<compile_context>
chip_gen: v6e
topology: v6e:2x2x1
jax: 0.10.0
libtpu: 0.0.40
codegen_flags: <defaults>
</compile_context>

<pallas_src>
import functools

import jax
import jax.numpy as jnp
from jax import lax
from jax.experimental import pallas as pl
from jax.experimental.pallas import tpu as pltpu

LANE = 128
_EPS = 1e-5
# Keep the per-grid-step f32 accumulator (rows x 128 lanes x 4 B) <= ~2 MiB.
_MAX_ACC_ROWS = 4096
# Below v7x's 64 MiB physical per-TC VMEM; plenty for these block sizes.
_VMEM_LIMIT = 48 * 1024 * 1024


def _round_up(x, m):
    return (x + m - 1) // m * m


def _pad_last(v, cp):
    # Zero padding is load-bearing: padded gamma/beta lanes must stay 0 so the
    # folded scale/shift of padded channels are exactly 0.
    c = v.shape[-1]
    if c == cp:
        return v
    return jnp.pad(v, [(0, 0)] * (v.ndim - 1) + [(0, cp - c)])


def _pick_nb(n, h, w, n_cout, max_rows=_MAX_ACC_ROWS):
    """Images per conv grid step (MXU M-dim batching for weight-tile reuse)."""
    divisors = [d for d in range(1, n + 1)
                if n % d == 0 and d * h * w <= max_rows]
    if not divisors:
        return 1
    # Prefer weight reuse, but keep >=2 iterations on the parallel grid axes
    # (batch blocks x cout tiles) so both v7x TensorCores stay busy if we can.
    good = [d for d in divisors if (n // d) * n_cout >= 2]
    return max(good) if good else max(divisors)


# ----------------------------------------------------------------------------
# Fused conv3x3 (+optional input-side BN+ReLU) + per-channel stat kernel
# ----------------------------------------------------------------------------
def _conv3x3_fused_kernel(*refs, apply_input_bn_relu, NB, H, W, pad_output):
    """grid = (batch blocks, cout tiles, cin tiles); cin is the reduction axis.

    inputs : xp (NB, H+2, W+2, CT_in) spatially zero-padded activation block
             w  (3, 3, CT_in, CT_out) bf16
             [in_scale, in_shift] (1,1,1,CT_in) f32 -- only if apply_input_bn_relu
    outputs: y (NB, [H+2|H], [W+2|W], CT_out) f32, chan_sum / chan_ssq (1,1,CT_out)
    scratch: acc (NB*H*W, CT_out) f32, [xbuf (NB,H+2,W+2,CT_in) bf16]
    """
    if apply_input_bn_relu:
        (xp_ref, w_ref, isc_ref, ish_ref,
         y_ref, sum_ref, ssq_ref, acc_ref, xbuf_ref) = refs
    else:
        (xp_ref, w_ref, y_ref, sum_ref, ssq_ref, acc_ref) = refs

    k = pl.program_id(2)
    nk = pl.num_programs(2)
    Hp, Wp = H + 2, W + 2

    if apply_input_bn_relu:
        # BN1 + ReLU of the previous conv applied to this input tile in f32,
        # then cast to bf16 for the MXU.  The 1-px halo must end up zero
        # ('same' padding pads the *post*-ReLU activation with zeros): mask the
        # two halo columns before the store, then zero the two halo rows with
        # cheap contiguous strip stores.  The halo is re-zeroed on every cin
        # step because xbuf is rewritten per k.
        # TODO(synk): dedupe this transform across cout tiles (it is redone
        #             n_cout times per input tile).
        xt = jnp.maximum(xp_ref[...] * isc_ref[...] + ish_ref[...], 0.0)
        ww = lax.broadcasted_iota(jnp.int32, xt.shape, 2)
        xt = jnp.where((ww >= 1) & (ww <= W), xt, 0.0)
        xbuf_ref[...] = xt.astype(xbuf_ref.dtype)
        zrow = jnp.zeros((NB, 1, Wp, xbuf_ref.shape[-1]), xbuf_ref.dtype)
        xbuf_ref[:, 0:1, :, :] = zrow
        xbuf_ref[:, H + 1:H + 2, :, :] = zrow
        src = xbuf_ref
    else:
        src = xp_ref

    cin_t = src.shape[-1]
    cout_t = acc_ref.shape[-1]
    M = NB * H * W

    # 9-tap conv as bf16 MXU matmuls with f32 accumulation in registers; a
    # single accumulator-ref update per grid step (not 9 read-modify-writes).
    acc = None
    for kh in range(3):
        for kw in range(3):
            patch = src[:, kh:kh + H, kw:kw + W, :].reshape(M, cin_t)
            if patch.dtype != jnp.bfloat16:
                patch = patch.astype(jnp.bfloat16)
            d = jnp.dot(patch, w_ref[kh, kw],
                        preferred_element_type=jnp.float32)
            acc = d if acc is None else acc + d

    @pl.when(k == 0)
    def _init():
        acc_ref[...] = acc

    @pl.when(k > 0)
    def _accumulate():
        acc_ref[...] += acc

    @pl.when(k == nk - 1)
    def _finalize():
        total = acc_ref[...]
        yv = total.reshape(NB, H, W, cout_t).astype(y_ref.dtype)
        if pad_output:
            # Emit a spatially pre-padded output (zero halo) so the next conv
            # needs no separate jnp.pad pass over this activation.
            y_ref[...] = jnp.zeros_like(y_ref)
            y_ref[:, 1:H + 1, 1:W + 1, :] = yv
        else:
            y_ref[...] = yv
        # Per-channel batch statistics fused here so the following BatchNorm
        # never needs another HBM pass over the activation.
        sum_ref[...] = jnp.sum(total, axis=0).reshape(1, 1, cout_t)
        ssq_ref[...] = jnp.sum(total * total, axis=0).reshape(1, 1, cout_t)


def conv3x3_fused(xp, w_hwio, in_scale=None, in_shift=None, pad_output=False):
    """3x3 'same' conv over a spatially pre-padded NHWC input.

    xp      : (N, H+2, W+2, CPin); bf16 for plain convs, f32 when the fused
              BN1+ReLU input transform is requested.
    w_hwio  : (3, 3, CPin, CPout) bf16, channels padded to multiples of 128.
    Returns (y, chan_sum, chan_ssq); stats are per-batch-block partial sums.
    """
    N, Hp, Wp, CPin = xp.shape
    H, W = Hp - 2, Wp - 2
    CPout = w_hwio.shape[-1]
    assert CPin % LANE == 0 and CPout % LANE == 0
    ct_in = ct_out = LANE
    n_cout, n_cin = CPout // ct_out, CPin // ct_in
    NB = _pick_nb(N, H, W, n_cout)
    nblk = N // NB
    grid = (nblk, n_cout, n_cin)

    apply_tf = in_scale is not None
    kern = functools.partial(_conv3x3_fused_kernel,
                             apply_input_bn_relu=apply_tf,
                             NB=NB, H=H, W=W, pad_output=pad_output)

    in_specs = [
        pl.BlockSpec((NB, Hp, Wp, ct_in), lambda i, j, k: (i, 0, 0, k)),
        pl.BlockSpec((3, 3, ct_in, ct_out), lambda i, j, k: (0, 0, k, j)),
    ]
    args = [xp, w_hwio]
    scratch = [pltpu.VMEM((NB * H * W, ct_out), jnp.float32)]
    if apply_tf:
        in_specs += [
            pl.BlockSpec((1, 1, 1, ct_in), lambda i, j, k: (0, 0, 0, k)),
            pl.BlockSpec((1, 1, 1, ct_in), lambda i, j, k: (0, 0, 0, k)),
        ]
        args += [in_scale, in_shift]
        scratch += [pltpu.VMEM((NB, Hp, Wp, ct_in), jnp.bfloat16)]

    if pad_output:
        y_shape = (N, Hp, Wp, CPout)
        y_spec = pl.BlockSpec((NB, Hp, Wp, ct_out), lambda i, j, k: (i, 0, 0, j))
    else:
        y_shape = (N, H, W, CPout)
        y_spec = pl.BlockSpec((NB, H, W, ct_out), lambda i, j, k: (i, 0, 0, j))

    out_shape = (
        jax.ShapeDtypeStruct(y_shape, jnp.float32),
        jax.ShapeDtypeStruct((nblk, 1, CPout), jnp.float32),
        jax.ShapeDtypeStruct((nblk, 1, CPout), jnp.float32),
    )
    out_specs = (
        y_spec,
        pl.BlockSpec((1, 1, ct_out), lambda i, j, k: (i, 0, j)),
        pl.BlockSpec((1, 1, ct_out), lambda i, j, k: (i, 0, j)),
    )

    flops = 2 * N * H * W * 9 * CPin * CPout
    bytes_accessed = (xp.size * xp.dtype.itemsize + w_hwio.size * 2
                      + 4 * N * y_shape[1] * y_shape[2] * CPout)
    cost = pl.CostEstimate(flops=flops, transcendentals=0,
                           bytes_accessed=bytes_accessed)

    return pl.pallas_call(
        kern,
        grid=grid,
        in_specs=in_specs,
        out_specs=out_specs,
        out_shape=out_shape,
        scratch_shapes=scratch,
        compiler_params=pltpu.CompilerParams(
            dimension_semantics=("parallel", "parallel", "arbitrary"),
            vmem_limit_bytes=_VMEM_LIMIT),
        cost_estimate=cost,
    )(*args)


# ----------------------------------------------------------------------------
# Fused epilogue: relu( bn2(y2) + identity_branch ), flattened lane-dense
# ----------------------------------------------------------------------------
def _epilogue_downsample_kernel(y2_ref, s2_ref, b2_ref,
                                yd_ref, sd_ref, bd_ref, o_ref):
    main = y2_ref[...] * s2_ref[...] + b2_ref[...]
    iden = yd_ref[...] * sd_ref[...] + bd_ref[...]
    o_ref[...] = jnp.maximum(main + iden, 0.0).astype(o_ref.dtype)


def _epilogue_identity_kernel(y2_ref, s2_ref, b2_ref, id_ref, o_ref):
    main = y2_ref[...] * s2_ref[...] + b2_ref[...]
    o_ref[...] = jnp.maximum(main + id_ref[...], 0.0).astype(o_ref.dtype)


def residual_epilogue(y2, scale2, shift2, identity, id_scale=None, id_shift=None):
    N, H, W, CP = y2.shape
    assert CP % LANE == 0 and identity.shape[-1] == CP
    rows = N * H * W
    y2f = y2.reshape(rows, CP)
    idf = identity.reshape(rows, CP)
    s2 = scale2.reshape(1, CP)
    b2 = shift2.reshape(1, CP)

    rb = rows                                    # fall back to a full block
    for cand in (2048, 1024, 512, 256, 128, 64, 32, 16, 8):
        if rows % cand == 0:
            rb = cand
            break
    grid = (rows // rb, CP // LANE)
    bs_act = pl.BlockSpec((rb, LANE), lambda i, j: (i, j))
    bs_vec = pl.BlockSpec((1, LANE), lambda i, j: (0, j))

    if id_scale is not None:
        kern = _epilogue_downsample_kernel
        in_specs = [bs_act, bs_vec, bs_vec, bs_act, bs_vec, bs_vec]
        args = (y2f, s2, b2, idf,
                id_scale.reshape(1, CP), id_shift.reshape(1, CP))
    else:
        kern = _epilogue_identity_kernel
        in_specs = [bs_act, bs_vec, bs_vec, bs_act]
        args = (y2f, s2, b2, idf)

    out = pl.pallas_call(
        kern,
        grid=grid,
        in_specs=in_specs,
        out_specs=bs_act,
        out_shape=jax.ShapeDtypeStruct((rows, CP), jnp.float32),
        compiler_params=pltpu.CompilerParams(
            dimension_semantics=("parallel", "parallel"),
            vmem_limit_bytes=_VMEM_LIMIT),
    )(*args)
    return out.reshape(N, H, W, CP)


# ----------------------------------------------------------------------------
# BN scale/shift fold (tiny per-channel arrays only — plain-JAX glue)
# ----------------------------------------------------------------------------
def _fold_bn(chan_sum, chan_ssq, count, gamma_p, beta_p, eps=_EPS):
    s = jnp.sum(chan_sum, axis=(0, 1))                 # (CP,)
    q = jnp.sum(chan_ssq, axis=(0, 1))                 # (CP,)
    mean = s / count
    var = jnp.maximum(q / count - mean * mean, 0.0)    # biased var (PyTorch)
    scale = gamma_p / jnp.sqrt(var + eps)
    shift = beta_p - mean * scale
    return scale, shift


# ----------------------------------------------------------------------------
# ResidualBlock forward
# ----------------------------------------------------------------------------
def residual_block(x_nchw, params):
    """x_nchw: (N, Cin, H, W) f32.  Returns (N, Cout, H, W) f32."""
    N, Cin, H, W = x_nchw.shape
    Cout = params["w1"].shape[0]
    CPin = _round_up(Cin, LANE)
    CPout = _round_up(Cout, LANE)
    count = N * H * W

    x = jnp.transpose(x_nchw, (0, 2, 3, 1))                       # NHWC
    xcp = jnp.pad(x, ((0, 0), (0, 0), (0, 0), (0, CPin - Cin)))   # f32 identity
    xp = jnp.pad(xcp, ((0, 0), (1, 1), (1, 1), (0, 0))).astype(jnp.bfloat16)

    def prep_w(w_oihw, cpi, cpo):
        w = jnp.transpose(w_oihw, (2, 3, 1, 0))                   # HWIO
        w = jnp.pad(w, ((0, 0), (0, 0),
                        (0, cpi - w.shape[2]), (0, cpo - w.shape[3])))
        return w.astype(jnp.bfloat16)                             # bf16 once

    g1 = _pad_last(params["gamma1"], CPout)
    b1 = _pad_last(params["beta1"], CPout)
    g2 = _pad_last(params["gamma2"], CPout)
    b2 = _pad_last(params["beta2"], CPout)

    # conv1: pre-padded f32 output (zero halo) + fused BN1 statistics
    y1p, s1, q1 = conv3x3_fused(xp, prep_w(params["w1"], CPin, CPout),
                                pad_output=True)
    scale1, shift1 = _fold_bn(s1, q1, count, g1, b1)

    # conv2: BN1+ReLU fused on its input path (+ fused BN2 statistics)
    y2, s2, q2 = conv3x3_fused(y1p, prep_w(params["w2"], CPout, CPout),
                               in_scale=scale1.reshape(1, 1, 1, CPout),
                               in_shift=shift1.reshape(1, 1, 1, CPout))
    scale2, shift2 = _fold_bn(s2, q2, count, g2, b2)

    if params["downsample"] is not None:
        dw, dg, db = params["downsample"]
        yd, sd, qd = conv3x3_fused(xp, prep_w(dw, CPin, CPout))
        scaled, shiftd = _fold_bn(sd, qd, count,
                                  _pad_last(dg, CPout), _pad_last(db, CPout))
        out = residual_epilogue(y2, scale2, shift2, yd, scaled, shiftd)
    else:
        assert Cin == Cout, "downsample=None requires Cin == Cout"
        out = residual_epilogue(y2, scale2, shift2, xcp)

    out = out[..., :Cout]
    return jnp.transpose(out, (0, 3, 1, 2))                       # NCHW


# ----------------------------------------------------------------------------
# Pure-JAX reference (correctness check only; matches the bf16 MXU operands)
# ----------------------------------------------------------------------------
def residual_block_ref(x_nchw, params):
    x = jnp.transpose(x_nchw, (0, 2, 3, 1))
    dn = ("NHWC", "HWIO", "NHWC")

    def conv(inp, w_oihw):
        w = jnp.transpose(w_oihw, (2, 3, 1, 0)).astype(jnp.bfloat16)
        return lax.conv_general_dilated(inp.astype(jnp.bfloat16), w, (1, 1),
                                        "SAME", dimension_numbers=dn,
                                        preferred_element_type=jnp.float32)

    def bn(y, g, b, eps=_EPS):
        m = jnp.mean(y, axis=(0, 1, 2))
        v = jnp.mean((y - m) ** 2, axis=(0, 1, 2))
        return (y - m) / jnp.sqrt(v + eps) * g + b

    if params["downsample"] is not None:
        dw, dg, db = params["downsample"]
        identity = bn(conv(x, dw), dg, db)
    else:
        identity = x

    h = jax.nn.relu(bn(conv(x, params["w1"]), params["gamma1"], params["beta1"]))
    y = bn(conv(h, params["w2"]), params["gamma2"], params["beta2"])
    out = jax.nn.relu(y + identity)
    return jnp.transpose(out, (0, 3, 1, 2))


# ----------------------------------------------------------------------------
# Main
# ----------------------------------------------------------------------------
if __name__ == "__main__":
    def make_params(cin, cout, ks):
        p = {
            "w1": jax.random.normal(ks[0], (cout, cin, 3, 3), jnp.float32) * 0.1,
            "w2": jax.random.normal(ks[1], (cout, cout, 3, 3), jnp.float32) * 0.1,
            "gamma1": 1.0 + 0.1 * jax.random.normal(ks[2], (cout,), jnp.float32),
            "beta1": 0.1 * jax.random.normal(ks[3], (cout,), jnp.float32),
            "gamma2": 1.0 + 0.1 * jax.random.normal(ks[4], (cout,), jnp.float32),
            "beta2": 0.1 * jax.random.normal(ks[5], (cout,), jnp.float32),
            "downsample": None,
        }
        if cin != cout:
            p["downsample"] = (
                jax.random.normal(ks[6], (cout, cin, 3, 3), jnp.float32) * 0.1,
                1.0 + 0.1 * jax.random.normal(ks[7], (cout,), jnp.float32),
                0.1 * jax.random.normal(ks[8], (cout,), jnp.float32),
            )
        return p

    key = jax.random.PRNGKey(0)
    N, H, W = 2, 16, 16

    # case 1: Cin != Cout (downsample branch); case 2: Cin == Cout (identity);
    # case 3: multi cin/cout tiles + batch-blocking (NB=2) exercised.
    for cin, cout in [(4, 8), (8, 8), (160, 160)]:
        key, *ks = jax.random.split(key, 11)
        params = make_params(cin, cout, ks)
        x = jax.random.normal(ks[9], (N, cin, H, W), jnp.float32)

        out = jax.block_until_ready(residual_block(x, params))
        ref = jax.block_until_ready(residual_block_ref(x, params))

        assert out.shape == (N, cout, H, W), out.shape
        err = float(jnp.max(jnp.abs(out - ref)))
        # bf16 MXU operands: only accumulation-order / BN-fold rounding differs
        # from the bf16-matched reference; 2e-2 leaves >10x margin while still
        # catching tiling / halo / stats bugs.
        assert err < 2e-2, (cin, cout, err)

    print("KERNEL_OK")
</pallas_src>

<mosaic_0001>
module attributes {stable_mosaic.version = 11 : i64} {
  func.func @_conv3x3_fused_kernel(%arg0: i32, %arg1: i32, %arg2: i32, %arg3: memref<1x18x18x128xbf16, #tpu.memory_space<vmem>>, %arg4: memref<3x3x128x128xbf16, #tpu.memory_space<vmem>>, %arg5: memref<1x18x18x128xf32, #tpu.memory_space<vmem>>, %arg6: memref<1x1x128xf32, #tpu.memory_space<vmem>>, %arg7: memref<1x1x128xf32, #tpu.memory_space<vmem>>, %arg8: memref<256x128xf32, #tpu.memory_space<vmem>>) attributes {dimension_semantics = [#tpu.dimension_semantics<parallel>, #tpu.dimension_semantics<parallel>, #tpu.dimension_semantics<arbitrary>], iteration_bounds = array<i64: 2, 1, 1>, scalar_prefetch = 0 : i64, scratch_operands = 1 : i64, tpu.core_type = #tpu.core_type<tc>, window_params = [{transform_indices = @transform_0, window_bounds = array<i64: 1, 18, 18, 128>}, {transform_indices = @transform_1, window_bounds = array<i64: 3, 3, 128, 128>}, {transform_indices = @transform_2, window_bounds = array<i64: 1, 18, 18, 128>}, {transform_indices = @transform_3, window_bounds = array<i64: 1, 1, 128>}, {transform_indices = @transform_4, window_bounds = array<i64: 1, 1, 128>}]} {
    %c0 = arith.constant 0 : index
    %c0_0 = arith.constant 0 : index
    %c0_1 = arith.constant 0 : index
    %c0_2 = arith.constant 0 : index
    %0 = vector.load %arg3[%c0, %c0_0, %c0_1, %c0_2] : memref<1x18x18x128xbf16, #tpu.memory_space<vmem>>, vector<1x16x16x128xbf16>
    %1 = vector.shape_cast %0 : vector<1x16x16x128xbf16> to vector<256x128xbf16>
    %c0_3 = arith.constant 0 : index
    %c0_4 = arith.constant 0 : index
    %c0_5 = arith.constant 0 : index
    %c0_6 = arith.constant 0 : index
    %2 = vector.load %arg4[%c0_3, %c0_4, %c0_5, %c0_6] : memref<3x3x128x128xbf16, #tpu.memory_space<vmem>>, vector<1x1x128x128xbf16>
    %3 = vector.shape_cast %2 : vector<1x1x128x128xbf16> to vector<128x128xbf16>
    %cst = arith.constant dense<0.000000e+00> : vector<256x128xf32>
    %4 = tpu.matmul %1, %3, %cst {dimension_numbers = #tpu.dot_dimension_numbers<[1], [0], [0], [1], [0, 0, 1, 1], [], []>} : vector<256x128xbf16>, vector<128x128xbf16>, vector<256x128xf32> -> vector<256x128xf32>
    %c0_7 = arith.constant 0 : index
    %c0_8 = arith.constant 0 : index
    %c1 = arith.constant 1 : index
    %c0_9 = arith.constant 0 : index
    %5 = vector.load %arg3[%c0_7, %c0_8, %c1, %c0_9] : memref<1x18x18x128xbf16, #tpu.memory_space<vmem>>, vector<1x16x16x128xbf16>
    %6 = vector.shape_cast %5 : vector<1x16x16x128xbf16> to vector<256x128xbf16>
    %c0_10 = arith.constant 0 : index
    %c1_11 = arith.constant 1 : index
    %c0_12 = arith.constant 0 : index
    %c0_13 = arith.constant 0 : index
    %7 = vector.load %arg4[%c0_10, %c1_11, %c0_12, %c0_13] : memref<3x3x128x128xbf16, #tpu.memory_space<vmem>>, vector<1x1x128x128xbf16>
    %8 = vector.shape_cast %7 : vector<1x1x128x128xbf16> to vector<128x128xbf16>
    %cst_14 = arith.constant dense<0.000000e+00> : vector<256x128xf32>
    %9 = tpu.matmul %6, %8, %cst_14 {dimension_numbers = #tpu.dot_dimension_numbers<[1], [0], [0], [1], [0, 0, 1, 1], [], []>} : vector<256x128xbf16>, vector<128x128xbf16>, vector<256x128xf32> -> vector<256x128xf32>
    %10 = arith.addf %4, %9 : vector<256x128xf32>
    %c0_15 = arith.constant 0 : index
    %c0_16 = arith.constant 0 : index
    %c2 = arith.constant 2 : index
    %c0_17 = arith.constant 0 : index
    %11 = vector.load %arg3[%c0_15, %c0_16, %c2, %c0_17] : memref<1x18x18x128xbf16, #tpu.memory_space<vmem>>, vector<1x16x16x128xbf16>
    %12 = vector.shape_cast %11 : vector<1x16x16x128xbf16> to vector<256x128xbf16>
    %c0_18 = arith.constant 0 : index
    %c2_19 = arith.constant 2 : index
    %c0_20 = arith.constant 0 : index
    %c0_21 = arith.constant 0 : index
    %13 = vector.load %arg4[%c0_18, %c2_19, %c0_20, %c0_21] : memref<3x3x128x128xbf16, #tpu.memory_space<vmem>>, vector<1x1x128x128xbf16>
    %14 = vector.shape_cast %13 : vector<1x1x128x128xbf16> to vector<128x128xbf16>
    %cst_22 = arith.constant dense<0.000000e+00> : vector<256x128xf32>
    %15 = tpu.matmul %12, %14, %cst_22 {dimension_numbers = #tpu.dot_dimension_numbers<[1], [0], [0], [1], [0, 0, 1, 1], [], []>} : vector<256x128xbf16>, vector<128x128xbf16>, vector<256x128xf32> -> vector<256x128xf32>
    %16 = arith.addf %10, %15 : vector<256x128xf32>
    %c0_23 = arith.constant 0 : index
    %c1_24 = arith.constant 1 : index
    %c0_25 = arith.constant 0 : index
    %c0_26 = arith.constant 0 : index
    %17 = vector.load %arg3[%c0_23, %c1_24, %c0_25, %c0_26] : memref<1x18x18x128xbf16, #tpu.memory_space<vmem>>, vector<1x16x16x128xbf16>
    %18 = vector.shape_cast %17 : vector<1x16x16x128xbf16> to vector<256x128xbf16>
    %c1_27 = arith.constant 1 : index
    %c0_28 = arith.constant 0 : index
    %c0_29 = arith.constant 0 : index
    %c0_30 = arith.constant 0 : index
    %19 = vector.load %arg4[%c1_27, %c0_28, %c0_29, %c0_30] : memref<3x3x128x128xbf16, #tpu.memory_space<vmem>>, vector<1x1x128x128xbf16>
    %20 = vector.shape_cast %19 : vector<1x1x128x128xbf16> to vector<128x128xbf16>
    %cst_31 = arith.constant dense<0.000000e+00> : vector<256x128xf32>
    %21 = tpu.matmul %18, %20, %cst_31 {dimension_numbers = #tpu.dot_dimension_numbers<[1], [0], [0], [1], [0, 0, 1, 1], [], []>} : vector<256x128xbf16>, vector<128x128xbf16>, vector<256x128xf32> -> vector<256x128xf32>
    %22 = arith.addf %16, %21 : vector<256x128xf32>
    %c0_32 = arith.constant 0 : index
    %c1_33 = arith.constant 1 : index
    %c1_34 = arith.constant 1 : index
    %c0_35 = arith.constant 0 : index
    %23 = vector.load %arg3[%c0_32, %c1_33, %c1_34, %c0_35] : memref<1x18x18x128xbf16, #tpu.memory_space<vmem>>, vector<1x16x16x128xbf16>
    %24 = vector.shape_cast %23 : vector<1x16x16x128xbf16> to vector<256x128xbf16>
    %c1_36 = arith.constant 1 : index
    %c1_37 = arith.constant 1 : index
    %c0_38 = arith.constant 0 : index
    %c0_39 = arith.constant 0 : index
    %25 = vector.load %arg4[%c1_36, %c1_37, %c0_38, %c0_39] : memref<3x3x128x128xbf16, #tpu.memory_space<vmem>>, vector<1x1x128x128xbf16>
    %26 = vector.shape_cast %25 : vector<1x1x128x128xbf16> to vector<128x128xbf16>
    %cst_40 = arith.constant dense<0.000000e+00> : vector<256x128xf32>
    %27 = tpu.matmul %24, %26, %cst_40 {dimension_numbers = #tpu.dot_dimension_numbers<[1], [0], [0], [1], [0, 0, 1, 1], [], []>} : vector<256x128xbf16>, vector<128x128xbf16>, vector<256x128xf32> -> vector<256x128xf32>
    %28 = arith.addf %22, %27 : vector<256x128xf32>
    %c0_41 = arith.constant 0 : index
    %c1_42 = arith.constant 1 : index
    %c2_43 = arith.constant 2 : index
    %c0_44 = arith.constant 0 : index
    %29 = vector.load %arg3[%c0_41, %c1_42, %c2_43, %c0_44] : memref<1x18x18x128xbf16, #tpu.memory_space<vmem>>, vector<1x16x16x128xbf16>
    %30 = vector.shape_cast %29 : vector<1x16x16x128xbf16> to vector<256x128xbf16>
    %c1_45 = arith.constant 1 : index
    %c2_46 = arith.constant 2 : index
    %c0_47 = arith.constant 0 : index
    %c0_48 = arith.constant 0 : index
    %31 = vector.load %arg4[%c1_45, %c2_46, %c0_47, %c0_48] : memref<3x3x128x128xbf16, #tpu.memory_space<vmem>>, vector<1x1x128x128xbf16>
    %32 = vector.shape_cast %31 : vector<1x1x128x128xbf16> to vector<128x128xbf16>
    %cst_49 = arith.constant dense<0.000000e+00> : vector<256x128xf32>
    %33 = tpu.matmul %30, %32, %cst_49 {dimension_numbers = #tpu.dot_dimension_numbers<[1], [0], [0], [1], [0, 0, 1, 1], [], []>} : vector<256x128xbf16>, vector<128x128xbf16>, vector<256x128xf32> -> vector<256x128xf32>
    %34 = arith.addf %28, %33 : vector<256x128xf32>
    %c0_50 = arith.constant 0 : index
    %c2_51 = arith.constant 2 : index
    %c0_52 = arith.constant 0 : index
    %c0_53 = arith.constant 0 : index
    %35 = vector.load %arg3[%c0_50, %c2_51, %c0_52, %c0_53] : memref<1x18x18x128xbf16, #tpu.memory_space<vmem>>, vector<1x16x16x128xbf16>
    %36 = vector.shape_cast %35 : vector<1x16x16x128xbf16> to vector<256x128xbf16>
    %c2_54 = arith.constant 2 : index
    %c0_55 = arith.constant 0 : index
    %c0_56 = arith.constant 0 : index
    %c0_57 = arith.constant 0 : index
    %37 = vector.load %arg4[%c2_54, %c0_55, %c0_56, %c0_57] : memref<3x3x128x128xbf16, #tpu.memory_space<vmem>>, vector<1x1x128x128xbf16>
    %38 = vector.shape_cast %37 : vector<1x1x128x128xbf16> to vector<128x128xbf16>
    %cst_58 = arith.constant dense<0.000000e+00> : vector<256x128xf32>
    %39 = tpu.matmul %36, %38, %cst_58 {dimension_numbers = #tpu.dot_dimension_numbers<[1], [0], [0], [1], [0, 0, 1, 1], [], []>} : vector<256x128xbf16>, vector<128x128xbf16>, vector<256x128xf32> -> vector<256x128xf32>
    %40 = arith.addf %34, %39 : vector<256x128xf32>
    %c0_59 = arith.constant 0 : index
    %c2_60 = arith.constant 2 : index
    %c1_61 = arith.constant 1 : index
    %c0_62 = arith.constant 0 : index
    %41 = vector.load %arg3[%c0_59, %c2_60, %c1_61, %c0_62] : memref<1x18x18x128xbf16, #tpu.memory_space<vmem>>, vector<1x16x16x128xbf16>
    %42 = vector.shape_cast %41 : vector<1x16x16x128xbf16> to vector<256x128xbf16>
    %c2_63 = arith.constant 2 : index
    %c1_64 = arith.constant 1 : index
    %c0_65 = arith.constant 0 : index
    %c0_66 = arith.constant 0 : index
    %43 = vector.load %arg4[%c2_63, %c1_64, %c0_65, %c0_66] : memref<3x3x128x128xbf16, #tpu.memory_space<vmem>>, vector<1x1x128x128xbf16>
    %44 = vector.shape_cast %43 : vector<1x1x128x128xbf16> to vector<128x128xbf16>
    %cst_67 = arith.constant dense<0.000000e+00> : vector<256x128xf32>
    %45 = tpu.matmul %42, %44, %cst_67 {dimension_numbers = #tpu.dot_dimension_numbers<[1], [0], [0], [1], [0, 0, 1, 1], [], []>} : vector<256x128xbf16>, vector<128x128xbf16>, vector<256x128xf32> -> vector<256x128xf32>
    %46 = arith.addf %40, %45 : vector<256x128xf32>
    %c0_68 = arith.constant 0 : index
    %c2_69 = arith.constant 2 : index
    %c2_70 = arith.constant 2 : index
    %c0_71 = arith.constant 0 : index
    %47 = vector.load %arg3[%c0_68, %c2_69, %c2_70, %c0_71] : memref<1x18x18x128xbf16, #tpu.memory_space<vmem>>, vector<1x16x16x128xbf16>
    %48 = vector.shape_cast %47 : vector<1x16x16x128xbf16> to vector<256x128xbf16>
    %c2_72 = arith.constant 2 : index
    %c2_73 = arith.constant 2 : index
    %c0_74 = arith.constant 0 : index
    %c0_75 = arith.constant 0 : index
    %49 = vector.load %arg4[%c2_72, %c2_73, %c0_74, %c0_75] : memref<3x3x128x128xbf16, #tpu.memory_space<vmem>>, vector<1x1x128x128xbf16>
    %50 = vector.shape_cast %49 : vector<1x1x128x128xbf16> to vector<128x128xbf16>
    %cst_76 = arith.constant dense<0.000000e+00> : vector<256x128xf32>
    %51 = tpu.matmul %48, %50, %cst_76 {dimension_numbers = #tpu.dot_dimension_numbers<[1], [0], [0], [1], [0, 0, 1, 1], [], []>} : vector<256x128xbf16>, vector<128x128xbf16>, vector<256x128xf32> -> vector<256x128xf32>
    %52 = arith.addf %46, %51 : vector<256x128xf32>
    %c0_i32 = arith.constant 0 : i32
    %53 = arith.cmpi eq, %arg2, %c0_i32 : i32
    %54 = arith.extui %53 : i1 to i32
    %c0_i32_77 = arith.constant 0 : i32
    %55 = arith.cmpi ne, %54, %c0_i32_77 : i32
    scf.if %55 {
      %c0_82 = arith.constant 0 : index
      %c0_83 = arith.constant 0 : index
      %62 = vector.load %arg8[%c0_82, %c0_83] : memref<256x128xf32, #tpu.memory_space<vmem>>, vector<256x128xf32>
      tpu.vector_store %arg8[%c0_82, %c0_83], %52 {strides = array<i32>} : memref<256x128xf32, #tpu.memory_space<vmem>>, vector<256x128xf32>,
    } else {
    }
    %c0_i32_78 = arith.constant 0 : i32
    %56 = arith.cmpi sgt, %arg2, %c0_i32_78 : i32
    %57 = arith.extui %56 : i1 to i32
    %c0_i32_79 = arith.constant 0 : i32
    %58 = arith.cmpi ne, %57, %c0_i32_79 : i32
    scf.if %58 {
      %c0_82 = arith.constant 0 : index
      %c0_83 = arith.constant 0 : index
      %62 = vector.load %arg8[%c0_82, %c0_83] : memref<256x128xf32, #tpu.memory_space<vmem>>, vector<256x128xf32>
      %63 = arith.addf %62, %52 : vector<256x128xf32>
      %c0_84 = arith.constant 0 : index
      %c0_85 = arith.constant 0 : index
      %64 = vector.load %arg8[%c0_84, %c0_85] : memref<256x128xf32, #tpu.memory_space<vmem>>, vector<256x128xf32>
      tpu.vector_store %arg8[%c0_84, %c0_85], %63 {strides = array<i32>} : memref<256x128xf32, #tpu.memory_space<vmem>>, vector<256x128xf32>,
    } else {
    }
    %c0_i32_80 = arith.constant 0 : i32
    %59 = arith.cmpi eq, %arg2, %c0_i32_80 : i32
    %60 = arith.extui %59 : i1 to i32
    %c0_i32_81 = arith.constant 0 : i32
    %61 = arith.cmpi ne, %60, %c0_i32_81 : i32
    scf.if %61 {
      %c0_82 = arith.constant 0 : index
      %c0_83 = arith.constant 0 : index
      %62 = vector.load %arg8[%c0_82, %c0_83] : memref<256x128xf32, #tpu.memory_space<vmem>>, vector<256x128xf32>
      %63 = vector.shape_cast %62 : vector<256x128xf32> to vector<1x16x16x128xf32>
      %cst_84 = arith.constant 0.000000e+00 : f32
      %64 = vector.broadcast %cst_84 : f32 to vector<1x18x18x128xf32>
      %c0_85 = arith.constant 0 : index
      %c0_86 = arith.constant 0 : index
      %c0_87 = arith.constant 0 : index
      %c0_88 = arith.constant 0 : index
      %65 = vector.load %arg5[%c0_85, %c0_86, %c0_87, %c0_88] : memref<1x18x18x128xf32, #tpu.memory_space<vmem>>, vector<1x18x18x128xf32>
      tpu.vector_store %arg5[%c0_85, %c0_86, %c0_87, %c0_88], %64 {strides = array<i32>} : memref<1x18x18x128xf32, #tpu.memory_space<vmem>>, vector<1x18x18x128xf32>,
      %c0_89 = arith.constant 0 : index
      %c1_90 = arith.constant 1 : index
      %c1_91 = arith.constant 1 : index
      %c0_92 = arith.constant 0 : index
      %66 = vector.load %arg5[%c0_89, %c1_90, %c1_91, %c0_92] : memref<1x18x18x128xf32, #tpu.memory_space<vmem>>, vector<1x16x16x128xf32>
      tpu.vector_store %arg5[%c0_89, %c1_90, %c1_91, %c0_92], %63 {strides = array<i32>} : memref<1x18x18x128xf32, #tpu.memory_space<vmem>>, vector<1x16x16x128xf32>,
      %cst_93 = arith.constant dense<0.000000e+00> : vector<128xf32>
      %67 = vector.multi_reduction <add>, %62, %cst_93 [0] : vector<256x128xf32> to vector<128xf32>
      %68 = vector.shape_cast %67 : vector<128xf32> to vector<1x1x128xf32>
      %c0_94 = arith.constant 0 : index
      %c0_95 = arith.constant 0 : index
      %c0_96 = arith.constant 0 : index
      %69 = vector.load %arg6[%c0_94, %c0_95, %c0_96] : memref<1x1x128xf32, #tpu.memory_space<vmem>>, vector<1x1x128xf32>
      tpu.vector_store %arg6[%c0_94, %c0_95, %c0_96], %68 {strides = array<i32>} : memref<1x1x128xf32, #tpu.memory_space<vmem>>, vector<1x1x128xf32>,
      %70 = arith.mulf %62, %62 : vector<256x128xf32>
      %cst_97 = arith.constant dense<0.000000e+00> : vector<128xf32>
      %71 = vector.multi_reduction <add>, %70, %cst_97 [0] : vector<256x128xf32> to vector<128xf32>
      %72 = vector.shape_cast %71 : vector<128xf32> to vector<1x1x128xf32>
      %c0_98 = arith.constant 0 : index
      %c0_99 = arith.constant 0 : index
      %c0_100 = arith.constant 0 : index
      %73 = vector.load %arg7[%c0_98, %c0_99, %c0_100] : memref<1x1x128xf32, #tpu.memory_space<vmem>>, vector<1x1x128xf32>
      tpu.vector_store %arg7[%c0_98, %c0_99, %c0_100], %72 {strides = array<i32>} : memref<1x1x128xf32, #tpu.memory_space<vmem>>, vector<1x1x128xf32>,
    } else {
    }
    return
  }
  func.func @transform_0(%arg0: i32, %arg1: i32, %arg2: i32) -> (i32, i32, i32, i32) {
    %c0_i32 = arith.constant 0 : i32
    %c0_i32_0 = arith.constant 0 : i32
    %c0_i32_1 = arith.constant 0 : i32
    return %arg0, %c0_i32, %c0_i32_0, %arg2 : i32, i32, i32, i32
  }
  func.func @transform_1(%arg0: i32, %arg1: i32, %arg2: i32) -> (i32, i32, i32, i32) {
    %c0_i32 = arith.constant 0 : i32
    %c0_i32_0 = arith.constant 0 : i32
    %c0_i32_1 = arith.constant 0 : i32
    return %c0_i32, %c0_i32_0, %arg2, %arg1 : i32, i32, i32, i32
  }
  func.func @transform_2(%arg0: i32, %arg1: i32, %arg2: i32) -> (i32, i32, i32, i32) {
    %c0_i32 = arith.constant 0 : i32
    %c0_i32_0 = arith.constant 0 : i32
    %c0_i32_1 = arith.constant 0 : i32
    return %arg0, %c0_i32, %c0_i32_0, %arg1 : i32, i32, i32, i32
  }
  func.func @transform_3(%arg0: i32, %arg1: i32, %arg2: i32) -> (i32, i32, i32) {
    %c0_i32 = arith.constant 0 : i32
    %c0_i32_0 = arith.constant 0 : i32
    return %arg0, %c0_i32, %arg1 : i32, i32, i32
  }
  func.func @transform_4(%arg0: i32, %arg1: i32, %arg2: i32) -> (i32, i32, i32) {
    %c0_i32 = arith.constant 0 : i32
    %c0_i32_0 = arith.constant 0 : i32
    return %arg0, %c0_i32, %arg1 : i32, i32, i32
  }
}

</mosaic_0001>

<bundles_post_ra>
// kernel: tpu_custom_call.1
= control target key start
LH: loop header
LB: loop body
LE: loop exit
PB: predicated region body
PF: predicated region fallthrough
CT: control target
= control target key end

     0   :  { %10 = vsyncpa [#allocation4], 0  ;;  %s10169_s0 = inlined_call_operand.vmem [shape: bf16[2,18,18,128], index: 0, kind: input, shape index: {}]   ;;  %s10170_s1 = inlined_call_operand.vmem [shape: bf16[3,3,128,128], index: 1, kind: input, shape index: {}]   ;;  %s10171_s2 = inlined_call_operand.vmem [shape: f32[2,18,18,128], index: 2, kind: output, shape index: {0}]   ;;  %s10172_s3 = inlined_call_operand.hbm [shape: f32[2,1,128], index: 3, kind: output, shape index: {1}]   ;;  %s10173_s4 = inlined_call_operand.hbm [shape: f32[2,1,128], index: 4, kind: output, shape index: {2}]  }
   0x1   :  { %12 = vsyncpa [#allocation4 + $0x1], 0 }
   0x2   :  { %13 = vsyncpa [#allocation6], 0 }
   0x3   :  { %15 = vsyncpa [#allocation6 + $0x1], 0  ;;  %s7287_s15 = smov 0   ;;  %s7289_s16 = smov 0  }
   0x4   :  { %s7291_s17 = smov 0   ;;  %s7293_s18 = smov 0  }
   0x5   :  { %s7295_s19 = smov 0   ;;  %s7297_s20 = smov 0  }
   0x6 LB: > { %s5667_s21 = sadd.s32 4294967295, %s7257_s20   ;;  %s5668_s22 = sadd.s32 4294967294, %s7257_s20   ;;  %s7257_s20 = sphi %s7297_s20, %s21_s20   ;;  %s7253_s19 = sphi %s7295_s19, %s10427_s19   ;;  %s7249_s18 = sphi %s7293_s18, %s10426_s18   ;;  %s7245_s17 = sphi %s7291_s17, %s10425_s17   ;;  %s7241_s16 = sphi %s7289_s16, %s10424_s16   ;;  %s7237_s15 = sphi %s7287_s15, %s10423_s15  }
   0x7   : > { %s40_s23 = sadd.s32 1, %s7253_s19  ;;  %s133_s24 = sadd.s32 1, %s7245_s17 }
   0x8   : > { %p42_p0 = scmp.ge.s32.totalorder %s40_s23, 2  ;;  %p143_p1 = scmp.ne.s32.totalorder %s7245_s17, %s7241_s16 }
   0x9   : > { %p144_p2 = scmp.eq.s32.totalorder %s5667_s21, 1  ;;  %p149_p3 = scmp.ne.s32.totalorder %s7241_s16, %s7237_s15 }
   0xa   : > { %s10429_s23 = smov (%p42_p0, %s40_s23), 0  ;;  %p150_p5 = scmp.eq.s32.totalorder %s5668_s22, 1 }
   0xb   : > { %p7327_p4 = por %p144_p2, %p143_p1  ;;  %s128_s26 = ssub.s32 %s7253_s19, %s10429_s23 }
   0xc   : > { %p5672_p6 = scmp.ge.s32.totalorder %s7257_s20, 1  ;;  %p131_p7 = scmp.eq.s32.totalorder %s128_s26, 0 }
   0xd   : > { %p7334_p8 = por %p150_p5, %p149_p3  ;;  %p219_p9 = scmp.lt.s32.totalorder %s7257_s20, 3 }
   0xe   : > { %s7340_s28 = scalar_select %p131_p7, %s7245_s17, %s133_s24  }
   0xf   : > { %p220_p10 = pnand %p5672_p6, %p219_p9 }
  0x11   : > { %223 = sbr.rel (%p220_p10) target bundleno = 617 (0x269), region = 28 }
  0x16   : > { %v7022_v0 = vld [vmem:[%s10170_s1 + $0x78] sm:$0xff]   ;;  %p267_p11 = scmp.lt.s32.totalorder %s7249_s18, 1  ;;  %v7023_v1 = vld [vmem:[%s10170_s1 + $0x70] sm:$0xff]   ;;  %v7024_v2 = vld [vmem:[%s10170_s1 + $0x68] sm:$0xff]   ;;  %vm357_vm0 = vsmask.f32 3328 }
  0x17   : > { %6511 = vmatprep.subr.bf16.mxu0 %v7022_v0  ;;  %6943 = vmatprep.subr.bf16.mxu1 %v7022_v0  ;;  %v7025_v3 = vld [vmem:[%s10170_s1 + $0x60] sm:$0xff]   ;;  %vm358_vm1 = vsmask.f32 7440  ;;  %v7026_v17 = vld [vmem:[%s10170_s1 + $0x58] sm:$0xff]   ;;  %v7027_v33 = vld [vmem:[%s10170_s1 + $0x50] sm:$0xff]   ;;  %vm1387_vm3 = vcmask 1042432  }
  0x18   : > { %s7350_s7 = scalar_select %p267_p11, %s7249_s18, 1  ;;  %6512 = vmatpush3.bf16.msra.mxu0 %v7022_v0  ;;  %6951 = vmatpush3.bf16.msra.mxu1 %v7022_v0  ;;  %vm7390_vm2 = vmor %vm357_vm0, %vm358_vm1  ;;  %v7028_v58 = vld [vmem:[%s10170_s1 + $0x48] sm:$0xff]   ;;  %vm1388_vm4 = vcmask 1046532  }
  0x19   : > { %6513 = vmatprep.subr.bf16.mxu0 %v7023_v1  ;;  %6944 = vmatprep.subr.bf16.mxu1 %v7023_v1  ;;  %vm7701_vm5 = vmor %vm1387_vm3, %vm1388_vm4  ;;  %s6291_s21 = sshll.u32 %s7249_s18, 4  ;;  %s7260_s11 = smov [#allocation3]  }
  0x1a   : > { %s6959_s10 = smul.u32 216, %s7350_s7  ;;  %s10092_s6 = scalar_lea.hbm %s10172_s3, %s6291_s21 }
  0x1b   : > { %s10099_s9 = scalar_lea.hbm %s10173_s4, %s6291_s21  ;;  %s7155_s12 = sshll.u32 %s7260_s11, 4  ;;  %s7156_s12 = int_to_ptr.vmem [resolvable:$false] %s7155_s12 }
  0x1c   : > { %s7359_s13 = scalar_lea.vmem %s10169_s0, %s6959_s10  ;;  %6514 = vmatpush3.bf16.msra.mxu0 %v7023_v1  ;;  %6952 = vmatpush3.bf16.msra.mxu1 %v7023_v1 }
  0x1d   : > { %6515 = vmatprep.subr.bf16.mxu0 %v7024_v2  ;;  %6945 = vmatprep.subr.bf16.mxu1 %v7024_v2  ;;  %v7365_v4 = vld [vmem:[%s7359_s13] sm:$0xf]  ;;  %v7368_v5 = vld [vmem:[%s7359_s13 + $0x4] sm:$0xf]  ;;  %v7371_v6 = vld [vmem:[%s7359_s13 + $0x8] sm:$0x1] }
  0x1e   : > { %v361_v7 = vshrl.u32 %v7365_v4, 16  ;;  %v364_v8 = vshll.u32 %v7365_v4, 16  ;;  %v370_v9 = vshll.u32 %v7368_v5, 16  ;;  %v374_v10 = vshrl.u32 %v7368_v5, 16  ;;  %v309_v12 = vld [vmem:[%s7359_s13 + $0x60] sm:$0xf] }
  0x1f   : > { %v380_v11 = vshll.u32 %v7371_v6, 16  ;;  %v310_v15 = vld [vmem:[%s7359_s13 + $0x64] sm:$0xf]  ;;  %v349_v16 = vld [vmem:[%s7359_s13 + $0x68] sm:$0x1]  ;;  %v553_v21 = vshrl.u32 %v309_v12, 16 }
  0x20   : > { %6516 = vmatpush3.bf16.msra.mxu0 %v7024_v2  ;;  %6953 = vmatpush3.bf16.msra.mxu1 %v7024_v2  ;;  %v363_v13 = vrot.slane %v361_v7, 4  ;;  %v366_v14 = vrot.slane %v364_v8, 5  ;;  %v372_v18 = vrot.slane %v370_v9, 5  ;;  %v376_v19 = vrot.slane %v374_v10, 4  ;;  %v7386_v26 = vld [vmem:[%s7359_s13 + $0xc] sm:$0xf] }
  0x21   : > { %6517 = vmatprep.subr.bf16.mxu0 %v7025_v3  ;;  %6946 = vmatprep.subr.bf16.mxu1 %v7025_v3  ;;  %v556_v23 = vshll.u32 %v309_v12, 16  ;;  %v562_v24 = vshll.u32 %v310_v15, 16  ;;  %v566_v25 = vshrl.u32 %v310_v15, 16  ;;  %v382_v29 = vrot.slane %v380_v11, 5  ;;  %v7395_v32 = vld [vmem:[%s7359_s13 + $0x10] sm:$0xf] }
  0x22   : > { %v367_v22 = vor.u32 %v366_v14, %v363_v13  ;;  %v377_v28 = vor.u32 %v376_v19, %v372_v18  ;;  %v555_v30 = vrot.slane %v553_v21, 4  ;;  %v572_v31 = vshll.u32 %v349_v16, 16  ;;  %v7401_v40 = vld [vmem:[%s7359_s13 + $0x14] sm:$0x1]  ;;  %v311_v47 = vld [vmem:[%s7359_s13 + $0x6c] sm:$0xf] }
  0x23   : > { %v558_v35 = vrot.slane %v556_v23, 5  ;;  %v564_v36 = vrot.slane %v562_v24, 5  ;;  %v568_v37 = vrot.slane %v566_v25, 4  ;;  %v385_v41 = vshrl.u32 %v7386_v26, 16  ;;  %v312_v52 = vld [vmem:[%s7359_s13 + $0x70] sm:$0xf] }
  0x24   : > { %6518 = vmatpush3.bf16.msra.mxu0 %v7025_v3  ;;  %6954 = vmatpush3.bf16.msra.mxu1 %v7025_v3  ;;  %v368_v34 = vrot.slane %v367_v22, 4  ;;  %v378_v38 = vrot.slane %v377_v28, 4  ;;  %v574_v39 = vrot.slane %v572_v31, 5  ;;  %v388_v42 = vshll.u32 %v7386_v26, 16  ;;  %v350_v57 = vld [vmem:[%s7359_s13 + $0x74] sm:$0x1] }
  0x25   : > { %6519 = vmatprep.subr.bf16.mxu0 %v7026_v17  ;;  %6947 = vmatprep.subr.bf16.mxu1 %v7026_v17  ;;  %v559_v44 = vor.u32 %v558_v35, %v555_v30  ;;  %v569_v45 = vor.u32 %v568_v37, %v564_v36  ;;  %v394_v46 = vshll.u32 %v7395_v32, 16  ;;  %v387_v49 = vrot.slane %v385_v41, 4  ;;  %v7424_v14 = vld [vmem:[%s7359_s13 + $0x18] sm:$0xf]  ;;  %v7029_v15 = vld [vmem:[%s10170_s1 + $0x40] sm:$0xff]  }
  0x26   : > { %v373_v43 = vsel %vm7390_vm2, %v368_v34, %v372_v18  ;;  %v383_v48 = vsel %vm7390_vm2, %v378_v38, %v382_v29  ;;  %v390_v50 = vrot.slane %v388_v42, 5  ;;  %v398_v51 = vshrl.u32 %v7395_v32, 16  ;;  %v7432_v19 = vld [vmem:[%s7359_s13 + $0x1c] sm:$0xf]  ;;  %v7437_v25 = vld [vmem:[%s7359_s13 + $0x20] sm:$0x1] }
  0x27   : > { %v5691_v53 = vcombine.low %v373_v43, %v383_v48  ;;  %v560_v54 = vrot.slane %v559_v44, 4  ;;  %v570_v55 = vrot.slane %v569_v45, 4  ;;  %v396_v56 = vrot.slane %v394_v46, 5  ;;  %v313_v34 = vld [vmem:[%s7359_s13 + $0x78] sm:$0xf] }
  0x28   : > { %6520 = vmatpush3.bf16.msra.mxu0 %v7026_v17  ;;  %6955 = vmatpush3.bf16.msra.mxu1 %v7026_v17  ;;  %v391_v59 = vor.u32 %v390_v50, %v387_v49  ;;  %v400_v60 = vrot.slane %v398_v51, 4  ;;  %v404_v61 = vshll.u32 %v7401_v40, 16  ;;  %v577_v1 = vshrl.u32 %v311_v47, 16  ;;  %v7030_v41 = vld [vmem:[%s10170_s1 + $0x38] sm:$0xff]   ;;  %v351_v49 = vld [vmem:[%s7359_s13 + $0x80] sm:$0x1] }
  0x29   : > { %6521 = vmatprep.subr.bf16.mxu0 %v7027_v33  ;;  %6948 = vmatprep.subr.bf16.mxu1 %v7027_v33  ;;  %v565_v63 = vsel %vm7390_vm2, %v560_v54, %v564_v36  ;;  %v575_v0 = vsel %vm7390_vm2, %v570_v55, %v574_v39  ;;  %v580_v2 = vshll.u32 %v311_v47, 16  ;;  %v586_v12 = vshll.u32 %v312_v52, 16  ;;  %v7446_v39 = vld [vmem:[%s7359_s13 + $0x7c] sm:$0xf] }
  0x2a   : > { %6527 = vmatprep.mubr.bf16.mxu0 %v5691_v53  ;;  %v5699_v3 = vcombine.low %v565_v63, %v575_v0  ;;  %v392_v7 = vrot.slane %v391_v59, 4  ;;  %v401_v8 = vor.u32 %v400_v60, %v396_v56  ;;  %v406_v9 = vrot.slane %v404_v61, 5  ;;  %v7031_v42 = vld [vmem:[%s10170_s1 + $0xb8] sm:$0xff]   ;;  %v7033_v59 = vld [vmem:[%s10170_s1 + $0xb0] sm:$0xff]   ;;  %v7473_v0 = vld [vmem:[%s7359_s13 + $0x28] sm:$0xf] }
  0x2b   : > { %v579_v10 = vrot.slane %v577_v1, 4  ;;  %v582_v11 = vrot.slane %v580_v2, 5  ;;  %v590_v13 = vshrl.u32 %v312_v52, 16  ;;  %v596_v18 = vshll.u32 %v350_v57, 16  ;;  %v7032_v52 = vld [vmem:[%s10170_s1 + $0x30] sm:$0xff]  }
  0x2c   : > { %6522 = vmatpush3.bf16.msra.mxu0 %v7027_v33  ;;  %6956 = vmatpush3.bf16.msra.mxu1 %v7027_v33  ;;  %v397_v16 = vsel %vm7390_vm2, %v392_v7, %v396_v56  ;;  %v402_v17 = vrot.slane %v401_v8, 4  ;;  %v588_v23 = vrot.slane %v586_v12, 5  ;;  %v409_v28 = vshrl.u32 %v7424_v14, 16  ;;  %v7464_v57 = vld [vmem:[%s7359_s13 + $0x24] sm:$0xf] }
  0x2d   : > { %6523 = vmatprep.subr.bf16.mxu0 %v7028_v58  ;;  %6949 = vmatprep.subr.bf16.mxu1 %v7028_v58  ;;  %v583_v22 = vor.u32 %v582_v11, %v579_v10  ;;  %v592_v24 = vrot.slane %v590_v13, 4  ;;  %v598_v30 = vrot.slane %v596_v18, 5  ;;  %v412_v31 = vshll.u32 %v7424_v14, 16  ;;  %v7476_v8 = vld [vmem:[%s7359_s13 + $0x2c] sm:$0x1] }
  0x2e   : > { %6543 = vmatprep.mubr.bf16.mxu1 %v5699_v3  ;;  %v407_v29 = vsel %vm7390_vm2, %v402_v17, %v406_v9  ;;  %v418_v33 = vshll.u32 %v7432_v19, 16  ;;  %v411_v38 = vrot.slane %v409_v28, 4  ;;  %v422_v45 = vshrl.u32 %v7432_v19, 16  ;;  %v7480_v13 = vld [vmem:[%s7359_s13 + $0x84] sm:$0xf] }
  0x2f   : > { %v5692_v35 = vcombine.low %v397_v16, %v407_v29  ;;  %v584_v36 = vrot.slane %v583_v22, 4  ;;  %v593_v37 = vor.u32 %v592_v24, %v588_v23  ;;  %v414_v43 = vrot.slane %v412_v31, 5  ;;  %v7487_v22 = vld [vmem:[%s7359_s13 + $0x88] sm:$0xf] }
  0x30   : > { %6524 = vmatpush3.bf16.msra.mxu0 %v7028_v58  ;;  %6957 = vmatpush3.bf16.msra.mxu1 %v7028_v58  ;;  %v420_v44 = vrot.slane %v418_v33, 5  ;;  %v428_v46 = vshll.u32 %v7437_v25, 16  ;;  %v601_v50 = vshrl.u32 %v313_v34, 16  ;;  %v604_v51 = vshll.u32 %v313_v34, 16 }
  0x31   : > { %6525 = vmatprep.subr.bf16.mxu0 %v7029_v15  ;;  %6950 = vmatprep.subr.bf16.mxu1 %v7029_v15  ;;  %v589_v47 = vsel %vm7390_vm2, %v584_v36, %v588_v23  ;;  %v594_v48 = vrot.slane %v593_v37, 4  ;;  %v415_v53 = vor.u32 %v414_v43, %v411_v38  ;;  %v424_v54 = vrot.slane %v422_v45, 4  ;;  %v7496_v36 = vld [vmem:[%s7359_s13 + $0x8c] sm:$0x1] }
  0x32   : > { %v430_v55 = vrot.slane %v428_v46, 5  ;;  %v610_v56 = vshll.u32 %v7446_v39, 16  ;;  %v603_v60 = vrot.slane %v601_v50, 4  ;;  %v606_v61 = vrot.slane %v604_v51, 5  ;;  %v7035_v37 = vld [vmem:[%s10170_s1 + $0xa8] sm:$0xff]  }
  0x33   : > { %v599_v58 = vsel %vm7390_vm2, %v594_v48, %v598_v30  ;;  %v614_v63 = vshrl.u32 %v7446_v39, 16  ;;  %v416_v2 = vrot.slane %v415_v53, 4  ;;  %v425_v3 = vor.u32 %v424_v54, %v420_v44  ;;  %v7034_v30 = vld [vmem:[%s10170_s1 + $0x28] sm:$0xff]   ;;  %v7511_v53 = vld [vmem:[%s7359_s13 + $0x30] sm:$0xf] }
  0x34   : > { %6526 = vmatpush3.bf16.msra.mxu0 %v7029_v15  ;;  %6958 = vmatpush3.bf16.msra.mxu1 %v7029_v15  ;;  %v5700_v1 = vcombine.low %v589_v47, %v599_v58  ;;  %v612_v7 = vrot.slane %v610_v56, 5  ;;  %v607_v9 = vor.u32 %v606_v61, %v603_v60  ;;  %v620_v11 = vshll.u32 %v351_v49, 16  ;;  %v7520_v60 = vld [vmem:[%s7359_s13 + $0x34] sm:$0xf] }
  0x35   : > { %6559 = vmatprep.subr.bf16.mxu1 %v7030_v41  ;;  %6607 = vmatprep.subr.bf16.mxu0 %v7031_v42  ;;  %v616_v10 = vrot.slane %v614_v63, 4  ;;  %v433_v12 = vshrl.u32 %v7464_v57, 16  ;;  %v421_v15 = vsel %vm7390_vm2, %v416_v2, %v420_v44  ;;  %v426_v16 = vrot.slane %v425_v3, 4 }
  0x36   : > { %v436_v17 = vshll.u32 %v7464_v57, 16  ;;  %v442_v18 = vshll.u32 %v7473_v0, 16  ;;  %v608_v23 = vrot.slane %v607_v9, 4  ;;  %v622_v28 = vrot.slane %v620_v11, 5 }
  0x37   : > { %6528 = vmatmul.mubr.bf16.vlgmr.msra.gmra.mxu0 %v5692_v35  ;;  %6544 = vmatmul.mubr.bf16.vlgmr.msra.gmra.mxu1 %v5700_v1  ;;  %v617_v24 = vor.u32 %v616_v10, %v612_v7  ;;  %v435_v29 = vrot.slane %v433_v12, 4  ;;  %v431_v31 = vsel %vm7390_vm2, %v426_v16, %v430_v55  ;;  %v446_v35 = vshrl.u32 %v7473_v0, 16  ;;  %v7528_v16 = vld [vmem:[%s7359_s13 + $0x38] sm:$0x1] }
  0x38   : > { %6560 = vmatpush3.bf16.msra.mxu1 %v7030_v41  ;;  %6608 = vmatpush3.bf16.msra.mxu0 %v7031_v42  ;;  %v438_v33 = vrot.slane %v436_v17, 5  ;;  %v444_v34 = vrot.slane %v442_v18, 5  ;;  %v5693_v38 = vcombine.low %v421_v15, %v431_v31  ;;  %v613_v41 = vsel %vm7390_vm2, %v608_v23, %v612_v7  ;;  %v7532_v18 = vld [vmem:[%s7359_s13 + $0x90] sm:$0xf]  ;;  %v7538_v31 = vld [vmem:[%s7359_s13 + $0x94] sm:$0xf] }
  0x39   : > { %6561 = vmatprep.subr.bf16.mxu1 %v7032_v52  ;;  %6609 = vmatprep.subr.bf16.mxu0 %v7033_v59  ;;  %v618_v42 = vrot.slane %v617_v24, 4  ;;  %v452_v43 = vshll.u32 %v7476_v8, 16  ;;  %v448_v45 = vrot.slane %v446_v35, 4  ;;  %v625_v46 = vshrl.u32 %v7480_v13, 16 }
  0x3a   : > { %v439_v44 = vor.u32 %v438_v33, %v435_v29  ;;  %v628_v47 = vshll.u32 %v7480_v13, 16  ;;  %v634_v50 = vshll.u32 %v7487_v22, 16  ;;  %v638_v51 = vshrl.u32 %v7487_v22, 16  ;;  %6531 = vmatprep.mubr.bf16.mxu0 %v5693_v38  ;;  %v7039_v38 = vld [vmem:[%s10170_s1 + $0x98] sm:$0xff]  }
  0x3b   : > { %v623_v48 = vsel %vm7390_vm2, %v618_v42, %v622_v28  ;;  %v454_v49 = vrot.slane %v452_v43, 5  ;;  %v449_v56 = vor.u32 %v448_v45, %v444_v34  ;;  %v627_v58 = vrot.slane %v625_v46, 4  ;;  %v7040_v46 = vld [vmem:[%s10170_s1 + $0x10] sm:$0xff]  }
  0x3c   : > { %6562 = vmatpush3.bf16.msra.mxu1 %v7032_v52  ;;  %6610 = vmatpush3.bf16.msra.mxu0 %v7033_v59  ;;  %v5701_v54 = vcombine.low %v613_v41, %v623_v48  ;;  %v440_v55 = vrot.slane %v439_v44, 4  ;;  %v7036_v52 = vld [vmem:[%s10170_s1 + $0x20] sm:$0xff]   ;;  %v630_v61 = vrot.slane %v628_v47, 5  ;;  %v636_v63 = vrot.slane %v634_v50, 5  ;;  %v7548_v44 = vld [vmem:[%s7359_s13 + $0x98] sm:$0x1] }
  0x3d   : > { %6563 = vmatprep.subr.bf16.mxu1 %v7034_v30  ;;  %v7037_v59 = vld [vmem:[%s10170_s1 + $0xa0] sm:$0xff]   ;;  %v640_v1 = vrot.slane %v638_v51, 4  ;;  %v644_v2 = vshll.u32 %v7496_v36, 16  ;;  %6611 = vmatprep.subr.bf16.mxu0 %v7035_v37  ;;  %v450_v7 = vrot.slane %v449_v56, 4  ;;  %v457_v9 = vshrl.u32 %v7511_v53, 16 }
  0x3e   : > { %6547 = vmatprep.mubr.bf16.mxu1 %v5701_v54  ;;  %v445_v3 = vsel %vm7390_vm2, %v440_v55, %v444_v34  ;;  %v460_v10 = vshll.u32 %v7511_v53, 16  ;;  %v631_v11 = vor.u32 %v630_v61, %v627_v58  ;;  %v466_v17 = vshll.u32 %v7520_v60, 16  ;;  %v7561_v51 = vld [vmem:[%s7359_s13 + $0x3c] sm:$0xf]  ;;  %v7564_v54 = vld [vmem:[%s7359_s13 + $0x40] sm:$0xf] }
  0x3f   : > { %v641_v12 = vor.u32 %v640_v1, %v636_v63  ;;  %v646_v15 = vrot.slane %v644_v2, 5  ;;  %v455_v23 = vsel %vm7390_vm2, %v450_v7, %v454_v49  ;;  %v459_v24 = vrot.slane %v457_v9, 4  ;;  %v7041_v55 = vld [vmem:[%s10170_s1 + $0x90] sm:$0xff]   ;;  %v7571_v7 = vld [vmem:[%s7359_s13 + $0x44] sm:$0x1] }
  0x40   : > { %6564 = vmatpush3.bf16.msra.mxu1 %v7034_v30  ;;  %6612 = vmatpush3.bf16.msra.mxu0 %v7035_v37  ;;  %v462_v28 = vrot.slane %v460_v10, 5  ;;  %v470_v29 = vshrl.u32 %v7520_v60, 16  ;;  %v7038_v30 = vld [vmem:[%s10170_s1 + $0x18] sm:$0xff]   ;;  %v5694_v33 = vcombine.low %v445_v3, %v455_v23  ;;  %v632_v34 = vrot.slane %v631_v11, 4 }
  0x41   : > { %6565 = vmatprep.subr.bf16.mxu1 %v7036_v52  ;;  %6613 = vmatprep.subr.bf16.mxu0 %v7037_v59  ;;  %v642_v35 = vrot.slane %v641_v12, 4  ;;  %v468_v37 = vrot.slane %v466_v17, 5  ;;  %v476_v43 = vshll.u32 %v7528_v16, 16  ;;  %v649_v45 = vshrl.u32 %v7532_v18, 16  ;;  %v7574_v9 = vld [vmem:[%s7359_s13 + $0x9c] sm:$0xf] }
  0x42   : > { %v463_v41 = vor.u32 %v462_v28, %v459_v24  ;;  %v472_v42 = vrot.slane %v470_v29, 4  ;;  %6532 = vmatmul.mubr.bf16.gmra.mxu0 %v5694_v33  ;;  %v637_v47 = vsel %vm7390_vm2, %v632_v34, %v636_v63  ;;  %v652_v49 = vshll.u32 %v7532_v18, 16  ;;  %v7583_v28 = vld [vmem:[%s7359_s13 + $0xa0] sm:$0xf]  ;;  %v7042_v29 = vld [vmem:[%s10170_s1 + $0x8] sm:$0xff]  }
  0x43   : > { %v647_v48 = vsel %vm7390_vm2, %v642_v35, %v646_v15  ;;  %v658_v50 = vshll.u32 %v7538_v31, 16  ;;  %v478_v63 = vrot.slane %v476_v43, 5  ;;  %v662_v3 = vshrl.u32 %v7538_v31, 16 }
  0x44   : > { %6566 = vmatpush3.bf16.msra.mxu1 %v7036_v52  ;;  %v5702_v56 = vcombine.low %v637_v47, %v647_v48  ;;  %6614 = vmatpush3.bf16.msra.mxu0 %v7037_v59  ;;  %v464_v58 = vrot.slane %v463_v41, 4  ;;  %v473_v61 = vor.u32 %v472_v42, %v468_v37  ;;  %v651_v52 = vrot.slane %v649_v45, 4  ;;  %v7043_v41 = vld [vmem:[%s10170_s1 + $0x88] sm:$0xff]  }
  0x45   : > { %6567 = vmatprep.subr.bf16.mxu1 %v7038_v30  ;;  %v654_v1 = vrot.slane %v652_v49, 5  ;;  %v660_v2 = vrot.slane %v658_v50, 5  ;;  %6615 = vmatprep.subr.bf16.mxu0 %v7039_v38  ;;  %v668_v11 = vshll.u32 %v7548_v44, 16  ;;  %v481_v12 = vshrl.u32 %v7561_v51, 16 }
  0x46   : > { %6548 = vmatmul.mubr.bf16.gmra.mxu1 %v5702_v56  ;;  %v469_v10 = vsel %vm7390_vm2, %v464_v58, %v468_v37  ;;  %v474_v59 = vrot.slane %v473_v61, 4  ;;  %v664_v17 = vrot.slane %v662_v3, 4  ;;  %v484_v23 = vshll.u32 %v7561_v51, 16  ;;  %v7599_v61 = vld [vmem:[%s7359_s13 + $0xa4] sm:$0x1] }
  0x47   : > { %v655_v15 = vor.u32 %v654_v1, %v651_v52  ;;  %v490_v24 = vshll.u32 %v7564_v54, 16  ;;  %v670_v34 = vrot.slane %v668_v11, 5  ;;  %v483_v35 = vrot.slane %v481_v12, 4 }
  0x48   : > { %6568 = vmatpush3.bf16.msra.mxu1 %v7038_v30  ;;  %v479_v33 = vsel %vm7390_vm2, %v474_v59, %v478_v63  ;;  %v494_v37 = vshrl.u32 %v7564_v54, 16  ;;  %6616 = vmatpush3.bf16.msra.mxu0 %v7039_v38  ;;  %v665_v43 = vor.u32 %v664_v17, %v660_v2  ;;  %v486_v45 = vrot.slane %v484_v23, 5  ;;  %v7604_v59 = vld [vmem:[%s7359_s13 + $0x48] sm:$0xf]  ;;  %v7613_v17 = vld [vmem:[%s7359_s13 + $0x4c] sm:$0xf] }
  0x49   : > { %6569 = vmatprep.subr.bf16.mxu1 %v7040_v46  ;;  %v5695_v42 = vcombine.low %v469_v10, %v479_v33  ;;  %v656_v30 = vrot.slane %v655_v15, 4  ;;  %6617 = vmatprep.subr.bf16.mxu0 %v7041_v55  ;;  %v492_v47 = vrot.slane %v490_v24, 5  ;;  %v500_v49 = vshll.u32 %v7571_v7, 16 }
  0x4a   : > { %v496_v48 = vrot.slane %v494_v37, 4  ;;  %v673_v50 = vshrl.u32 %v7574_v9, 16  ;;  %v666_v56 = vrot.slane %v665_v43, 4  ;;  %v487_v58 = vor.u32 %v486_v45, %v483_v35 }
  0x4b   : > { %6535 = vmatprep.mubr.bf16.mxu0 %v5695_v42  ;;  %v661_v38 = vsel %vm7390_vm2, %v656_v30, %v660_v2  ;;  %v676_v63 = vshll.u32 %v7574_v9, 16  ;;  %v502_v1 = vrot.slane %v500_v49, 5  ;;  %v682_v10 = vshll.u32 %v7583_v28, 16  ;;  %v7044_v2 = vld [vmem:[%s10170_s1] sm:$0xff]   ;;  %v7622_v30 = vld [vmem:[%s7359_s13 + $0x50] sm:$0x1] }
  0x4c   : > { %6570 = vmatpush3.bf16.msra.mxu1 %v7040_v46  ;;  %v497_v52 = vor.u32 %v496_v48, %v492_v47  ;;  %v675_v3 = vrot.slane %v673_v50, 4  ;;  %6618 = vmatpush3.bf16.msra.mxu0 %v7041_v55  ;;  %v671_v11 = vsel %vm7390_vm2, %v666_v56, %v670_v34  ;;  %v488_v12 = vrot.slane %v487_v58, 4  ;;  %v7045_v55 = vld [vmem:[%s10170_s1 + $0x80] sm:$0xff]  }
  0x4d   : > { %6571 = vmatprep.subr.bf16.mxu1 %v7042_v29  ;;  %v678_v15 = vrot.slane %v676_v63, 5  ;;  %v686_v46 = vshrl.u32 %v7583_v28, 16  ;;  %6619 = vmatprep.subr.bf16.mxu0 %v7043_v41  ;;  %v5703_v23 = vcombine.low %v661_v38, %v671_v11  ;;  %v684_v33 = vrot.slane %v682_v10, 5  ;;  %v7630_v38 = vld [vmem:[%s7359_s13 + $0xa8] sm:$0xf] }
  0x4e   : > { %v498_v24 = vrot.slane %v497_v52, 4  ;;  %v692_v35 = vshll.u32 %v7599_v61, 16  ;;  %v493_v34 = vsel %vm7390_vm2, %v488_v12, %v492_v47  ;;  %v505_v43 = vshrl.u32 %v7604_v59, 16  ;;  %10202 = vst [vmem:[#allocation9_spill] sm:$0xff] %v7630_v38  ;;  %v7635_v47 = vld [vmem:[%s10170_s1 + $0xf8] sm:$0xff]  }
  0x4f   : > { %v679_v37 = vor.u32 %v678_v15, %v675_v3  ;;  %v688_v42 = vrot.slane %v686_v46, 4  ;;  %6551 = vmatprep.mubr.bf16.mxu1 %v5703_v23  ;;  %v508_v49 = vshll.u32 %v7604_v59, 16  ;;  %v514_v50 = vshll.u32 %v7613_v17, 16  ;;  %v7638_v52 = vld [vmem:[%s7359_s13 + $0xac] sm:$0xf] }
  0x50   : > { %6572 = vmatpush3.bf16.msra.mxu1 %v7042_v29  ;;  %v503_v45 = vsel %vm7390_vm2, %v498_v24, %v502_v1  ;;  %v694_v48 = vrot.slane %v692_v35, 5  ;;  %6620 = vmatpush3.bf16.msra.mxu0 %v7043_v41  ;;  %v507_v63 = vrot.slane %v505_v43, 4  ;;  %v7643_v1 = vld [vmem:[%s10170_s1 + $0x138] sm:$0xff]   ;;  %v518_v10 = vshrl.u32 %v7613_v17, 16  ;;  %v7648_v12 = vld [vmem:[%s7359_s13 + $0xb0] sm:$0x1] }
  0x51   : > { %v5696_v29 = vcombine.low %v493_v34, %v503_v45  ;;  %v680_v56 = vrot.slane %v679_v37, 4  ;;  %v689_v58 = vor.u32 %v688_v42, %v684_v33  ;;  %6573 = vmatprep.subr.bf16.mxu1 %v7044_v2  ;;  %6621 = vmatprep.subr.bf16.mxu0 %v7045_v55  ;;  %v510_v41 = vrot.slane %v508_v49, 5  ;;  %10203 = vst [vmem:[#allocation10_spill] sm:$0xff] %v7648_v12  ;;  %v7651_v15 = vld [vmem:[%s7359_s13 + $0x54] sm:$0xf] }
  0x52   : > { %v516_v3 = vrot.slane %v514_v50, 5  ;;  %v524_v11 = vshll.u32 %v7622_v30, 16  ;;  %v697_v24 = vshrl.u32 %v7630_v38, 16  ;;  %v700_v35 = vshll.u32 %v7630_v38, 16  ;;  %v7658_v34 = vld [vmem:[%s7359_s13 + $0x58] sm:$0xf] }
  0x53   : > { %6536 = vmatmul.mubr.bf16.gmra.mxu0 %v5696_v29  ;;  %v685_v46 = vsel %vm7390_vm2, %v680_v56, %v684_v33  ;;  %v690_v23 = vrot.slane %v689_v58, 4  ;;  %v511_v37 = vor.u32 %v510_v41, %v507_v63  ;;  %v520_v42 = vrot.slane %v518_v10, 4 }
  0x54   : > { %6574 = vmatpush3.bf16.msra.mxu1 %v7044_v2  ;;  %v526_v43 = vrot.slane %v524_v11, 5  ;;  %v706_v45 = vshll.u32 %v7638_v52, 16  ;;  %6622 = vmatpush3.bf16.msra.mxu0 %v7045_v55  ;;  %v699_v49 = vrot.slane %v697_v24, 4  ;;  %v702_v50 = vrot.slane %v700_v35, 5  ;;  %v7667_v55 = vld [vmem:[%s7359_s13 + $0x5c] sm:$0x1] }
  0x55   : > { %6655 = vmatprep.subr.bf16.mxu1 %v7635_v47  ;;  %v695_v33 = vsel %vm7390_vm2, %v690_v23, %v694_v48  ;;  %v710_v29 = vshrl.u32 %v7638_v52, 16  ;;  %6703 = vmatprep.subr.bf16.mxu0 %v7643_v1  ;;  %v512_v56 = vrot.slane %v511_v37, 4  ;;  %v521_v58 = vor.u32 %v520_v42, %v516_v3  ;;  %v7672_v48 = vld [vmem:[%s7359_s13 + $0xb4] sm:$0xf]  ;;  %v7679_v37 = vld [vmem:[%s7359_s13 + $0xb8] sm:$0xf] }
  0x56   : > { %v5704_v2 = vcombine.low %v685_v46, %v695_v33  ;;  %v708_v63 = vrot.slane %v706_v45, 5  ;;  %v703_v41 = vor.u32 %v702_v50, %v699_v49  ;;  %v716_v11 = vshll.u32 %v7648_v12, 16  ;;  %10204 = vst [vmem:[#allocation11_spill] sm:$0xff] %v7672_v48  ;;  %10205 = vst [vmem:[#allocation12_spill] sm:$0xff] %v7679_v37 }
  0x57   : > { %v712_v10 = vrot.slane %v710_v29, 4  ;;  %v529_v21 = vshrl.u32 %v7651_v15, 16  ;;  %v517_v23 = vsel %vm7390_vm2, %v512_v56, %v516_v3  ;;  %v522_v24 = vrot.slane %v521_v58, 4  ;;  %v7685_v3 = vld [vmem:[%s7359_s13 + $0xbc] sm:$0x1] }
  0x58   : > { %6552 = vmatmul.mubr.bf16.gmra.mxu1 %v5704_v2  ;;  %v532_v46 = vshll.u32 %v7651_v15, 16  ;;  %v538_v35 = vshll.u32 %v7658_v34, 16  ;;  %v704_v42 = vrot.slane %v703_v41, 4  ;;  %v718_v33 = vrot.slane %v716_v11, 5  ;;  %10206 = vst [vmem:[#allocation13_spill] sm:$0xff] %v7685_v3 }
  0x59   : > { %v713_v45 = vor.u32 %v712_v10, %v708_v63  ;;  %v531_v49 = vrot.slane %v529_v21, 4  ;;  %v527_v50 = vsel %vm7390_vm2, %v522_v24, %v526_v43  ;;  %v542_v62 = vshrl.u32 %v7658_v34, 16  ;;  %v1339_v10 = vld [vmem:[%s7359_s13] sm:$0xe] }
  0x5a   : > { %v534_v29 = vrot.slane %v532_v46, 5  ;;  %v540_v2 = vrot.slane %v538_v35, 5  ;;  %v5697_v56 = vcombine.low %v517_v23, %v527_v50  ;;  %v709_v58 = vsel %vm7390_vm2, %v704_v42, %v708_v63 }
  0x5b   : > { %v714_v20 = vrot.slane %v713_v45, 4  ;;  %v548_v41 = vshll.u32 %v7667_v55, 16  ;;  %v544_v21 = vrot.slane %v542_v62, 4  ;;  %v721_v12 = vshrl.u32 %v7672_v48, 16 }
  0x5c   : > { %v535_v11 = vor.u32 %v534_v29, %v531_v49  ;;  %v724_v43 = vshll.u32 %v7672_v48, 16  ;;  %6539 = vmatprep.mubr.bf16.mxu0 %v5697_v56  ;;  %v730_v46 = vshll.u32 %v7679_v37, 16  ;;  %v734_v63 = vshrl.u32 %v7679_v37, 16  ;;  %v1340_v49 = vld [vmem:[%s7359_s13 + $0xc] sm:$0xe] }
  0x5d   : > { %v719_v24 = vsel %vm7390_vm2, %v714_v20, %v718_v33  ;;  %v550_v23 = vrot.slane %v548_v41, 5  ;;  %v545_v45 = vor.u32 %v544_v21, %v540_v2  ;;  %v723_v50 = vrot.slane %v721_v12, 4  ;;  %v1341_v20 = vld [vmem:[%s7359_s13 + $0x18] sm:$0xe] }
  0x5e   : > { %v5705_v35 = vcombine.low %v709_v58, %v719_v24  ;;  %v536_v42 = vrot.slane %v535_v11, 4  ;;  %v726_v62 = vrot.slane %v724_v43, 5  ;;  %v732_v29 = vrot.slane %v730_v46, 5 }
  0x5f   : > { %v736_v38 = vrot.slane %v734_v63, 4  ;;  %v740_v48 = vshll.u32 %v7685_v3, 16  ;;  %v546_v58 = vrot.slane %v545_v45, 4  ;;  %v5739_v41 = vrot.slane %v1339_v10, 9 }
  0x60   : > { %6555 = vmatprep.mubr.bf16.mxu1 %v5705_v35  ;;  %v541_v33 = vsel %vm7390_vm2, %v536_v42, %v540_v2  ;;  %v1392_v12 = vrot.slane %v7368_v5, 5  ;;  %v727_v11 = vor.u32 %v726_v62, %v723_v50  ;;  %v5740_v24 = vrot.slane %v1340_v49, 9 }
  0x61   : > { %v737_v21 = vor.u32 %v736_v38, %v732_v29  ;;  %v742_v43 = vrot.slane %v740_v48, 5  ;;  %v551_v46 = vsel %vm7390_vm2, %v546_v58, %v550_v23  ;;  %v1399_v35 = vrot.slane %v7395_v32, 5 }
  0x62   : > { %v1393_v63 = vsel %vm7701_vm5, %v5739_v41, %v1392_v12  ;;  %v1394_v3 = vrot.slane %v1392_v12, 4  ;;  %v5698_v37 = vcombine.low %v541_v33, %v551_v46  ;;  %v728_v2 = vrot.slane %v727_v11, 4  ;;  %v1343_v12 = vld [vmem:[%s7359_s13 + $0x30] sm:$0xe]  ;;  %v1345_v46 = vld [vmem:[%s7359_s13 + $0x48] sm:$0xe] }
  0x63   : > { %v738_v42 = vrot.slane %v737_v21, 4  ;;  %v5715_v10 = vcombine.low %v7365_v4, %v7368_v5  ;;  %v10209_v38 = vrot.slane %v7371_v6, 5  ;;  %v1401_v45 = vrot.slane %v1399_v35, 4 }
  0x64   : > { %v5741_v23 = vrot.slane %v1341_v20, 9  ;;  %6540 = vmatmul.mubr.bf16.gmra.mxu0 %v5698_v37  ;;  %v733_v50 = vsel %vm7390_vm2, %v728_v2, %v732_v29  ;;  %v1406_v33 = vrot.slane %v7432_v19, 5  ;;  %v1400_v4 = vsel %vm7701_vm5, %v5740_v24, %v1399_v35  ;;  %v1344_v24 = vld [vmem:[%s7359_s13 + $0x3c] sm:$0xe] }
  0x65   : > { %v1396_v48 = vsel %vm7701_vm5, %v1394_v3, %v10209_v38  ;;  %v743_v49 = vsel %vm7390_vm2, %v738_v42, %v742_v43  ;;  %v10210_v5 = vrot.slane %v7401_v40, 5  ;;  %v1409_v37 = vrot.slane %v7437_v25, 5  ;;  %v1342_v3 = vld [vmem:[%s7359_s13 + $0x24] sm:$0xe]  ;;  %v7053_v25 = vld [vmem:[%s10170_s1 + $0x130] sm:$0xff]  }
  0x66   : > { %v5771_v62 = vcombine.low %v1393_v63, %v1396_v48  ;;  %v5706_v58 = vcombine.low %v733_v50, %v743_v49  ;;  %v1407_v29 = vsel %vm7701_vm5, %v5741_v23, %v1406_v33  ;;  %v1408_v20 = vrot.slane %v1406_v33, 4  ;;  %v7052_v23 = vld [vmem:[%s10170_s1 + $0xf0] sm:$0xff]  }
  0x67   : > { %v1403_v6 = vsel %vm7701_vm5, %v1401_v45, %v10210_v5  ;;  %v1413_v41 = vrot.slane %v7473_v0, 5  ;;  %v5742_v21 = vrot.slane %v1342_v3, 9  ;;  %v1420_v43 = vrot.slane %v7520_v60, 5  ;;  %v7776_v3 = vld [vmem:[%s7359_s13 + $0x68] sm:$0x1] }
  0x68   : > { %6623 = vmatprep.mubr.bf16.mxu0 %v5771_v62  ;;  %6556 = vmatmul.mubr.bf16.gmra.mxu1 %v5706_v58  ;;  %v5772_v11 = vcombine.low %v1400_v4, %v1403_v6  ;;  %v1410_v40 = vsel %vm7701_vm5, %v1408_v20, %v1409_v37  ;;  %v1416_v2 = vrot.slane %v7476_v8, 5  ;;  %v5743_v42 = vrot.slane %v1343_v12, 9  ;;  %v1346_v37 = vld [vmem:[%s7359_s13 + $0x54] sm:$0xe]  ;;  %v7800_v12 = vld [vmem:[%s7359_s13 + $0x60] sm:$0xe] }
  0x69   : > { %6575 = vmatprep.mubr.bf16.mxu1 %v5715_v10  ;;  %v5773_v63 = vcombine.low %v1407_v29, %v1410_v40  ;;  %v1415_v35 = vrot.slane %v1413_v41, 4  ;;  %v1422_v38 = vrot.slane %v1420_v43, 4  ;;  %v1423_v10 = vrot.slane %v7528_v16, 5 }
  0x6a   : > { %v1427_v48 = vrot.slane %v7564_v54, 5  ;;  %v5717_v45 = vcombine.low %v7424_v14, %v7432_v19  ;;  %v1434_v50 = vrot.slane %v7613_v17, 5  ;;  %v5744_v49 = vrot.slane %v1344_v24, 9  ;;  %v7061_v24 = vld [vmem:[%s10170_s1 + $0x120] sm:$0xff]  }
  0x6b   : > { %v1430_v8 = vrot.slane %v7571_v7, 5  ;;  %v5745_v33 = vrot.slane %v1345_v46, 9  ;;  %v1414_v14 = vsel %vm7701_vm5, %v5742_v21, %v1413_v41  ;;  %v1417_v19 = vsel %vm7701_vm5, %v1415_v35, %v1416_v2  ;;  %v7812_v46 = vld [vmem:[%s7359_s13 + $0x78] sm:$0xe]  ;;  %v7060_v2 = vld [vmem:[%s10170_s1 + $0xe0] sm:$0xff]  }
  0x6c   : > { %6624 = vmatmul.mubr.bf16.vlgmr.msra.gmra.mxu0 %v5772_v11  ;;  %v1429_v62 = vrot.slane %v1427_v48, 4  ;;  %v1436_v16 = vrot.slane %v1434_v50, 4  ;;  %v1437_v58 = vrot.slane %v7622_v30, 5  ;;  %v1421_v4 = vsel %vm7701_vm5, %v5743_v42, %v1420_v43  ;;  %v7803_v11 = vld [vmem:[%s7359_s13 + $0x6c] sm:$0xe] }
  0x6d   : > { %6704 = vmatpush3.bf16.msra.mxu0 %v7643_v1  ;;  %6627 = vmatprep.mubr.bf16.mxu0 %v5773_v63  ;;  %v1424_v7 = vsel %vm7701_vm5, %v1422_v38, %v1423_v10  ;;  %v7057_v1 = vld [vmem:[%s10170_s1 + $0x128] sm:$0xff]   ;;  %v1441_v5 = vrot.slane %v7658_v34, 5  ;;  %v10211_v6 = vcombine.low %v7386_v26, %v7395_v32  ;;  %v5718_v30 = vcombine.low %v7464_v57, %v7473_v0  ;;  %v1350_v63 = vld [vmem:[%s7359_s13 + $0x84] sm:$0xe]  ;;  %v1351_v42 = vld [vmem:[%s7359_s13 + $0x90] sm:$0xe] }
  0x6e   : > { %6705 = vmatprep.subr.bf16.mxu0 %v7053_v25  ;;  %v1451_v29 = vrot.slane %v7776_v3, 5  ;;  %v5774_v20 = vcombine.low %v1414_v14, %v1417_v19  ;;  %v7782_v41 = vsel %vm7701_vm5, %v5744_v49, %v1427_v48  ;;  %v7786_v26 = vsel %vm7701_vm5, %v1429_v62, %v1430_v8  ;;  %v7056_v32 = vld [vmem:[%s10170_s1 + $0xe8] sm:$0xff]   ;;  %v7831_v48 = vld [vmem:[%s7359_s13 + $0x64] sm:$0xf]  ;;  %v1352_v49 = vld [vmem:[%s7359_s13 + $0x9c] sm:$0xe] }
  0x6f   : > { %v5775_v57 = vcombine.low %v1421_v4, %v1424_v7  ;;  %v7793_v0 = vsel %vm7701_vm5, %v5745_v33, %v1434_v50  ;;  %v5719_v40 = vcombine.low %v7511_v53, %v7520_v60  ;;  %v5746_v21 = vrot.slane %v1346_v37, 9  ;;  %v7853_v4 = vld [vmem:[%s7359_s13 + $0x74] sm:$0x1] }
  0x70   : > { %6576 = vmatmul.mubr.bf16.vlgmr.msra.gmra.mxu1 %v10211_v6  ;;  %v1444_v43 = vrot.slane %v7667_v55, 5  ;;  %v5720_v35 = vcombine.low %v7561_v51, %v7564_v54  ;;  %v5776_v53 = vcombine.low %v7782_v41, %v7786_v26  ;;  %v5721_v60 = vcombine.low %v7604_v59, %v7613_v17  ;;  %v7146_v54 = vld [vmem:[%s7359_s13 + $0x80] sm:$0x1] }
  0x71   : > { %6656 = vmatpush3.bf16.msra.mxu1 %v7635_v47  ;;  %6579 = vmatprep.mubr.bf16.mxu1 %v5717_v45  ;;  %v7797_v47 = vsel %vm7701_vm5, %v1436_v16, %v1437_v58  ;;  %v5722_v55 = vcombine.low %v7651_v15, %v7658_v34  ;;  %v5747_v10 = vrot.slane %v7800_v12, 9  ;;  %v1448_v45 = vrot.slane %v7831_v48, 5  ;;  %v7849_v16 = vld [vmem:[%s7359_s13 + $0x70] sm:$0xf]  ;;  %v7147_v17 = vld [vmem:[%s7359_s13 + $0x60] sm:$0xf] }
  0x72   : > { %6657 = vmatprep.subr.bf16.mxu1 %v7052_v23  ;;  %6706 = vmatpush3.bf16.msra.mxu0 %v7053_v25  ;;  %v1443_v25 = vrot.slane %v1441_v5, 4  ;;  %v5777_v38 = vcombine.low %v7793_v0, %v7797_v47  ;;  %v5748_v62 = vrot.slane %v7803_v11, 9  ;;  %v1469_v8 = vrot.slane %v7487_v22, 5  ;;  %v1353_v0 = vld [vmem:[%s7359_s13 + $0xa8] sm:$0xe]  ;;  %v8033_v15 = vld [vmem:[%s10170_s1 + $0x1b8] sm:$0xff]  }
  0x73   : > { %6707 = vmatprep.subr.bf16.mxu0 %v7057_v1  ;;  %v1472_v33 = vrot.slane %v7496_v36, 5  ;;  %v7842_v14 = vsel %vm7701_vm5, %v5746_v21, %v1441_v5  ;;  %v1455_v58 = vrot.slane %v7849_v16, 5  ;;  %v1458_v7 = vrot.slane %v7853_v4, 5  ;;  %v7064_v36 = vld [vmem:[%s10170_s1 + $0xd8] sm:$0xff]  }
  0x74   : > { %6628 = vmatmul.mubr.bf16.gmra.mxu0 %v5774_v20  ;;  %v7846_v19 = vsel %vm7701_vm5, %v1443_v25, %v1444_v43  ;;  %v5749_v5 = vrot.slane %v7812_v46, 9  ;;  %v1471_v37 = vrot.slane %v1469_v8, 4  ;;  %v5751_v41 = vrot.slane %v1351_v42, 9  ;;  %v5867_v42 = vld [vmem:[%s7359_s13 + $0xc] sm:$0xf] }
  0x75   : > { %6658 = vmatpush3.bf16.msra.mxu1 %v7052_v23  ;;  %6631 = vmatprep.mubr.bf16.mxu0 %v5775_v57  ;;  %v5750_v23 = vrot.slane %v1350_v63, 9  ;;  %v1476_v26 = vrot.slane %v7538_v31, 5  ;;  %v1479_v57 = vrot.slane %v7548_v44, 5  ;;  %v1462_v47 = vrot.slane %v7446_v39, 5 }
  0x76   : > { %6659 = vmatprep.subr.bf16.mxu1 %v7056_v32  ;;  %6708 = vmatpush3.bf16.msra.mxu0 %v7057_v1  ;;  %v7065_v1 = vld [vmem:[%s10170_s1 + $0x118] sm:$0xff]   ;;  %v7877_v21 = vsel %vm7701_vm5, %v1471_v37, %v1472_v33  ;;  %v1483_v63 = vrot.slane %v7583_v28, 5  ;;  %v5753_v33 = vrot.slane %v1353_v0, 9  ;;  %v1490_v37 = vrot.slane %v7638_v52, 5  ;;  %v7068_v0 = vld [vmem:[%s10170_s1 + $0xd0] sm:$0xff]  }
  0x77   : > { %6709 = vmatprep.subr.bf16.mxu0 %v7061_v24  ;;  %v7865_v6 = vsel %vm7701_vm5, %v5750_v23, %v1469_v8  ;;  %v7885_v44 = vsel %vm7701_vm5, %v5751_v41, %v1476_v26  ;;  %v1478_v43 = vrot.slane %v1476_v26, 4  ;;  %v7069_v23 = vld [vmem:[%s10170_s1 + $0x110] sm:$0xff]   ;;  %v1486_v8 = vrot.slane %v7599_v61, 5 }
  0x78   : > { %6580 = vmatmul.mubr.bf16.gmra.mxu1 %v5718_v30  ;;  %v1450_v30 = vrot.slane %v1448_v45, 4  ;;  %v1485_v20 = vrot.slane %v1483_v63, 4  ;;  %v10213_v61 = vld [vmem:[#allocation10_spill] sm:$0xff]  ;;  %v2260_v12 = vshrl.u32 %v5867_v42, 16  ;;  %v1457_v51 = vrot.slane %v1455_v58, 4 }
  0x79   : > { %6583 = vmatprep.mubr.bf16.mxu1 %v5719_v40  ;;  %6660 = vmatpush3.bf16.msra.mxu1 %v7056_v32  ;;  %v5752_v40 = vrot.slane %v1352_v49, 9  ;;  %v7897_v32 = vld [vmem:[%s7359_s13 + $0x10] sm:$0xf]  ;;  %v7901_v41 = vsel %vm7701_vm5, %v1478_v43, %v1479_v57  ;;  %v1493_v50 = vrot.slane %v10213_v61, 5  ;;  %v1492_v57 = vrot.slane %v1490_v37, 4  ;;  %v10215_v43 = vld [vmem:[#allocation11_spill] sm:$0xff] }
  0x7a   : > { %6661 = vmatprep.subr.bf16.mxu1 %v7060_v2  ;;  %6710 = vmatpush3.bf16.msra.mxu0 %v7061_v24  ;;  %v10212_v24 = vld [vmem:[#allocation9_spill] sm:$0xff]  ;;  %v1449_v61 = vsel %vm7701_vm5, %v5747_v10, %v1448_v45  ;;  %v2263_v10 = vshll.u32 %v5867_v42, 16  ;;  %v5870_v45 = vld [vmem:[%s7359_s13 + $0x18] sm:$0xf]  ;;  %v2269_v59 = vshll.u32 %v7897_v32, 16  ;;  %v1459_v11 = vsel %vm7701_vm5, %v1457_v51, %v1458_v7 }
  0x7b   : > { %6711 = vmatprep.subr.bf16.mxu0 %v7065_v1  ;;  %v7905_v26 = vsel %vm7701_vm5, %v5752_v40, %v1483_v63  ;;  %v10214_v40 = vld [vmem:[#allocation12_spill] sm:$0xff]  ;;  %v7971_v42 = vld [vmem:[%s7359_s13 + $0x14] sm:$0x1]  ;;  %v2262_v63 = vrot.slane %v2260_v12, 4  ;;  %v1463_v4 = vsel %vm7701_vm5, %v5749_v5, %v1462_v47  ;;  %v10217_v5 = vld [vmem:[#allocation13_spill] sm:$0xff] }
  0x7c   : > { %6632 = vmatmul.mubr.bf16.gmra.mxu0 %v5776_v53  ;;  %v2265_v49 = vrot.slane %v2263_v10, 5  ;;  %v5873_v53 = vld [vmem:[%s7359_s13 + $0x24] sm:$0xf] }
  0x7d   : > { %6662 = vmatpush3.bf16.msra.mxu1 %v7060_v2  ;;  %6635 = vmatprep.mubr.bf16.mxu0 %v5777_v38  ;;  %v7915_v2 = vsel %vm7701_vm5, %v5753_v33, %v1490_v37  ;;  %v5778_v38 = vcombine.low %v7842_v14, %v7846_v19  ;;  %v1452_v33 = vsel %vm7701_vm5, %v1450_v30, %v1451_v29  ;;  %v7073_v14 = vld [vmem:[%s10170_s1 + $0x108] sm:$0xff]   ;;  %v7077_v30 = vld [vmem:[%s10170_s1 + $0x100] sm:$0xff]   ;;  %v7990_v19 = vrot.slane %v2269_v59, 5 }
  0x7e   : > { %6663 = vmatprep.subr.bf16.mxu1 %v7064_v36  ;;  %6712 = vmatpush3.bf16.msra.mxu0 %v7065_v1  ;;  %v7933_v37 = vsel %vm7701_vm5, %v1485_v20, %v1486_v8  ;;  %v7945_v29 = vsel %vm7701_vm5, %v1492_v57, %v1493_v50  ;;  %v7072_v50 = vld [vmem:[%s10170_s1 + $0xc8] sm:$0xff]   ;;  %v7960_v1 = vld [vmem:[%s7359_s13 + $0xb4] sm:$0xe]  ;;  %v5779_v20 = vcombine.low %v1449_v61, %v1452_v33  ;;  %v2273_v8 = vshrl.u32 %v7897_v32, 16  ;;  %v7988_v61 = vld [vmem:[%s7359_s13 + $0x1c] sm:$0xf] }
  0x7f   : > { %6713 = vmatprep.subr.bf16.mxu0 %v7069_v23  ;;  %v7975_v57 = vld [vmem:[%s7359_s13 + $0x6c] sm:$0xf]  ;;  %v2284_v33 = vshrl.u32 %v5870_v45, 16  ;;  %v2293_v51 = vshll.u32 %v7988_v61, 16  ;;  %v2297_v39 = vshrl.u32 %v7988_v61, 16  ;;  %v2308_v59 = vshrl.u32 %v5873_v53, 16 }
  0x80   : > { %6584 = vmatmul.mubr.bf16.gmra.mxu1 %v5720_v35  ;;  %v1465_v35 = vrot.slane %v7146_v54, 5  ;;  %v5724_v54 = vcombine.low %v7975_v57, %v7849_v16  ;;  %v2275_v3 = vrot.slane %v2273_v8, 4  ;;  %v2311_v46 = vshll.u32 %v5873_v53, 16  ;;  %v7150_v8 = vld [vmem:[%s7359_s13 + $0x7c] sm:$0xf] }
  0x81   : > { %6587 = vmatprep.mubr.bf16.mxu1 %v5721_v60  ;;  %6664 = vmatpush3.bf16.msra.mxu1 %v7064_v36  ;;  %v5723_v60 = vcombine.low %v7147_v17, %v7831_v48  ;;  %v1464_v36 = vrot.slane %v1462_v47, 4  ;;  %v7985_v48 = vsel %vm7701_vm5, %v5748_v62, %v1455_v58  ;;  %v2287_v17 = vshll.u32 %v5870_v45, 16  ;;  %v7076_v58 = vld [vmem:[%s10170_s1 + $0xc0] sm:$0xff]   ;;  %v8015_v45 = vld [vmem:[%s7359_s13 + $0x28] sm:$0xf] }
  0x82   : > { %6665 = vmatprep.subr.bf16.mxu1 %v7068_v0  ;;  %6714 = vmatpush3.bf16.msra.mxu0 %v7069_v23  ;;  %v10183_v62 = vrot.slane %v10214_v40, 5  ;;  %v8002_v23 = vld [vmem:[%s7359_s13 + $0x20] sm:$0x1]  ;;  %v2286_v12 = vrot.slane %v2284_v33, 4  ;;  %10216 = vst [vmem:[#allocation9_spill] sm:$0xff] %v8015_v45  ;;  %v5780_v34 = vcombine.low %v7985_v48, %v1459_v11  ;;  %v2317_v53 = vshll.u32 %v8015_v45, 16 }
  0x83   : > { %6715 = vmatprep.subr.bf16.mxu0 %v7073_v14  ;;  %v2289_v10 = vrot.slane %v2287_v17, 5  ;;  %v1466_v7 = vsel %vm7701_vm5, %v1464_v36, %v1465_v35  ;;  %v2266_v35 = vor.u32 %v2265_v49, %v2262_v63  ;;  %v8028_v36 = vld [vmem:[%s10170_s1 + $0x178] sm:$0xff]   ;;  %v5876_v63 = vld [vmem:[%s7359_s13 + $0x30] sm:$0xf]  ;;  %v8049_v48 = vld [vmem:[%s7359_s13 + $0x34] sm:$0xf] }
  0x84   : > { %6636 = vmatmul.mubr.bf16.gmra.mxu0 %v5778_v38  ;;  %v2279_v38 = vshll.u32 %v7971_v42, 16  ;;  %v5781_v17 = vcombine.low %v1463_v4, %v1466_v7  ;;  %10219 = vst [vmem:[#allocation12_spill] sm:$0xff] %v8049_v48  ;;  %v8051_v11 = vrot.slane %v2293_v51, 5  ;;  %v2313_v47 = vrot.slane %v2311_v46, 5  ;;  %v8070_v46 = vld [vmem:[%s7359_s13 + $0x40] sm:$0xf] }
  0x85   : > { %6666 = vmatpush3.bf16.msra.mxu1 %v7068_v0  ;;  %6639 = vmatprep.mubr.bf16.mxu0 %v5779_v20  ;;  %v2276_v20 = vor.u32 %v2275_v3, %v7990_v19  ;;  %v2290_v49 = vor.u32 %v2289_v10, %v2286_v12  ;;  %v7149_v3 = vld [vmem:[%s7359_s13 + $0x78] sm:$0xf]  ;;  %v2299_v12 = vrot.slane %v2297_v39, 4  ;;  %v2310_v10 = vrot.slane %v2308_v59, 4  ;;  %10220 = vst [vmem:[#allocation11_spill] sm:$0xff] %v8070_v46 }
  0x86   : > { %6667 = vmatprep.subr.bf16.mxu1 %v7072_v50  ;;  %6716 = vmatpush3.bf16.msra.mxu0 %v7073_v14  ;;  %v2303_v14 = vshll.u32 %v8002_v23, 16  ;;  %v5725_v33 = vcombine.low %v7149_v3, %v7150_v8  ;;  %v8042_v25 = vrot.slane %v2279_v38, 5  ;;  %v8054_v0 = vld [vmem:[%s7359_s13 + $0x38] sm:$0x1]  ;;  %v8056_v4 = vrot.slane %v2266_v35, 4 }
  0x87   : > { %6717 = vmatprep.subr.bf16.mxu0 %v7077_v30  ;;  %v8058_v7 = vrot.slane %v2276_v20, 4  ;;  %v2332_v3 = vshrl.u32 %v5876_v63, 16  ;;  %v5879_v8 = vld [vmem:[%s7359_s13 + $0x3c] sm:$0xf]  ;;  %v8066_v51 = vrot.slane %v2317_v53, 5  ;;  %v2335_v39 = vshll.u32 %v5876_v63, 16 }
  0x88   : > { %6588 = vmatmul.mubr.bf16.gmra.mxu1 %v5722_v55  ;;  %v1499_v55 = vrot.slane %v10183_v62, 4  ;;  %v8060_v38 = vrot.slane %v2303_v14, 5  ;;  %v2341_v59 = vshll.u32 %v8049_v48, 16  ;;  %v2345_v20 = vshrl.u32 %v8049_v48, 16 }
  0x89   : > { %6591 = vmatprep.mubr.bf16.mxu1 %v5723_v60  ;;  %6668 = vmatpush3.bf16.msra.mxu1 %v7072_v50  ;;  %v8045_v60 = vld [vmem:[%s7359_s13 + $0x2c] sm:$0x1]  ;;  %v2321_v50 = vshrl.u32 %v8015_v45, 16  ;;  %v2300_v14 = vor.u32 %v2299_v12, %v8051_v11  ;;  %v2334_v53 = vrot.slane %v2332_v3, 4  ;;  %v2337_v63 = vrot.slane %v2335_v39, 5 }
  0x8a   : > { %6669 = vmatprep.subr.bf16.mxu1 %v7076_v58  ;;  %10218 = vst [vmem:[#allocation10_spill] sm:$0xff] %v8045_v60  ;;  %6718 = vmatpush3.bf16.msra.mxu0 %v7077_v30  ;;  %v8064_v30 = vrot.slane %v2290_v49, 4  ;;  %v2356_v49 = vshrl.u32 %v5879_v8, 16  ;;  %v2359_v62 = vshll.u32 %v5879_v8, 16  ;;  %v2347_v48 = vrot.slane %v2345_v20, 4 }
  0x8b   : > { %6799 = vmatprep.subr.bf16.mxu0 %v8033_v15  ;;  %v2323_v35 = vrot.slane %v2321_v50, 4  ;;  %v8080_v50 = vrot.slane %v2341_v59, 5  ;;  %v8083_v45 = vld [vmem:[%s7359_s13 + $0x44] sm:$0x1]  ;;  %v2369_v12 = vshrl.u32 %v8070_v46, 16  ;;  %v10221_v16 = vrot.slane %v10214_v40, 5 }
  0x8c   : > { %6640 = vmatmul.mubr.bf16.gmra.mxu0 %v5780_v34  ;;  %v2327_v34 = vshll.u32 %v8045_v60, 16  ;;  %v10222_v57 = vrot.slane %v7960_v1, 9  ;;  %v8104_v39 = vld [vmem:[%s7359_s13 + $0x4c] sm:$0xf]  ;;  %v2358_v59 = vrot.slane %v2356_v49, 4  ;;  %v2361_v20 = vrot.slane %v2359_v62, 5 }
  0x8d   : > { %6670 = vmatpush3.bf16.msra.mxu1 %v7076_v58  ;;  %6643 = vmatprep.mubr.bf16.mxu0 %v5781_v17  ;;  %v2314_v58 = vor.u32 %v2313_v47, %v2310_v10  ;;  %v2351_v17 = vshll.u32 %v8054_v0, 16  ;;  %v2365_v47 = vshll.u32 %v8070_v46, 16  ;;  %v5882_v10 = vld [vmem:[%s7359_s13 + $0x48] sm:$0xf]  ;;  %v2324_v8 = vor.u32 %v2323_v35, %v8066_v51 }
  0x8e   : > { %6751 = vmatprep.subr.bf16.mxu1 %v8028_v36  ;;  %v2371_v1 = vrot.slane %v2369_v12, 4  ;;  %v8108_v46 = vrot.slane %v2300_v14, 4  ;;  %v2272_v62 = vsel %vm7390_vm2, %v8056_v4, %v7990_v19  ;;  %v2282_v35 = vsel %vm7390_vm2, %v8058_v7, %v8042_v25  ;;  %v5885_v4 = vld [vmem:[%s7359_s13 + $0x54] sm:$0xf] }
  0x8f   : > { %v8106_v60 = vrot.slane %v2365_v47, 5  ;;  %v2383_v14 = vshll.u32 %v5882_v10, 16  ;;  %v2375_v49 = vshll.u32 %v8083_v45, 16  ;;  %v2393_v19 = vshrl.u32 %v8104_v39, 16 }
  0x90   : > { %6592 = vmatmul.mubr.bf16.gmra.mxu1 %v5724_v54  ;;  %v8094_v54 = vsel %vm7701_vm5, %v10222_v57, %v10221_v16  ;;  %v8110_v16 = vrot.slane %v2314_v58, 4  ;;  %v8112_v57 = vrot.slane %v2327_v34, 5  ;;  %v2389_v58 = vshll.u32 %v8104_v39, 16 }
  0x91   : > { %6595 = vmatprep.mubr.bf16.mxu1 %v5725_v33  ;;  %v10223_v33 = vrot.slane %v10217_v5, 5  ;;  %v2380_v5 = vshrl.u32 %v5882_v10, 16  ;;  %v10225_v34 = vcombine.low %v7885_v44, %v7901_v41  ;;  %v8133_v47 = vrot.slane %v2324_v8, 4  ;;  %v8139_v10 = vld [vmem:[%s7359_s13 + $0x58] sm:$0xf] }
  0x92   : > { %v8135_v12 = vrot.slane %v2351_v17, 5  ;;  %v2362_v25 = vor.u32 %v2361_v20, %v2358_v59  ;;  %v2372_v7 = vor.u32 %v2371_v1, %v8106_v60  ;;  %v10226_v44 = vcombine.low %v7480_v13, %v7487_v22  ;;  %v8145_v41 = vld [vmem:[%s7359_s13 + $0x50] sm:$0x1] }
  0x93   : > { %v8100_v3 = vsel %vm7701_vm5, %v1499_v55, %v10223_v33  ;;  %v10224_v55 = vcombine.low %v7865_v6, %v7877_v21  ;;  %v2338_v6 = vor.u32 %v2337_v63, %v2334_v53  ;;  %v2348_v21 = vor.u32 %v2347_v48, %v8080_v50 }
  0x94   : > { %v2382_v48 = vrot.slane %v2380_v5, 4  ;;  %v2385_v53 = vrot.slane %v2383_v14, 5  ;;  %v8147_v63 = vrot.slane %v2389_v58, 5  ;;  %v2395_v17 = vrot.slane %v2393_v19, 4  ;;  %v5888_v5 = vld [vmem:[%s7359_s13 + $0x60] sm:$0xf] }
  0x95   : > { %6644 = vmatmul.mubr.bf16.gmra.mxu0 %v10224_v55  ;;  %v10227_v33 = vcombine.low %v7532_v18, %v7538_v31  ;;  %v2404_v8 = vshrl.u32 %v5885_v4, 16  ;;  %v2407_v59 = vshll.u32 %v5885_v4, 16  ;;  %v8152_v20 = vrot.slane %v2338_v6, 4  ;;  %v8169_v31 = vld [vmem:[%s7359_s13 + $0x64] sm:$0xf] }
  0x96   : > { %6647 = vmatprep.mubr.bf16.mxu0 %v10225_v34  ;;  %v8154_v1 = vrot.slane %v2348_v21, 4  ;;  %v8156_v13 = vrot.slane %v2375_v49, 5  ;;  %v2413_v22 = vshll.u32 %v8139_v10, 16  ;;  %v5786_v55 = vcombine.low %v8094_v54, %v8100_v3  ;;  %v8165_v34 = vld [vmem:[%s7359_s13 + $0x5c] sm:$0x1] }
  0x97   : > { %v5931_v14 = vcombine.low %v2272_v62, %v2282_v35  ;;  %v8162_v58 = vrot.slane %v2362_v25, 4  ;;  %v2417_v18 = vshrl.u32 %v8139_v10, 16  ;;  %v8171_v6 = vrot.slane %v2372_v7, 4 }
  0x98   : > { %6596 = vmatmul.mubr.bf16.gmra.mxu1 %v10226_v44  ;;  %v2399_v21 = vshll.u32 %v8145_v41, 16  ;;  %v2428_v49 = vshrl.u32 %v5888_v5, 16  ;;  %v2431_v19 = vshll.u32 %v5888_v5, 16  ;;  %v10228_v4 = vcombine.low %v7905_v26, %v7933_v37 }
  0x99   : > { %6599 = vmatprep.mubr.bf16.mxu1 %v10227_v33  ;;  %v2386_v54 = vor.u32 %v2385_v53, %v2382_v48  ;;  %v2396_v3 = vor.u32 %v2395_v17, %v8147_v63  ;;  %v2406_v62 = vrot.slane %v2404_v8, 4  ;;  %v2409_v35 = vrot.slane %v2407_v59, 5  ;;  %v8209_v8 = vld [vmem:[%s7359_s13 + $0x70] sm:$0xf] }
  0x9a   : > { %v10229_v25 = vcombine.low %v7915_v2, %v7945_v29  ;;  %v8181_v7 = vrot.slane %v2413_v22, 5  ;;  %v2419_v44 = vrot.slane %v2417_v18, 4  ;;  %v2423_v33 = vshll.u32 %v8165_v34, 16 }
  0x9b   : > { %v2437_v26 = vshll.u32 %v8169_v31, 16  ;;  %v2296_v37 = vsel %vm7390_vm2, %v8064_v30, %v8051_v11  ;;  %v2306_v2 = vsel %vm7390_vm2, %v8108_v46, %v8060_v38  ;;  %v2430_v29 = vrot.slane %v2428_v49, 4  ;;  %v5891_v46 = vld [vmem:[%s7359_s13 + $0x6c] sm:$0xf] }
  0x9c   : > { %v2433_v48 = vrot.slane %v2431_v19, 5  ;;  %v10230_v53 = vcombine.low %v7574_v9, %v7583_v28  ;;  %v2320_v17 = vsel %vm7390_vm2, %v8110_v16, %v8066_v51  ;;  %v2330_v11 = vsel %vm7390_vm2, %v8133_v47, %v8112_v57  ;;  %v8217_v16 = vld [vmem:[%s7359_s13 + $0x68] sm:$0x1] }
  0x9d   : > { %6648 = vmatmul.mubr.bf16.gmra.mxu0 %v10228_v4  ;;  %v8204_v30 = vrot.slane %v2399_v21, 5  ;;  %v2441_v38 = vshrl.u32 %v8169_v31, 16  ;;  %v10231_v9 = vcombine.low %v10212_v24, %v7638_v52  ;;  %v8214_v28 = vrot.slane %v2386_v54, 4  ;;  %v7078_v52 = vld [vmem:[%s7359_s13 + $0xc] sm:$0xff]  }
  0x9e   : > { %6651 = vmatprep.mubr.bf16.mxu0 %v10229_v25  ;;  %v2410_v51 = vor.u32 %v2409_v35, %v2406_v62  ;;  %v2452_v59 = vshrl.u32 %v5891_v46, 16  ;;  %v2455_v57 = vshll.u32 %v5891_v46, 16  ;;  %v8219_v47 = vrot.slane %v2396_v3, 4  ;;  %v8230_v62 = vld [vmem:[%s7359_s13 + $0x74] sm:$0x1] }
  0x9f   : > { %v2420_v22 = vor.u32 %v2419_v44, %v8181_v7  ;;  %v8222_v5 = vrot.slane %v2423_v33, 5  ;;  %v2461_v18 = vshll.u32 %v8209_v8, 16  ;;  %v2434_v24 = vor.u32 %v2433_v48, %v2430_v29  ;;  %v5894_v25 = vld [vmem:[%s7359_s13 + $0x78] sm:$0xf]  ;;  %v8234_v44 = vld [vmem:[%s7359_s13 + $0x7c] sm:$0xf] }
  0xa0   : > { %6600 = vmatmul.mubr.bf16.gmra.mxu1 %v10230_v53  ;;  %v8226_v21 = vrot.slane %v2437_v26, 5  ;;  %v2443_v49 = vrot.slane %v2441_v38, 4  ;;  %v2465_v19 = vshrl.u32 %v8209_v8, 16  ;;  %v5932_v4 = vcombine.low %v2296_v37, %v2306_v2  ;;  %v8241_v26 = vld [vmem:[%s7359_s13 + $0x80] sm:$0x1] }
  0xa1   : > { %6603 = vmatprep.mubr.bf16.mxu1 %v10231_v9  ;;  %v5933_v54 = vcombine.low %v2320_v17, %v2330_v11  ;;  %v2454_v3 = vrot.slane %v2452_v59, 4  ;;  %v2457_v35 = vrot.slane %v2455_v57, 5  ;;  %v8236_v33 = vrot.slane %v2410_v51, 4 }
  0xa2   : > { %v8238_v53 = vrot.slane %v2461_v18, 5  ;;  %v2467_v29 = vrot.slane %v2465_v19, 4  ;;  %v2476_v48 = vshrl.u32 %v5894_v25, 16  ;;  %v2447_v37 = vshll.u32 %v8217_v16, 16  ;;  %v5897_v19 = vld [vmem:[%s7359_s13 + $0x84] sm:$0xf] }
  0xa3   : > { %v2479_v2 = vshll.u32 %v5894_v25, 16  ;;  %v2485_v17 = vshll.u32 %v8234_v44, 16  ;;  %v2489_v11 = vshrl.u32 %v8234_v44, 16  ;;  %v8246_v38 = vrot.slane %v2420_v22, 4  ;;  %v7082_v25 = vld [vmem:[%s7359_s13 + $0x24] sm:$0xff]  }
  0xa4   : > { %v8248_v46 = vrot.slane %v2434_v24, 4  ;;  %v2478_v9 = vrot.slane %v2476_v48, 4  ;;  %v10232_v51 = vcombine.low %v10215_v43, %v10214_v40  ;;  %v2344_v22 = vsel %vm7390_vm2, %v8152_v20, %v8080_v50 }
  0xa5   : > { %6652 = vmatmul.mubr.bf16.gmra.mxu0 %v5786_v55  ;;  %v2444_v55 = vor.u32 %v2443_v49, %v8226_v21  ;;  %v2481_v59 = vrot.slane %v2479_v2, 5  ;;  %v8254_v57 = vrot.slane %v2485_v17, 5  ;;  %v2491_v18 = vrot.slane %v2489_v11, 4  ;;  %v8303_v17 = vld [vmem:[%s7359_s13 + $0x8c] sm:$0x1] }
  0xa6   : > { %6719 = vmatprep.mubr.bf16.mxu0 %v5931_v14  ;;  %v2458_v14 = vor.u32 %v2457_v35, %v2454_v3  ;;  %v2468_v24 = vor.u32 %v2467_v29, %v8238_v53  ;;  %v2471_v49 = vshll.u32 %v8230_v62, 16  ;;  %v2495_v40 = vshll.u32 %v8241_v26, 16  ;;  %v8277_v3 = vld [vmem:[%s7359_s13 + $0x88] sm:$0xf]  ;;  %v7079_v35 = vld [vmem:[%s7359_s13 + $0x18] sm:$0xff]  }
  0xa7   : > { %v2354_v43 = vsel %vm7390_vm2, %v8154_v1, %v8135_v12  ;;  %v2378_v50 = vsel %vm7390_vm2, %v8171_v6, %v8156_v13  ;;  %v2482_v20 = vor.u32 %v2481_v59, %v2478_v9  ;;  %v7085_v12 = vld [vmem:[%s10170_s1 + $0x1b0] sm:$0xff]   ;;  %v8284_v1 = vrot.slane %v2447_v37, 5  ;;  %v8308_v11 = vld [vmem:[%s10170_s1 + $0x1a8] sm:$0xff]  }
  0xa8   : > { %6604 = vmatmul.mubr.bf16.gmra.mxu1 %v10232_v51  ;;  %v2503_v29 = vshll.u32 %v5897_v19, 16  ;;  %v7084_v13 = vld [vmem:[%s10170_s1 + $0x170] sm:$0xff]   ;;  %v2392_v6 = vsel %vm7390_vm2, %v8214_v28, %v8147_v63  ;;  %v2402_v48 = vsel %vm7390_vm2, %v8219_v47, %v8204_v30  ;;  %v8298_v37 = vrot.slane %v2444_v55, 4 }
  0xa9   : > { %6671 = vmatprep.mubr.bf16.mxu1 %v7078_v52  ;;  %v2368_v52 = vsel %vm7390_vm2, %v8162_v58, %v8106_v60  ;;  %v2492_v60 = vor.u32 %v2491_v18, %v8254_v57  ;;  %v2500_v58 = vshrl.u32 %v5897_v19, 16  ;;  %v8300_v2 = vrot.slane %v2458_v14, 4  ;;  %v5900_v14 = vld [vmem:[%s7359_s13 + $0x90] sm:$0xf]  ;;  %v8331_v59 = vld [vmem:[%s7359_s13 + $0x94] sm:$0xf] }
  0xaa   : > { %v8310_v63 = vrot.slane %v2468_v24, 4  ;;  %v8312_v28 = vrot.slane %v2471_v49, 5  ;;  %v2509_v30 = vshll.u32 %v8277_v3, 16  ;;  %v2513_v47 = vshrl.u32 %v8277_v3, 16  ;;  %10233 = vst [vmem:[#allocation13_spill] sm:$0xff] %v8331_v59 }
  0xab   : > { %v2426_v55 = vsel %vm7390_vm2, %v8246_v38, %v8222_v5  ;;  %v8325_v9 = vrot.slane %v2482_v20, 4  ;;  %v8327_v51 = vrot.slane %v2495_v40, 5  ;;  %v2505_v18 = vrot.slane %v2503_v29, 5  ;;  %v7088_v5 = vld [vmem:[%s10170_s1 + $0x168] sm:$0xff]  }
  0xac   : > { %v2527_v38 = vshll.u32 %v5900_v14, 16  ;;  %v2533_v24 = vshll.u32 %v8331_v59, 16  ;;  %v2537_v49 = vshrl.u32 %v8331_v59, 16  ;;  %v5934_v40 = vcombine.low %v2344_v22, %v2354_v43 }
  0xad   : > { %6720 = vmatmul.mubr.bf16.vlgmr.msra.gmra.mxu0 %v5932_v4  ;;  %v2416_v4 = vsel %vm7390_vm2, %v8236_v33, %v8181_v7  ;;  %v2519_v7 = vshll.u32 %v8303_v17, 16  ;;  %v2524_v33 = vshrl.u32 %v5900_v14, 16  ;;  %v5935_v20 = vcombine.low %v2368_v52, %v2378_v50 }
  0xae   : > { %6800 = vmatpush3.bf16.msra.mxu0 %v8033_v15  ;;  %6723 = vmatprep.mubr.bf16.mxu0 %v5933_v54  ;;  %v8333_v15 = vrot.slane %v2492_v60, 4  ;;  %v2502_v54 = vrot.slane %v2500_v58, 4  ;;  %v8342_v19 = vrot.slane %v2509_v30, 5  ;;  %v7083_v60 = vld [vmem:[%s7359_s13 + $0x30] sm:$0xff]   ;;  %v7093_v58 = vld [vmem:[%s10170_s1 + $0x1a0] sm:$0xff]   ;;  %v2529_v14 = vrot.slane %v2527_v38, 5 }
  0xaf   : > { %6801 = vmatprep.subr.bf16.mxu0 %v7085_v12  ;;  %v2526_v29 = vrot.slane %v2524_v33, 4  ;;  %v2539_v22 = vrot.slane %v2537_v49, 4  ;;  %v8350_v43 = vcombine.low %v2392_v6, %v2402_v48  ;;  %v8353_v52 = vcombine.low %v2416_v4, %v2426_v55  ;;  %v5903_v30 = vld [vmem:[%s7359_s13 + $0x9c] sm:$0xf]  ;;  %v8375_v4 = vld [vmem:[%s7359_s13 + $0xa4] sm:$0x1] }
  0xb0   : > { %6672 = vmatmul.mubr.bf16.vlgmr.msra.gmra.mxu1 %v7079_v35  ;;  %v2515_v35 = vrot.slane %v2513_v47, 4  ;;  %v2506_v48 = vor.u32 %v2505_v18, %v2502_v54  ;;  %v8372_v47 = vld [vmem:[%s7359_s13 + $0xa0] sm:$0xf]  ;;  %10236 = vst [vmem:[#allocation16_spill] sm:$0xff] %v8375_v4  ;;  %v2548_v55 = vshrl.u32 %v5903_v30, 16  ;;  %v2551_v33 = vshll.u32 %v5903_v30, 16 }
  0xb1   : > { %6752 = vmatpush3.bf16.msra.mxu1 %v8028_v36  ;;  %6675 = vmatprep.mubr.bf16.mxu1 %v7082_v25  ;;  %v8348_v36 = vrot.slane %v2533_v24, 5  ;;  %v2450_v25 = vsel %vm7390_vm2, %v8298_v37, %v8284_v1  ;;  %10235 = vst [vmem:[#allocation15_spill] sm:$0xff] %v8372_v47  ;;  %v7086_v38 = vld [vmem:[%s7359_s13 + $0x3c] sm:$0xff]   ;;  %v2557_v37 = vshll.u32 %v8372_v47, 16  ;;  %v2561_v24 = vshrl.u32 %v8372_v47, 16 }
  0xb2   : > { %6753 = vmatprep.subr.bf16.mxu1 %v7084_v13  ;;  %6802 = vmatpush3.bf16.msra.mxu0 %v7085_v12  ;;  %v8364_v12 = vld [vmem:[%s7359_s13 + $0x98] sm:$0x1]  ;;  %v2516_v1 = vor.u32 %v2515_v35, %v8342_v19  ;;  %v7092_v54 = vld [vmem:[%s10170_s1 + $0x160] sm:$0xff]   ;;  %v2530_v18 = vor.u32 %v2529_v14, %v2526_v29  ;;  %v2550_v30 = vrot.slane %v2548_v55, 4  ;;  %v2553_v49 = vrot.slane %v2551_v33, 5 }
  0xb3   : > { %6803 = vmatprep.subr.bf16.mxu0 %v8308_v11  ;;  %10234 = vst [vmem:[#allocation14_spill] sm:$0xff] %v8364_v12  ;;  %v2543_v35 = vshll.u32 %v8364_v12, 16  ;;  %v2563_v6 = vrot.slane %v2561_v24, 4  ;;  %v2567_v50 = vshll.u32 %v8375_v4, 16  ;;  %v5906_v47 = vld [vmem:[%s7359_s13 + $0xa8] sm:$0xf] }
  0xb4   : > { %v7096_v29 = vld [vmem:[%s10170_s1 + $0x158] sm:$0xff]   ;;  %v8398_v14 = vrot.slane %v2506_v48, 4  ;;  %v2572_v55 = vshrl.u32 %v5906_v47, 16  ;;  %v2575_v33 = vshll.u32 %v5906_v47, 16  ;;  %v8411_v4 = vld [vmem:[%s7359_s13 + $0xb0] sm:$0x1] }
  0xb5   : > { %6724 = vmatmul.mubr.bf16.gmra.mxu0 %v5934_v40  ;;  %6754 = vmatpush3.bf16.msra.mxu1 %v7084_v13  ;;  %v7097_v13 = vld [vmem:[%s10170_s1 + $0x198] sm:$0xff]   ;;  %v2540_v40 = vor.u32 %v2539_v22, %v8348_v36  ;;  %v8400_v22 = vrot.slane %v2519_v7, 5  ;;  %v7087_v48 = vld [vmem:[%s7359_s13 + $0x48] sm:$0xff]   ;;  %v8414_v7 = vrot.slane %v2516_v1, 4  ;;  %v8416_v12 = vrot.slane %v2530_v18, 4 }
  0xb6   : > { %6727 = vmatprep.mubr.bf16.mxu0 %v5935_v20  ;;  %6755 = vmatprep.subr.bf16.mxu1 %v7088_v5  ;;  %v8391_v20 = vrot.slane %v2557_v37, 5  ;;  %v2554_v37 = vor.u32 %v2553_v49, %v2550_v30  ;;  %v8418_v59 = vrot.slane %v2543_v35, 5  ;;  %v7100_v49 = vld [vmem:[%s10170_s1 + $0x150] sm:$0xff]   ;;  %v8435_v18 = vrot.slane %v2575_v33, 5 }
  0xb7   : > { %6804 = vmatpush3.bf16.msra.mxu0 %v8308_v11  ;;  %v8403_v11 = vld [vmem:[%s7359_s13 + $0xac] sm:$0xf]  ;;  %v2591_v35 = vshll.u32 %v8411_v4, 16 }
  0xb8   : > { %6676 = vmatmul.mubr.bf16.gmra.mxu1 %v7083_v60  ;;  %6805 = vmatprep.subr.bf16.mxu0 %v7093_v58  ;;  %10237 = vst [vmem:[#allocation17_spill] sm:$0xff] %v8403_v11  ;;  %v2474_v60 = vsel %vm7390_vm2, %v8310_v63, %v8312_v28  ;;  %v2564_v24 = vor.u32 %v2563_v6, %v8391_v20  ;;  %v2581_v47 = vshll.u32 %v8403_v11, 16  ;;  %v7090_v63 = vld [vmem:[%s7359_s13 + $0x54] sm:$0xff]   ;;  %v8425_v28 = vrot.slane %v2540_v40, 4 }
  0xb9   : > { %6679 = vmatprep.mubr.bf16.mxu1 %v7086_v38  ;;  %6756 = vmatpush3.bf16.msra.mxu1 %v7088_v5  ;;  %v7101_v5 = vld [vmem:[%s10170_s1 + $0x190] sm:$0xff]   ;;  %v8427_v6 = vrot.slane %v2567_v50, 5  ;;  %v8429_v38 = vrot.slane %v2572_v55, 4  ;;  %v2585_v1 = vshrl.u32 %v8403_v11, 16  ;;  %v8444_v40 = vrot.slane %v2554_v37, 4 }
  0xba   : > { %6757 = vmatprep.subr.bf16.mxu1 %v7092_v54  ;;  %v8446_v30 = vrot.slane %v2564_v24, 4  ;;  %v5909_v55 = vld [vmem:[%s7359_s13 + $0xb4] sm:$0xf]  ;;  %v8450_v11 = vld [vmem:[%s7359_s13 + $0xb8] sm:$0xf]  ;;  %v7104_v24 = vld [vmem:[%s10170_s1 + $0x148] sm:$0xff]  }
  0xbb   : > { %6806 = vmatpush3.bf16.msra.mxu0 %v7093_v58  ;;  %v10238_v58 = vsel %vm7390_vm2, %v8248_v46, %v8226_v21  ;;  %10239 = vst [vmem:[#allocation18_spill] sm:$0xff] %v8450_v11  ;;  %v2488_v21 = vsel %vm7390_vm2, %v8325_v9, %v8254_v57  ;;  %v8462_v46 = vrot.slane %v2581_v47, 5  ;;  %v5912_v37 = vld [vmem:[%s7359_s13 + $0xc0] sm:$0xf]  ;;  %v2498_v57 = vsel %vm7390_vm2, %v8333_v15, %v8327_v51  ;;  %v8489_v47 = vld [vmem:[%s7359_s13 + $0xc4] sm:$0xf] }
  0xbc   : > { %6807 = vmatprep.subr.bf16.mxu0 %v7097_v13  ;;  %v5938_v50 = vcombine.low %v10238_v58, %v2450_v25  ;;  %v2596_v25 = vshrl.u32 %v5909_v55, 16  ;;  %v2512_v9 = vsel %vm7390_vm2, %v8398_v14, %v8342_v19  ;;  %10242 = vst [vmem:[#allocation20_spill] sm:$0xff] %v8489_v47  ;;  %v8492_v51 = vld [vmem:[%s7359_s13 + $0xc8] sm:$0x1]  ;;  %v2629_v58 = vshll.u32 %v8489_v47, 16 }
  0xbd   : > { %6728 = vmatmul.mubr.bf16.gmra.mxu0 %v8350_v43  ;;  %6758 = vmatpush3.bf16.msra.mxu1 %v7092_v54  ;;  %v10240_v43 = vsel %vm7390_vm2, %v8300_v2, %v8238_v53  ;;  %v2587_v54 = vrot.slane %v2585_v1, 4  ;;  %v2599_v53 = vshll.u32 %v5909_v55, 16  ;;  %v2605_v2 = vshll.u32 %v8450_v11, 16 }
  0xbe   : > { %6731 = vmatprep.mubr.bf16.mxu0 %v8353_v52  ;;  %v5939_v33 = vcombine.low %v10240_v43, %v2474_v60  ;;  %6759 = vmatprep.subr.bf16.mxu1 %v7096_v29  ;;  %v7105_v52 = vld [vmem:[%s10170_s1 + $0x188] sm:$0xff]   ;;  %v2609_v60 = vshrl.u32 %v8450_v11, 16  ;;  %v2598_v15 = vrot.slane %v2596_v25, 4  ;;  %v10243_v55 = vrot.slane %v7897_v32, 5 }
  0xbf   : > { %6808 = vmatpush3.bf16.msra.mxu0 %v7097_v13  ;;  %v2522_v13 = vsel %vm7390_vm2, %v8414_v7, %v8400_v22  ;;  %v2601_v19 = vrot.slane %v2599_v53, 5  ;;  %v8494_v14 = vrot.slane %v2605_v2, 5  ;;  %v2620_v22 = vshrl.u32 %v5912_v37, 16  ;;  %v7091_v2 = vld [vmem:[%s7359_s13 + $0x60] sm:$0xff]  }
  0xc0   : > { %6680 = vmatmul.mubr.bf16.gmra.mxu1 %v7087_v48  ;;  %6809 = vmatprep.subr.bf16.mxu0 %v7101_v5  ;;  %v8486_v48 = vld [vmem:[%s7359_s13 + $0xbc] sm:$0x1]  ;;  %v2611_v1 = vrot.slane %v2609_v60, 4  ;;  %v2623_v7 = vshll.u32 %v5912_v37, 16  ;;  %v8499_v43 = vrot.slane %v10243_v55, 4  ;;  %v8504_v25 = vrot.slane %v2591_v35, 5 }
  0xc1   : > { %10241 = vst [vmem:[#allocation19_spill] sm:$0xff] %v8486_v48  ;;  %6683 = vmatprep.mubr.bf16.mxu1 %v7090_v63  ;;  %6760 = vmatpush3.bf16.msra.mxu1 %v7096_v29  ;;  %v2578_v63 = vor.u32 %v8435_v18, %v8429_v38  ;;  %v2588_v29 = vor.u32 %v2587_v54, %v8462_v46  ;;  %v2633_v53 = vshrl.u32 %v8489_v47, 16  ;;  %v2615_v60 = vshll.u32 %v8486_v48, 16  ;;  %v7094_v38 = vld [vmem:[%s7359_s13 + $0x6c] sm:$0xff]   ;;  %v8524_v48 = vld [vmem:[%s7359_s13 + $0x18] sm:$0xe] }
  0xc2   : > { %6761 = vmatprep.subr.bf16.mxu1 %v7100_v49  ;;  %v2622_v37 = vrot.slane %v2620_v22, 4  ;;  %v2625_v11 = vrot.slane %v2623_v7, 5  ;;  %v8509_v55 = vrot.slane %v2629_v58, 5  ;;  %v2602_v18 = vor.u32 %v2601_v19, %v2598_v15  ;;  %v7108_v22 = vld [vmem:[%s10170_s1 + $0x140] sm:$0xff]   ;;  %v8521_v58 = vld [vmem:[%s7359_s13 + $0xc] sm:$0xe] }
  0xc3   : > { %6810 = vmatpush3.bf16.msra.mxu0 %v7101_v5  ;;  %v7109_v5 = vld [vmem:[%s10170_s1 + $0x180] sm:$0xff]   ;;  %v2612_v35 = vor.u32 %v2611_v1, %v8494_v14  ;;  %v2635_v54 = vrot.slane %v2633_v53, 4  ;;  %v2639_v47 = vshll.u32 %v8492_v51, 16  ;;  %v5940_v15 = vcombine.low %v2488_v21, %v2498_v57 }
  0xc4   : > { %6811 = vmatprep.subr.bf16.mxu0 %v7105_v52  ;;  %v2626_v7 = vor.u32 %v2625_v11, %v2622_v37  ;;  %v5941_v19 = vcombine.low %v2512_v9, %v2522_v13  ;;  %v8532_v1 = vrot.slane %v2578_v63, 4  ;;  %v8534_v11 = vrot.slane %v2588_v29, 4  ;;  %v7095_v9 = vld [vmem:[%s7359_s13 + $0x78] sm:$0xff]   ;;  %v7098_v37 = vld [vmem:[%s7359_s13 + $0x84] sm:$0xff]  }
  0xc5   : > { %6732 = vmatmul.mubr.bf16.gmra.mxu0 %v5938_v50  ;;  %6762 = vmatpush3.bf16.msra.mxu1 %v7100_v49  ;;  %v8529_v49 = vld [vmem:[%s10170_s1 + $0x238] sm:$0xff]   ;;  %v2636_v50 = vor.u32 %v2635_v54, %v8509_v55  ;;  %v8543_v53 = vrot.slane %v2612_v35, 4  ;;  %v8545_v21 = vrot.slane %v2615_v60, 5  ;;  %v8551_v63 = vrot.slane %v2639_v47, 5  ;;  %v5958_v60 = vld [vmem:[%s7359_s13 + $0x30] sm:$0xe] }
  0xc6   : > { %6735 = vmatprep.mubr.bf16.mxu0 %v5939_v33  ;;  %6763 = vmatprep.subr.bf16.mxu1 %v7104_v24  ;;  %v8539_v33 = vld [vmem:[%s10170_s1 + $0x1f8] sm:$0xff]   ;;  %v8549_v13 = vrot.slane %v2626_v7, 4  ;;  %v3034_v29 = vrot.slane %v7971_v42, 5  ;;  %v10244_v35 = vld [vmem:[#allocation9_spill] sm:$0xff]  ;;  %v5974_v47 = vrot.slane %v5958_v60, 9  ;;  %v10247_v60 = vld [vmem:[#allocation10_spill] sm:$0xff] }
  0xc7   : > { %6812 = vmatpush3.bf16.msra.mxu0 %v7105_v52  ;;  %v8541_v52 = vrot.slane %v2602_v18, 4  ;;  %v10245_v7 = vld [vmem:[#allocation12_spill] sm:$0xff]  ;;  %v3055_v18 = vrot.slane %v8054_v0, 5  ;;  %v2570_v0 = vsel %vm7390_vm2, %v8446_v30, %v8427_v6  ;;  %v3069_v30 = vrot.slane %v8145_v41, 5 }
  0xc8   : > { %6684 = vmatmul.mubr.bf16.gmra.mxu1 %v7091_v2  ;;  %6813 = vmatprep.subr.bf16.mxu0 %v7109_v5  ;;  %v3052_v57 = vrot.slane %v10245_v7, 5  ;;  %v10246_v2 = vld [vmem:[#allocation11_spill] sm:$0xff] }
  0xc9   : > { %6687 = vmatprep.mubr.bf16.mxu1 %v7094_v38  ;;  %6764 = vmatpush3.bf16.msra.mxu1 %v7104_v24  ;;  %v8556_v24 = vrot.slane %v2636_v50, 4  ;;  %v3038_v38 = vrot.slane %v7988_v61, 5  ;;  %v2536_v50 = vsel %vm7390_vm2, %v8416_v12, %v8348_v36  ;;  %v3059_v54 = vrot.slane %v10246_v2, 5  ;;  %v5959_v12 = vld [vmem:[%s7359_s13 + $0x3c] sm:$0xe] }
  0xca   : > { %6765 = vmatprep.subr.bf16.mxu1 %v7108_v22  ;;  %v8578_v7 = vsel %vm7701_vm5, %v5974_v47, %v3052_v57  ;;  %v3054_v36 = vrot.slane %v3052_v57, 4  ;;  %v5975_v2 = vrot.slane %v5959_v12, 9  ;;  %v7099_v47 = vld [vmem:[%s7359_s13 + $0x90] sm:$0xff]   ;;  %v3076_v12 = vrot.slane %v8165_v34, 5 }
  0xcb   : > { %6814 = vmatpush3.bf16.msra.mxu0 %v7109_v5  ;;  %v2546_v5 = vsel %vm7390_vm2, %v8425_v28, %v8418_v59  ;;  %v2560_v59 = vsel %vm7390_vm2, %v8444_v40, %v8391_v20  ;;  %v3061_v28 = vrot.slane %v3059_v54, 4  ;;  %v3066_v20 = vrot.slane %v8104_v39, 5 }
  0xcc   : > { %6895 = vmatprep.subr.bf16.mxu0 %v8529_v49  ;;  %v8592_v57 = vsel %vm7701_vm5, %v3054_v36, %v3055_v18  ;;  %v5943_v18 = vcombine.low %v2560_v59, %v2570_v0  ;;  %v8607_v39 = vsel %vm7701_vm5, %v5975_v2, %v3059_v54  ;;  %v2584_v36 = vsel %vm7390_vm2, %v8532_v1, %v8462_v46  ;;  %v5961_v54 = vld [vmem:[%s7359_s13 + $0x54] sm:$0xe] }
  0xcd   : > { %6736 = vmatmul.mubr.bf16.gmra.mxu0 %v5940_v15  ;;  %6766 = vmatpush3.bf16.msra.mxu1 %v7108_v22  ;;  %v3048_v15 = vrot.slane %v10247_v60, 5  ;;  %v3062_v22 = vrot.slane %v8083_v45, 5  ;;  %v6006_v40 = vcombine.low %v8578_v7, %v8592_v57  ;;  %v5960_v45 = vld [vmem:[%s7359_s13 + $0x48] sm:$0xe]  ;;  %v2594_v46 = vsel %vm7390_vm2, %v8534_v11, %v8504_v25  ;;  %v7119_v7 = vld [vmem:[%s7359_s13 + $0x54] sm:$0xff]  }
  0xce   : > { %6739 = vmatprep.mubr.bf16.mxu0 %v5941_v19  ;;  %6847 = vmatprep.subr.bf16.mxu1 %v8539_v33  ;;  %v5942_v19 = vcombine.low %v2536_v50, %v2546_v5  ;;  %v3068_v50 = vrot.slane %v3066_v20, 4  ;;  %v7102_v5 = vld [vmem:[%s7359_s13 + $0x9c] sm:$0xff]   ;;  %v3080_v2 = vrot.slane %v8169_v31, 5  ;;  %v2608_v34 = vsel %vm7390_vm2, %v8541_v52, %v8494_v14 }
  0xcf   : > { %v8599_v6 = vsel %vm7701_vm5, %v3061_v28, %v3062_v22  ;;  %v5977_v28 = vrot.slane %v5961_v54, 9  ;;  %v5962_v22 = vld [vmem:[%s7359_s13 + $0x60] sm:$0xe]  ;;  %v3083_v25 = vrot.slane %v8217_v16, 5  ;;  %v2618_v11 = vsel %vm7390_vm2, %v8543_v53, %v8545_v21 }
  0xd0   : > { %6688 = vmatmul.mubr.bf16.gmra.mxu1 %v7095_v9  ;;  %v3073_v9 = vrot.slane %v8139_v10, 5  ;;  %v6007_v41 = vcombine.low %v8607_v39, %v8599_v6  ;;  %v8622_v59 = vsel %vm7701_vm5, %v3068_v50, %v3069_v30  ;;  %v3087_v14 = vrot.slane %v8209_v8, 5  ;;  %v6188_v6 = vld [vmem:[%s7359_s13 + $0x24] sm:$0xe] }
  0xd1   : > { %6691 = vmatprep.mubr.bf16.mxu1 %v7098_v37  ;;  %v5976_v37 = vrot.slane %v5960_v45, 9  ;;  %v3082_v45 = vrot.slane %v3080_v2, 4  ;;  %v5944_v52 = vcombine.low %v2584_v36, %v2594_v46  ;;  %v3090_v8 = vrot.slane %v8230_v62, 5  ;;  %v5964_v36 = vld [vmem:[%s7359_s13 + $0x78] sm:$0xe] }
  0xd2   : > { %v3075_v0 = vrot.slane %v3073_v9, 4  ;;  %v8649_v31 = vsel %vm7701_vm5, %v5977_v28, %v3073_v9  ;;  %v3089_v9 = vrot.slane %v3087_v14, 4  ;;  %v3094_v54 = vrot.slane %v8234_v44, 5 }
  0xd3   : > { %v8618_v10 = vsel %vm7701_vm5, %v5976_v37, %v3066_v20  ;;  %v5978_v20 = vrot.slane %v5962_v22, 9  ;;  %v8661_v53 = vsel %vm7701_vm5, %v3082_v45, %v3083_v25  ;;  %v5945_v37 = vcombine.low %v2608_v34, %v2618_v11 }
  0xd4   : > { %v8677_v46 = vsel %vm7701_vm5, %v3089_v9, %v3090_v8  ;;  %v5980_v62 = vrot.slane %v5964_v36, 9  ;;  %v3101_v28 = vrot.slane %v8277_v3, 5  ;;  %v3096_v44 = vrot.slane %v3094_v54, 4  ;;  %v7110_v8 = vld [vmem:[%s7359_s13 + $0x18] sm:$0xff]  }
  0xd5   : > { %6740 = vmatmul.mubr.bf16.gmra.mxu0 %v5942_v19  ;;  %v8640_v19 = vsel %vm7701_vm5, %v3075_v0, %v3076_v12  ;;  %v8656_v16 = vsel %vm7701_vm5, %v5978_v20, %v3080_v2  ;;  %v3097_v0 = vrot.slane %v8241_v26, 5  ;;  %v3104_v26 = vrot.slane %v8303_v17, 5  ;;  %v5965_v20 = vld [vmem:[%s7359_s13 + $0x84] sm:$0xe]  ;;  %v10252_v36 = vld [vmem:[#allocation15_spill] sm:$0xff] }
  0xd6   : > { %6743 = vmatprep.mubr.bf16.mxu0 %v5943_v18  ;;  %v5963_v18 = vld [vmem:[%s7359_s13 + $0x6c] sm:$0xe]  ;;  %v2632_v2 = vsel %vm7390_vm2, %v8549_v13, %v8509_v55  ;;  %v8689_v34 = vsel %vm7701_vm5, %v5980_v62, %v3094_v54  ;;  %v2642_v3 = vsel %vm7390_vm2, %v8556_v24, %v8551_v63  ;;  %v5981_v25 = vrot.slane %v5965_v20, 9  ;;  %v10250_v63 = vld [vmem:[#allocation13_spill] sm:$0xff] }
  0xd7   : > { %v5979_v21 = vrot.slane %v5963_v18, 9  ;;  %v8698_v17 = vsel %vm7701_vm5, %v3096_v44, %v3097_v0  ;;  %v3103_v11 = vrot.slane %v3101_v28, 4  ;;  %v10248_v45 = vrot.slane %v7897_v32, 5  ;;  %v5966_v18 = vld [vmem:[%s7359_s13 + $0x90] sm:$0xe]  ;;  %v7122_v62 = vld [vmem:[%s7359_s13 + $0x60] sm:$0xff]  }
  0xd8   : > { %6692 = vmatmul.mubr.bf16.gmra.mxu1 %v7099_v47  ;;  %v7103_v47 = vld [vmem:[%s7359_s13 + $0xa8] sm:$0xff]   ;;  %v10249_v55 = vrot.slane %v8521_v58, 9  ;;  %v3108_v24 = vrot.slane %v10250_v63, 5  ;;  %v8715_v32 = vsel %vm7701_vm5, %v5981_v25, %v3101_v28  ;;  %v3115_v54 = vrot.slane %v10252_v36, 5 }
  0xd9   : > { %6695 = vmatprep.mubr.bf16.mxu1 %v7102_v5  ;;  %v7106_v5 = vld [vmem:[%s7359_s13 + $0xb4] sm:$0xff]   ;;  %v8673_v12 = vsel %vm7701_vm5, %v5979_v21, %v3087_v14  ;;  %v5957_v14 = vld [vmem:[%s7359_s13 + $0x24] sm:$0xe]  ;;  %v10251_v21 = vld [vmem:[#allocation14_spill] sm:$0xff]  ;;  %v8719_v58 = vsel %vm7701_vm5, %v3103_v11, %v3104_v26  ;;  %v5946_v0 = vcombine.low %v2632_v2, %v2642_v3  ;;  %v3035_v28 = vsel %vm7701_vm5, %v8499_v43, %v3034_v29 }
  0xda   : > { %v3032_v13 = vsel %vm7701_vm5, %v10249_v55, %v10248_v45  ;;  %v3111_v9 = vrot.slane %v10251_v21, 5  ;;  %v3110_v44 = vrot.slane %v3108_v24, 4  ;;  %v7107_v45 = vld [vmem:[%s7359_s13 + $0xc0] sm:$0xff]   ;;  %v3040_v26 = vrot.slane %v3038_v38, 4  ;;  %v5967_v2 = vld [vmem:[%s7359_s13 + $0x9c] sm:$0xe] }
  0xdb   : > { %v3117_v3 = vrot.slane %v3115_v54, 4  ;;  %v5983_v11 = vrot.slane %v5967_v2, 9  ;;  %v10254_v55 = vld [vmem:[#allocation17_spill] sm:$0xff]  ;;  %v6003_v21 = vcombine.low %v3032_v13, %v3035_v28  ;;  %v10258_v28 = vrot.slane %v8524_v48, 9  ;;  %v8863_v43 = vld [vmem:[%s7359_s13 + $0x34] sm:$0xf] }
  0xdc   : > { %v8740_v25 = vsel %vm7701_vm5, %v3110_v44, %v3111_v9  ;;  %v3122_v42 = vrot.slane %v10254_v55, 5  ;;  %v5968_v63 = vld [vmem:[%s7359_s13 + $0xa8] sm:$0xe]  ;;  %v3956_v39 = vshll.u32 %v8863_v43, 16 }
  0xdd   : > { %6744 = vmatmul.mubr.bf16.gmra.mxu0 %v5944_v52  ;;  %v8753_v9 = vsel %vm7701_vm5, %v5983_v11, %v3115_v54  ;;  %v5969_v54 = vld [vmem:[%s7359_s13 + $0xb4] sm:$0xe] }
  0xde   : > { %6747 = vmatprep.mubr.bf16.mxu0 %v5945_v37  ;;  %v5982_v37 = vrot.slane %v5966_v18, 9  ;;  %v5973_v18 = vrot.slane %v5957_v14, 9  ;;  %v3124_v36 = vrot.slane %v3122_v42, 4  ;;  %v10255_v14 = vrot.slane %v10244_v35, 5 }
  0xdf   : > { %v5985_v55 = vrot.slane %v5969_v54, 9 }
  0xe0   : > { %6696 = vmatmul.mubr.bf16.gmra.mxu1 %v7103_v47  ;;  %v10253_v47 = vld [vmem:[#allocation16_spill] sm:$0xff]  ;;  %v3047_v44 = vrot.slane %v10255_v14, 4  ;;  %v10260_v61 = vmov %v10255_v14  ;;  %v3139_v14 = vrot.slane %v8492_v51, 5  ;;  %v6105_v51 = vld [vmem:[%s7359_s13 + $0x30] sm:$0xf] }
  0xe1   : > { %6699 = vmatprep.mubr.bf16.mxu1 %v7106_v5  ;;  %v3118_v20 = vrot.slane %v10253_v47, 5  ;;  %v8735_v5 = vsel %vm7701_vm5, %v5982_v37, %v3108_v24  ;;  %v3125_v24 = vrot.slane %v8411_v4, 5  ;;  %v5984_v37 = vrot.slane %v5968_v63, 9 }
  0xe2   : > { %v10259_v63 = vrot.slane %v8002_v23, 5  ;;  %v3046_v48 = vsel %vm7701_vm5, %v5973_v18, %v10260_v61  ;;  %v3049_v23 = vsel %vm7701_vm5, %v3047_v44, %v3048_v15  ;;  %v8833_v61 = vld [vmem:[%s7359_s13 + $0x28] sm:$0xf] }
  0xe3   : > { %v8747_v29 = vsel %vm7701_vm5, %v3117_v3, %v3118_v20  ;;  %v10256_v20 = vld [vmem:[#allocation18_spill] sm:$0xff]  ;;  %v8762_v4 = vsel %vm7701_vm5, %v5984_v37, %v3122_v42  ;;  %v8766_v13 = vsel %vm7701_vm5, %v3124_v36, %v3125_v24  ;;  %v3039_v3 = vsel %vm7701_vm5, %v10258_v28, %v3038_v38  ;;  %v5970_v37 = vld [vmem:[%s7359_s13 + $0xc0] sm:$0xe] }
  0xe4   : > { %v3129_v2 = vrot.slane %v10256_v20, 5  ;;  %v3042_v24 = vsel %vm7701_vm5, %v3040_v26, %v10259_v63  ;;  %v10261_v38 = vld [vmem:[#allocation20_spill] sm:$0xff]  ;;  %v5986_v18 = vrot.slane %v5970_v37, 9  ;;  %v7117_v20 = vld [vmem:[%s10170_s1 + $0x230] sm:$0xff]   ;;  %v6005_v54 = vcombine.low %v3046_v48, %v3049_v23  ;;  %v6102_v63 = vld [vmem:[%s7359_s13 + $0x24] sm:$0xf] }
  0xe5   : > { %6748 = vmatmul.mubr.bf16.gmra.mxu0 %v5946_v0  ;;  %v3136_v36 = vrot.slane %v10261_v38, 5  ;;  %v6004_v15 = vcombine.low %v3039_v3, %v3042_v24  ;;  %v7116_v28 = vld [vmem:[%s10170_s1 + $0x1f0] sm:$0xff]   ;;  %v7115_v48 = vld [vmem:[%s7359_s13 + $0x3c] sm:$0xff]   ;;  %v3923_v37 = vshrl.u32 %v6102_v63, 16  ;;  %v7118_v38 = vld [vmem:[%s7359_s13 + $0x48] sm:$0xff]   ;;  %v3932_v23 = vshll.u32 %v8833_v61, 16 }
  0xe6   : > { %6815 = vmatprep.mubr.bf16.mxu0 %v7110_v8  ;;  %v10257_v8 = vld [vmem:[#allocation19_spill] sm:$0xff]  ;;  %v3131_v42 = vrot.slane %v3129_v2, 4  ;;  %v8797_v26 = vsel %vm7701_vm5, %v5985_v55, %v3129_v2  ;;  %v7121_v55 = vld [vmem:[%s10170_s1 + $0x228] sm:$0xff]  }
  0xe7   : > { %v3132_v0 = vrot.slane %v10257_v8, 5  ;;  %v3138_v60 = vrot.slane %v3136_v36, 4  ;;  %v8810_v44 = vsel %vm7701_vm5, %v5986_v18, %v3136_v36  ;;  %v6099_v2 = vld [vmem:[%s7359_s13 + $0x18] sm:$0xf]  ;;  %v7120_v36 = vld [vmem:[%s10170_s1 + $0x1e8] sm:$0xff]   ;;  %v3925_v11 = vrot.slane %v3923_v37, 4 }
  0xe8   : > { %6700 = vmatmul.mubr.bf16.gmra.mxu1 %v7107_v45  ;;  %v7111_v45 = vld [vmem:[%s7359_s13 + $0x24] sm:$0xff]   ;;  %v3902_v24 = vshll.u32 %v6099_v2, 16  ;;  %v6101_v18 = vld [vmem:[%s7359_s13 + $0x20] sm:$0x1]  ;;  %v3947_v37 = vshrl.u32 %v6105_v51, 16 }
  0xe9   : > { %6767 = vmatprep.mubr.bf16.mxu1 %v6003_v21  ;;  %v7114_v21 = vld [vmem:[%s7359_s13 + $0x30] sm:$0xff]   ;;  %v8801_v35 = vsel %vm7701_vm5, %v3131_v42, %v3132_v0  ;;  %v8815_v8 = vsel %vm7701_vm5, %v3138_v60, %v3139_v14  ;;  %v8818_v0 = vld [vmem:[%s7359_s13 + $0x1c] sm:$0xf]  ;;  %v3899_v42 = vshrl.u32 %v6099_v2, 16  ;;  %v3926_v14 = vshll.u32 %v6102_v63, 16 }
  0xea   : > { %v4670_v3 = vrot.slane %v8818_v0, 5  ;;  %v8853_v63 = vld [vmem:[%s7359_s13 + $0x2c] sm:$0x1] }
  0xeb   : > { %v3901_v60 = vrot.slane %v3899_v42, 4  ;;  %v3928_v47 = vrot.slane %v3926_v14, 5  ;;  %v7124_v42 = vld [vmem:[%s10170_s1 + $0x1e0] sm:$0xff]  }
  0xed   : > { %6816 = vmatmul.mubr.bf16.vlgmr.msra.gmra.mxu0 %v7111_v45  ;;  %v3912_v45 = vshrl.u32 %v8818_v0, 16 }
  0xee   : > { %6896 = vmatpush3.bf16.msra.mxu0 %v8529_v49  ;;  %6819 = vmatprep.mubr.bf16.mxu0 %v7114_v21  ;;  %v3908_v49 = vshll.u32 %v8818_v0, 16  ;;  %v3936_v21 = vshrl.u32 %v8833_v61, 16 }
  0xef   : > { %6897 = vmatprep.subr.bf16.mxu0 %v7117_v20 }
  0xf0   : > { %6768 = vmatmul.mubr.bf16.vlgmr.msra.gmra.mxu1 %v6004_v15  ;;  %v6187_v15 = vld [vmem:[%s7359_s13 + $0x18] sm:$0xe]  ;;  %v8848_v2 = vrot.slane %v3908_v49, 5  ;;  %v3918_v49 = vshll.u32 %v6101_v18, 16  ;;  %v3938_v0 = vrot.slane %v3936_v21, 4 }
  0xf1   : > { %6848 = vmatpush3.bf16.msra.mxu1 %v8539_v33  ;;  %6771 = vmatprep.mubr.bf16.mxu1 %v6005_v54  ;;  %v7125_v33 = vld [vmem:[%s10170_s1 + $0x220] sm:$0xff]   ;;  %v3914_v54 = vrot.slane %v3912_v45, 4  ;;  %v8860_v45 = vrot.slane %v3932_v23, 5  ;;  %v7129_v23 = vld [vmem:[%s10170_s1 + $0x218] sm:$0xff]  }
  0xf2   : > { %6849 = vmatprep.subr.bf16.mxu1 %v7116_v28  ;;  %6898 = vmatpush3.bf16.msra.mxu0 %v7117_v20  ;;  %v3904_v20 = vrot.slane %v3902_v24, 5 }
  0xf3   : > { %6899 = vmatprep.subr.bf16.mxu0 %v7121_v55  ;;  %v3915_v21 = vor.u32 %v3914_v54, %v8848_v2  ;;  %v3939_v54 = vor.u32 %v3938_v0, %v8860_v45 }
  0xf5   : > { %6820 = vmatmul.mubr.bf16.gmra.mxu0 %v7115_v48  ;;  %6850 = vmatpush3.bf16.msra.mxu1 %v7116_v28  ;;  %v6203_v48 = vrot.slane %v6187_v15, 9  ;;  %v4673_v28 = vrot.slane %v6101_v18, 5  ;;  %v4672_v18 = vrot.slane %v4670_v3, 4  ;;  %v3942_v15 = vshll.u32 %v8853_v63, 16 }
  0xf6   : > { %6823 = vmatprep.mubr.bf16.mxu0 %v7118_v38  ;;  %6851 = vmatprep.subr.bf16.mxu1 %v7120_v36  ;;  %v3950_v38 = vshll.u32 %v6105_v51, 16  ;;  %v4677_v51 = vrot.slane %v8833_v61, 5  ;;  %v3960_v61 = vshrl.u32 %v8863_v43, 16 }
  0xf7   : > { %v8858_v24 = vpop.f32.mrf.mxu0  ;;  %6900 = vmatpush3.bf16.msra.mxu0 %v7121_v55  ;;  %v8868_v14 = vpop.f32.mrf.mxu1  ;;  %v3905_v55 = vor.u32 %v3904_v20, %v3901_v60  ;;  %v7128_v60 = vld [vmem:[%s10170_s1 + $0x1d8] sm:$0xff]   ;;  %v8886_v20 = vrot.slane %v3918_v49, 5  ;;  %v7133_v49 = vld [vmem:[%s10170_s1 + $0x210] sm:$0xff]  }
  0xf8   : > { %6772 = vmatmul.mubr.bf16.gmra.mxu1 %v6006_v40  ;;  %6901 = vmatprep.subr.bf16.mxu0 %v7125_v33  ;;  %10262 = vst [vmem:[#allocation9_spill] sm:$0xff] %v8868_v14  ;;  %v3929_v40 = vor.u32 %v3928_v47, %v3925_v11  ;;  %v3949_v47 = vrot.slane %v3947_v37, 4  ;;  %v3952_v11 = vrot.slane %v3950_v38, 5  ;;  %v8913_v37 = vld [vmem:[%s7359_s13 + $0x40] sm:$0xf]  ;;  %v4679_v50 = vrot.slane %v4677_v51, 4 }
  0xf9   : > { %6775 = vmatprep.mubr.bf16.mxu1 %v6007_v41  ;;  %6852 = vmatpush3.bf16.msra.mxu1 %v7120_v36  ;;  %v8879_v57 = vpop.f32.mrf.mxu0  ;;  %v8893_v41 = vsel %vm7701_vm5, %v6203_v48, %v4670_v3  ;;  %v6108_v36 = vld [vmem:[%s7359_s13 + $0x3c] sm:$0xf]  ;;  %v8897_v52 = vpop.f32.mrf.mxu1  ;;  %v8902_v0 = vrot.slane %v3905_v55, 4  ;;  %v8908_v3 = vsel %vm7701_vm5, %v4672_v18, %v4673_v28  ;;  %v8910_v48 = vrot.slane %v3942_v15, 5  ;;  %v7132_v55 = vld [vmem:[%s10170_s1 + $0x1d0] sm:$0xff]  }
  0xfa   : > { %6853 = vmatprep.subr.bf16.mxu1 %v7124_v42  ;;  %10263 = vst [vmem:[#allocation12_spill] sm:$0xff] %v8897_v52  ;;  %v8920_v22 = vrot.slane %v3929_v40, 4  ;;  %v4680_v28 = vrot.slane %v8853_v63, 5  ;;  %v3940_v18 = vrot.slane %v3939_v54, 4  ;;  %v8924_v15 = vld [vmem:[%s7359_s13 + $0x38] sm:$0x1]  ;;  %v3953_v1 = vor.u32 %v3952_v11, %v3949_v47 }
  0xfb   : > { %6902 = vmatpush3.bf16.msra.mxu0 %v7125_v33  ;;  %v8904_v33 = vrot.slane %v3915_v21, 4  ;;  %v8915_v38 = vpop.f32.mrf.mxu0  ;;  %v6204_v21 = vrot.slane %v6188_v6, 9  ;;  %v3974_v30 = vshll.u32 %v6108_v36, 16  ;;  %v8928_v52 = vrot.slane %v3960_v61, 4  ;;  %v6189_v40 = vld [vmem:[%s7359_s13 + $0x30] sm:$0xe]  ;;  %v8936_v54 = vpop.f32.mrf.mxu1 }
  0xfc   : > { %6903 = vmatprep.subr.bf16.mxu0 %v7129_v23  ;;  %v3980_v6 = vshll.u32 %v8913_v37, 16  ;;  %v3984_v63 = vshrl.u32 %v8913_v37, 16  ;;  %10265 = vst [vmem:[#allocation11_spill] sm:$0xff] %v8936_v54  ;;  %v10266_v11 = vcombine.low %v8649_v31, %v8640_v19  ;;  %v7123_v61 = vld [vmem:[%s7359_s13 + $0x6c] sm:$0xff]   ;;  %v8969_v19 = vsel %vm7701_vm5, %v4679_v50, %v4680_v28  ;;  %v8987_v28 = vld [vmem:[%s7359_s13 + $0x44] sm:$0x1] }
  0xfd   : > { %6824 = vmatmul.mubr.bf16.gmra.mxu0 %v7119_v7  ;;  %6854 = vmatpush3.bf16.msra.mxu1 %v7124_v42  ;;  %v8926_v7 = vrot.slane %v3956_v39, 5  ;;  %v3971_v42 = vshrl.u32 %v6108_v36, 16  ;;  %v3911_v39 = vsel %vm7390_vm2, %v8902_v0, %v8848_v2  ;;  %v3921_v47 = vsel %vm7390_vm2, %v8904_v33, %v8886_v20  ;;  %v7126_v36 = vld [vmem:[%s7359_s13 + $0x78] sm:$0xff]   ;;  %v8980_v33 = vld [vmem:[%s7359_s13 + $0x4c] sm:$0xf]  ;;  %v8991_v54 = vpop.f32.mrf.mxu1 }
  0xfe   : > { %6827 = vmatprep.mubr.bf16.mxu0 %v7122_v62  ;;  %6855 = vmatprep.subr.bf16.mxu1 %v7128_v60  ;;  %v10264_v62 = vcombine.low %v8618_v10, %v8622_v59  ;;  %v4684_v59 = vrot.slane %v8863_v43, 5  ;;  %v3935_v2 = vsel %vm7390_vm2, %v8920_v22, %v8860_v45  ;;  %v8965_v20 = vsel %vm7701_vm5, %v6204_v21, %v4677_v51  ;;  %v6111_v43 = vld [vmem:[%s7359_s13 + $0x48] sm:$0xf]  ;;  %v6190_v14 = vld [vmem:[%s7359_s13 + $0x3c] sm:$0xe] }
  0xff   : > { %6904 = vmatpush3.bf16.msra.mxu0 %v7129_v23  ;;  %v7137_v23 = vld [vmem:[%s10170_s1 + $0x208] sm:$0xff]   ;;  %v3966_v31 = vshll.u32 %v8924_v15, 16  ;;  %v3945_v22 = vsel %vm7390_vm2, %v3940_v18, %v8910_v48  ;;  %v6205_v45 = vrot.slane %v6189_v40, 9  ;;  %v3973_v0 = vrot.slane %v3971_v42, 4  ;;  %10268 = vst [vmem:[#allocation13_spill] sm:$0xff] %v8991_v54  ;;  %v7140_v42 = vld [vmem:[%s10170_s1 + $0x1c0] sm:$0xff]  }
 0x100   : > { %6776 = vmatmul.mubr.bf16.gmra.mxu1 %v10264_v62  ;;  %6905 = vmatprep.subr.bf16.mxu0 %v7133_v49  ;;  %v8957_v62 = vpop.f32.mrf.mxu0  ;;  %v3976_v51 = vrot.slane %v3974_v30, 5  ;;  %v8982_v50 = vrot.slane %v3953_v1, 4  ;;  %v3963_v21 = vor.u32 %v8928_v52, %v8926_v7  ;;  %v3986_v10 = vrot.slane %v3984_v63, 4  ;;  %v7141_v30 = vld [vmem:[%s10170_s1 + $0x200] sm:$0xff]  }
 0x101   : > { %6779 = vmatprep.mubr.bf16.mxu1 %v10266_v11  ;;  %6856 = vmatpush3.bf16.msra.mxu1 %v7128_v60  ;;  %10267 = vst [vmem:[#allocation10_spill] sm:$0xff] %v8957_v62  ;;  %v7136_v60 = vld [vmem:[%s10170_s1 + $0x1c8] sm:$0xff]   ;;  %v8989_v11 = vrot.slane %v3980_v6, 5  ;;  %v4686_v48 = vrot.slane %v4684_v59, 4  ;;  %v3995_v1 = vshrl.u32 %v6111_v43, 16  ;;  %v3998_v18 = vshll.u32 %v6111_v43, 16 }
 0x102   : > { %6857 = vmatprep.subr.bf16.mxu1 %v7132_v55  ;;  %v8997_v52 = vpop.f32.mrf.mxu0  ;;  %v9002_v40 = vcombine.low %v3911_v39, %v3921_v47  ;;  %v4008_v63 = vshrl.u32 %v8980_v33, 16  ;;  %v9010_v43 = vrot.slane %v3966_v31, 5  ;;  %v3990_v54 = vshll.u32 %v8987_v28, 16  ;;  %v6114_v39 = vld [vmem:[%s7359_s13 + $0x54] sm:$0xf]  ;;  %v7127_v6 = vld [vmem:[%s7359_s13 + $0x84] sm:$0xff]  }
 0x103   : > { %6906 = vmatpush3.bf16.msra.mxu0 %v7133_v49  ;;  %v4687_v49 = vrot.slane %v8924_v15, 5  ;;  %10269 = vst [vmem:[#allocation14_spill] sm:$0xff] %v8997_v52  ;;  %v4004_v15 = vshll.u32 %v8980_v33, 16  ;;  %v4691_v31 = vrot.slane %v8913_v37, 5  ;;  %v10272_v37 = vcombine.low %v8673_v12, %v8677_v46  ;;  %v7130_v47 = vld [vmem:[%s7359_s13 + $0x90] sm:$0xff]  }
 0x104   : > { %6907 = vmatprep.subr.bf16.mxu0 %v7137_v23 }
 0x105   : > { %6828 = vmatmul.mubr.bf16.gmra.mxu0 %v7123_v61  ;;  %6858 = vmatpush3.bf16.msra.mxu1 %v7132_v55  ;;  %v9008_v61 = vcombine.low %v3935_v2, %v3945_v22  ;;  %v3977_v55 = vor.u32 %v3976_v51, %v3973_v0  ;;  %v3987_v2 = vor.u32 %v3986_v10, %v8989_v11  ;;  %v9026_v22 = vld [vmem:[%s7359_s13 + $0x58] sm:$0xf]  ;;  %v9033_v51 = vrot.slane %v3963_v21, 4 }
 0x106   : > { %6831 = vmatprep.mubr.bf16.mxu0 %v7126_v36  ;;  %6859 = vmatprep.subr.bf16.mxu1 %v7136_v60  ;;  %v9021_v36 = vsel %vm7701_vm5, %v6205_v45, %v4684_v59  ;;  %v10270_v0 = vcombine.low %v8656_v16, %v8661_v53  ;;  %v9037_v59 = vsel %vm7701_vm5, %v4686_v48, %v4687_v49  ;;  %v3997_v45 = vrot.slane %v3995_v1, 4  ;;  %v9044_v16 = vpop.f32.mrf.mxu0  ;;  %v6113_v1 = vld [vmem:[%s7359_s13 + $0x50] sm:$0x1] }
 0x107   : > { %6908 = vmatpush3.bf16.msra.mxu0 %v7137_v23  ;;  %v9031_v23 = vpop.f32.mrf.mxu1  ;;  %v4000_v10 = vrot.slane %v3998_v18, 5  ;;  %10273 = vst [vmem:[#allocation16_spill] sm:$0xff] %v9044_v16  ;;  %v6206_v53 = vrot.slane %v6190_v14, 9  ;;  %v4010_v21 = vrot.slane %v4008_v63, 4  ;;  %v3978_v48 = vrot.slane %v3977_v55, 4 }
 0x108   : > { %6780 = vmatmul.mubr.bf16.gmra.mxu1 %v10270_v0  ;;  %10271 = vst [vmem:[#allocation15_spill] sm:$0xff] %v9031_v23  ;;  %6909 = vmatprep.subr.bf16.mxu0 %v7141_v30  ;;  %v9046_v0 = vrot.slane %v4004_v15, 5  ;;  %v4019_v23 = vshrl.u32 %v6114_v39, 16  ;;  %v3992_v49 = vrot.slane %v3990_v54, 5  ;;  %v4022_v18 = vshll.u32 %v6114_v39, 16  ;;  %v9062_v39 = vpop.f32.mrf.mxu0 }
 0x109   : > { %6783 = vmatprep.mubr.bf16.mxu1 %v10272_v37  ;;  %6860 = vmatpush3.bf16.msra.mxu1 %v7136_v60  ;;  %v4028_v52 = vshll.u32 %v9026_v22, 16  ;;  %v3988_v12 = vrot.slane %v3987_v2, 4  ;;  %v4693_v46 = vrot.slane %v4691_v31, 4  ;;  %v4694_v37 = vrot.slane %v8987_v28, 5  ;;  %v9052_v60 = vpop.f32.mrf.mxu1  ;;  %v6117_v55 = vld [vmem:[%s7359_s13 + $0x60] sm:$0xf] }
 0x10a   : > { %6861 = vmatprep.subr.bf16.mxu1 %v7140_v42  ;;  %v4032_v14 = vshrl.u32 %v9026_v22, 16  ;;  %10274 = vst [vmem:[#allocation17_spill] sm:$0xff] %v9052_v60  ;;  %v3969_v15 = vsel %vm7390_vm2, %v9033_v51, %v9010_v43  ;;  %v4001_v63 = vor.u32 %v4000_v10, %v3997_v45  ;;  %v4011_v28 = vor.u32 %v4010_v21, %v9046_v0  ;;  %v6191_v60 = vld [vmem:[%s7359_s13 + $0x48] sm:$0xe] }
 0x10b   : > { %6910 = vmatpush3.bf16.msra.mxu0 %v7141_v30  ;;  %v4698_v30 = vrot.slane %v8980_v33, 5  ;;  %v4014_v2 = vshll.u32 %v6113_v1, 16  ;;  %v4021_v16 = vrot.slane %v4019_v23, 4  ;;  %v4024_v62 = vrot.slane %v4022_v18, 5  ;;  %v9087_v10 = vpop.f32.mrf.mxu1 }
 0x10c   : > { %v3983_v43 = vsel %vm7390_vm2, %v3978_v48, %v8989_v11  ;;  %v9071_v33 = vsel %vm7701_vm5, %v6206_v53, %v4691_v31  ;;  %v3993_v51 = vsel %vm7390_vm2, %v3988_v12, %v3992_v49  ;;  %v9079_v23 = vsel %vm7701_vm5, %v4693_v46, %v4694_v37  ;;  %10276 = vst [vmem:[#allocation18_spill] sm:$0xff] %v9087_v10  ;;  %v9090_v49 = vld [vmem:[%s7359_s13 + $0x64] sm:$0xf]  ;;  %v7131_v12 = vld [vmem:[%s7359_s13 + $0x9c] sm:$0xff]   ;;  %v9096_v46 = vpop.f32.mrf.mxu0 }
 0x10d   : > { %6832 = vmatmul.mubr.bf16.gmra.mxu0 %v7127_v6  ;;  %6862 = vmatpush3.bf16.msra.mxu1 %v7140_v42  ;;  %v9073_v6 = vrot.slane %v4028_v52, 5  ;;  %v4034_v42 = vrot.slane %v4032_v14, 4  ;;  %v4043_v45 = vshrl.u32 %v6117_v55, 16  ;;  %v4046_v11 = vshll.u32 %v6117_v55, 16  ;;  %v7134_v55 = vld [vmem:[%s7359_s13 + $0xa8] sm:$0xff]  }
 0x10e   : > { %6835 = vmatprep.mubr.bf16.mxu0 %v7130_v47  ;;  %v9082_v47 = vld [vmem:[%s7359_s13 + $0x5c] sm:$0x1]  ;;  %v10275_v31 = vcombine.low %v8689_v34, %v8698_v17  ;;  %v4002_v52 = vrot.slane %v4001_v63, 4  ;;  %v6207_v53 = vrot.slane %v6191_v60, 9  ;;  %v4700_v21 = vrot.slane %v4698_v30, 4 }
 0x10f   : > { %v4701_v48 = vrot.slane %v6113_v1, 5  ;;  %v10277_v18 = vcombine.low %v8715_v32, %v8719_v58  ;;  %v4012_v37 = vrot.slane %v4011_v28, 4  ;;  %v4016_v14 = vrot.slane %v4014_v2, 5  ;;  %v6192_v63 = vld [vmem:[%s7359_s13 + $0x54] sm:$0xe]  ;;  %v9114_v28 = vpop.f32.mrf.mxu1 }
 0x110   : > { %6784 = vmatmul.mubr.bf16.gmra.mxu1 %v10275_v31  ;;  %v4025_v34 = vor.u32 %v4024_v62, %v4021_v16  ;;  %v4705_v17 = vrot.slane %v9026_v22, 5  ;;  %v4035_v60 = vor.u32 %v4034_v42, %v9073_v6  ;;  %v4038_v1 = vshll.u32 %v9082_v47, 16  ;;  %10279 = vst [vmem:[#allocation19_spill] sm:$0xff] %v9114_v28  ;;  %v6193_v62 = vld [vmem:[%s7359_s13 + $0x60] sm:$0xe] }
 0x111   : > { %6787 = vmatprep.mubr.bf16.mxu1 %v10277_v18  ;;  %v4045_v31 = vrot.slane %v4043_v45, 4  ;;  %v4048_v54 = vrot.slane %v4046_v11, 5  ;;  %v10278_v32 = vsel %vm7390_vm2, %v8982_v50, %v8926_v7  ;;  %v4052_v22 = vshll.u32 %v9090_v49, 16 }
 0x112   : > { %v9108_v58 = vcombine.low %v10278_v32, %v3969_v15  ;;  %v4056_v16 = vshrl.u32 %v9090_v49, 16  ;;  %v9116_v2 = vcombine.low %v3983_v43, %v3993_v51  ;;  %v4007_v42 = vsel %vm7390_vm2, %v4002_v52, %v9046_v0  ;;  %v6120_v15 = vld [vmem:[%s7359_s13 + $0x6c] sm:$0xf]  ;;  %v9134_v32 = vld [vmem:[%s7359_s13 + $0x70] sm:$0xf] }
 0x113   : > { %v9123_v7 = vsel %vm7701_vm5, %v6207_v53, %v4698_v30  ;;  %v9127_v50 = vsel %vm7701_vm5, %v4700_v21, %v4701_v48  ;;  %v9130_v45 = vpop.f32.mrf.mxu0  ;;  %v4026_v43 = vrot.slane %v4025_v34, 4  ;;  %v6208_v51 = vrot.slane %v6192_v63, 9  ;;  %v6119_v53 = vld [vmem:[%s7359_s13 + $0x68] sm:$0x1] }
 0x114   : > { %10280 = vst [vmem:[#allocation20_spill] sm:$0xff] %v9130_v45  ;;  %v4707_v11 = vrot.slane %v4705_v17, 4  ;;  %v4708_v18 = vrot.slane %v9082_v47, 5  ;;  %v4017_v0 = vsel %vm7390_vm2, %v4012_v37, %v4016_v14  ;;  %v4036_v30 = vrot.slane %v4035_v60, 4  ;;  %v6195_v45 = vld [vmem:[%s7359_s13 + $0x78] sm:$0xe] }
 0x115   : > { %6836 = vmatmul.mubr.bf16.gmra.mxu0 %v7131_v12  ;;  %v4040_v52 = vrot.slane %v4038_v1, 5  ;;  %v4049_v21 = vor.u32 %v4048_v54, %v4045_v31  ;;  %v9139_v48 = vrot.slane %v4052_v22, 5  ;;  %v4058_v12 = vrot.slane %v4056_v16, 4  ;;  %v7135_v31 = vld [vmem:[%s7359_s13 + $0xb4] sm:$0xff]  }
 0x116   : > { %6839 = vmatprep.mubr.bf16.mxu0 %v7134_v55  ;;  %v4067_v34 = vshrl.u32 %v6120_v15, 16  ;;  %v4070_v63 = vshll.u32 %v6120_v15, 16  ;;  %v10281_v47 = vcombine.low %v8735_v5, %v8740_v25  ;;  %v4712_v14 = vrot.slane %v9090_v49, 5  ;;  %v9156_v5 = vpop.f32.mrf.mxu0 }
 0x117   : > { %v4076_v54 = vshll.u32 %v9134_v32, 16  ;;  %v4080_v60 = vshrl.u32 %v9134_v32, 16  ;;  %v10283_v1 = vcombine.low %v8753_v9, %v8747_v29  ;;  %10284 = vst [vmem:[#allocation22_spill] sm:$0xff] %v9156_v5  ;;  %v9158_v25 = vcombine.low %v4007_v42, %v4017_v0  ;;  %v6123_v29 = vld [vmem:[%s7359_s13 + $0x78] sm:$0xf]  ;;  %v7138_v9 = vld [vmem:[%s7359_s13 + $0xc0] sm:$0xff]  }
 0x118   : > { %6788 = vmatmul.mubr.bf16.gmra.mxu1 %v10281_v47  ;;  %v9145_v55 = vpop.f32.mrf.mxu1  ;;  %v4031_v22 = vsel %vm7390_vm2, %v4026_v43, %v9073_v6  ;;  %v9165_v49 = vsel %vm7701_vm5, %v6208_v51, %v4705_v17  ;;  %v9169_v16 = vsel %vm7701_vm5, %v4707_v11, %v4708_v18  ;;  %v4041_v15 = vsel %vm7390_vm2, %v4036_v30, %v4040_v52  ;;  %v9182_v43 = vld [vmem:[%s7359_s13 + $0x74] sm:$0x1]  ;;  %v9239_v5 = vld [vmem:[%s7359_s13 + $0x8c] sm:$0x1] }
 0x119   : > { %10282 = vst [vmem:[#allocation21_spill] sm:$0xff] %v9145_v55  ;;  %6791 = vmatprep.mubr.bf16.mxu1 %v10283_v1  ;;  %v9175_v47 = vrot.slane %v4049_v21, 4  ;;  %v4062_v42 = vshll.u32 %v6119_v53, 16  ;;  %v6209_v0 = vrot.slane %v6193_v62, 9  ;;  %v9178_v1 = vld [vmem:[%s7359_s13 + $0x7c] sm:$0xf]  ;;  %v4059_v6 = vor.u32 %v4058_v12, %v9139_v48  ;;  %v9188_v21 = vpop.f32.mrf.mxu0 }
 0x11a   : > { %v4715_v17 = vrot.slane %v6119_v53, 5  ;;  %v4069_v51 = vrot.slane %v4067_v34, 4  ;;  %v4072_v11 = vrot.slane %v4070_v63, 5  ;;  %v9184_v18 = vpop.f32.mrf.mxu1  ;;  %v4714_v37 = vrot.slane %v4712_v14, 4  ;;  %10286 = vst [vmem:[#allocation24_spill] sm:$0xff] %v9188_v21 }
 0x11b   : > { %10285 = vst [vmem:[#allocation23_spill] sm:$0xff] %v9184_v18  ;;  %v9186_v55 = vrot.slane %v4076_v54, 5  ;;  %v4082_v30 = vrot.slane %v4080_v60, 4  ;;  %v4091_v52 = vshrl.u32 %v6123_v29, 16  ;;  %v6194_v53 = vld [vmem:[%s7359_s13 + $0x6c] sm:$0xe]  ;;  %v9195_v18 = vcombine.low %v4031_v22, %v4041_v15 }
 0x11c   : > { %v4094_v12 = vshll.u32 %v6123_v29, 16  ;;  %v4100_v34 = vshll.u32 %v9178_v1, 16  ;;  %v4104_v63 = vshrl.u32 %v9178_v1, 16  ;;  %v9197_v54 = vrot.slane %v4062_v42, 5  ;;  %v6126_v62 = vld [vmem:[%s7359_s13 + $0x84] sm:$0xf]  ;;  %v9218_v42 = vpop.f32.mrf.mxu1 }
 0x11d   : > { %6840 = vmatmul.mubr.bf16.gmra.mxu0 %v7135_v31  ;;  %10287 = vst [vmem:[#allocation25_spill] sm:$0xff] %v9195_v18  ;;  %v9201_v60 = vsel %vm7701_vm5, %v6209_v0, %v4712_v14  ;;  %v4086_v31 = vshll.u32 %v9182_v43, 16  ;;  %v9209_v28 = vrot.slane %v4059_v6, 4  ;;  %v4719_v22 = vrot.slane %v9134_v32, 5  ;;  %v9213_v15 = vld [vmem:[%s7359_s13 + $0x88] sm:$0xf] }
 0x11e   : > { %6843 = vmatprep.mubr.bf16.mxu0 %v7138_v9  ;;  %v4073_v9 = vor.u32 %v4072_v11, %v4069_v51  ;;  %v10288_v14 = vcombine.low %v8762_v4, %v8766_v13  ;;  %10289 = vst [vmem:[#allocation26_spill] sm:$0xff] %v9218_v42  ;;  %v7139_v0 = vld [vmem:[%s7359_s13 + $0xcc] sm:$0xff]   ;;  %v9223_v10 = vsel %vm7701_vm5, %v4714_v37, %v4715_v17  ;;  %v6210_v6 = vrot.slane %v6194_v53, 9  ;;  %v9226_v11 = vpop.f32.mrf.mxu0  ;;  %v9232_v4 = vld [vmem:[%s7359_s13 + $0x80] sm:$0x1] }
 0x11f   : > { %v4083_v29 = vor.u32 %v4082_v30, %v9186_v55  ;;  %v4093_v51 = vrot.slane %v4091_v52, 4  ;;  %10290 = vst [vmem:[#allocation27_spill] sm:$0xff] %v9226_v11  ;;  %v10291_v32 = vcombine.low %v8797_v26, %v8801_v35  ;;  %v4096_v13 = vrot.slane %v4094_v12, 5 }
 0x120   : > { %6792 = vmatmul.mubr.bf16.gmra.mxu1 %v10288_v14  ;;  %v9234_v14 = vrot.slane %v4100_v34, 5  ;;  %v4106_v42 = vrot.slane %v4104_v63, 4  ;;  %v4115_v21 = vshrl.u32 %v6126_v62, 16  ;;  %v4088_v37 = vrot.slane %v4086_v31, 5 }
 0x121   : > { %6795 = vmatprep.mubr.bf16.mxu1 %v10291_v32  ;;  %v4722_v17 = vrot.slane %v9182_v43, 5  ;;  %v4118_v30 = vshll.u32 %v6126_v62, 16  ;;  %v4124_v52 = vshll.u32 %v9213_v15, 16  ;;  %v4074_v53 = vrot.slane %v4073_v9, 4  ;;  %v9242_v32 = vpop.f32.mrf.mxu1 }
 0x122   : > { %v4721_v11 = vrot.slane %v4719_v22, 4  ;;  %v4117_v26 = vrot.slane %v4115_v21, 4  ;;  %v4128_v35 = vshrl.u32 %v9213_v15, 16  ;;  %v4084_v12 = vrot.slane %v4083_v29, 4 }
 0x123   : > { %v4110_v34 = vshll.u32 %v9232_v4, 16  ;;  %v4120_v63 = vrot.slane %v4118_v30, 5  ;;  %v9245_v31 = vrot.slane %v4124_v52, 5  ;;  %v4097_v62 = vor.u32 %v4096_v13, %v4093_v51  ;;  %v6196_v52 = vld [vmem:[%s7359_s13 + $0x84] sm:$0xe] }
 0x124   : > { %v9247_v43 = vpop.f32.mrf.mxu0  ;;  %v4107_v9 = vor.u32 %v4106_v42, %v9234_v14  ;;  %v4726_v21 = vrot.slane %v9178_v1, 5  ;;  %v4130_v18 = vrot.slane %v4128_v35, 4  ;;  %v10292_v29 = vcombine.low %v8893_v41, %v8908_v3 }
 0x125   : > { %6844 = vmatmul.mubr.bf16.gmra.mxu0 %v7139_v0  ;;  %v4065_v30 = vsel %vm7390_vm2, %v9209_v28, %v9197_v54  ;;  %v9263_v51 = vsel %vm7701_vm5, %v6210_v6, %v4719_v22  ;;  %v4134_v42 = vshll.u32 %v9239_v5, 16  ;;  %v4079_v41 = vsel %vm7390_vm2, %v4074_v53, %v9186_v55  ;;  %v6129_v54 = vld [vmem:[%s7359_s13 + $0x90] sm:$0xf] }
 0x126   : > { %6911 = vmatprep.mubr.bf16.mxu0 %v10292_v29  ;;  %v9266_v1 = vpop.f32.mrf.mxu0  ;;  %v4121_v3 = vor.u32 %v4120_v63, %v4117_v26  ;;  %v4131_v13 = vor.u32 %v4130_v18, %v9245_v31  ;;  %v4733_v28 = vrot.slane %v9213_v15, 5  ;;  %v10294_v22 = vcombine.low %v8810_v44, %v8815_v8 }
 0x127   : > { %v4089_v6 = vsel %vm7390_vm2, %v4084_v12, %v4088_v37  ;;  %v9284_v55 = vsel %vm7701_vm5, %v4721_v11, %v4722_v17  ;;  %v4112_v53 = vrot.slane %v4110_v34, 5  ;;  %v6211_v18 = vrot.slane %v6195_v45, 9  ;;  %v9293_v12 = vld [vmem:[%s7359_s13 + $0x94] sm:$0xf] }
 0x128   : > { %v9275_v35 = vpop.f32.mrf.mxu1  ;;  %6796 = vmatmul.mubr.bf16.gmra.mxu1 %v10294_v22  ;;  %v9286_v26 = vpop.f32.mrf.mxu0  ;;  %v4098_v15 = vrot.slane %v4097_v62, 4  ;;  %v4108_v63 = vrot.slane %v4107_v9, 4  ;;  %v4728_v29 = vrot.slane %v4726_v21, 4  ;;  %v4729_v0 = vrot.slane %v9232_v4, 5 }
 0x129   : > { %10293 = vst [vmem:[#allocation28_spill] sm:$0xff] %v9275_v35  ;;  %6863 = vmatprep.mubr.bf16.mxu1 %v9002_v40  ;;  %v4136_v8 = vrot.slane %v4134_v42, 5  ;;  %v6212_v37 = vrot.slane %v6196_v52, 9  ;;  %v4139_v11 = vshrl.u32 %v6129_v54, 16  ;;  %v4142_v17 = vshll.u32 %v6129_v54, 16 }
 0x12a   : > { %v9290_v44 = vpop.f32.mrf.mxu1  ;;  %v9295_v34 = vpop.f32.mrf.mxu0  ;;  %v4122_v45 = vrot.slane %v4121_v3, 4  ;;  %v4132_v22 = vrot.slane %v4131_v13, 4  ;;  %v4735_v40 = vrot.slane %v4733_v28, 4  ;;  %v4736_v62 = vrot.slane %v9239_v5, 5  ;;  %v9316_v54 = vld [vmem:[%s7359_s13 + $0x98] sm:$0x1] }
 0x12b   : > { %10295 = vst [vmem:[#allocation29_spill] sm:$0xff] %v9290_v44  ;;  %v10297_v4 = vsel %vm7390_vm2, %v9175_v47, %v9139_v48  ;;  %v9307_v52 = vcombine.low %v4079_v41, %v4089_v6  ;;  %v9313_v13 = vsel %vm7701_vm5, %v6211_v18, %v4726_v21  ;;  %v4103_v48 = vsel %vm7390_vm2, %v4098_v15, %v9234_v14  ;;  %v6132_v41 = vld [vmem:[%s7359_s13 + $0x9c] sm:$0xf]  ;;  %v9333_v6 = vld [vmem:[%s7359_s13 + $0xa0] sm:$0xf] }
 0x12c   : > { %v9298_v9 = vpop.f32.mrf.mxu1  ;;  %v9305_v42 = vcombine.low %v10297_v4, %v4065_v30  ;;  %v6625_v5 = vpop.f32.mrf.mxu0  ;;  %v4113_v47 = vsel %vm7390_vm2, %v4108_v63, %v4112_v53  ;;  %v9328_v30 = vsel %vm7701_vm5, %v4728_v29, %v4729_v0  ;;  %v4148_v21 = vshll.u32 %v9293_v12, 16  ;;  %v9420_v35 = vld [vmem:[%s7359_s13 + $0xb0] sm:$0x1] }
 0x12d   : > { %10296 = vst [vmem:[#allocation30_spill] sm:$0xff] %v9298_v9  ;;  %v10298_v9 = vcombine.low %v8965_v20, %v8969_v19  ;;  %v10300_v20 = vcombine.low %v9021_v36, %v9037_v59  ;;  %v9342_v19 = vsel %vm7701_vm5, %v6212_v37, %v4733_v28  ;;  %v4141_v14 = vrot.slane %v4139_v11, 4  ;;  %v9357_v37 = vld [vmem:[%s7359_s13 + $0x90] sm:$0xe] }
 0x12e   : > { %v9335_v18 = vpop.f32.mrf.mxu1  ;;  %v4144_v53 = vrot.slane %v4142_v17, 5  ;;  %v4152_v0 = vshrl.u32 %v9293_v12, 16  ;;  %v1665_v15 = vpop.f32.mrf.mxu0  ;;  %v4127_v63 = vsel %vm7390_vm2, %v4122_v45, %v9245_v31  ;;  %v4137_v29 = vsel %vm7390_vm2, %v4132_v22, %v4136_v8 }
 0x12f   : > { %6912 = vmatmul.mubr.bf16.vlgmr.msra.gmra.mxu0 %v10298_v9  ;;  %10299 = vst [vmem:[#allocation31_spill] sm:$0xff] %v9335_v18  ;;  %v9352_v36 = vsel %vm7701_vm5, %v4735_v40, %v4736_v62  ;;  %v4158_v59 = vshll.u32 %v9316_v54, 16  ;;  %v4163_v11 = vshrl.u32 %v6132_v41, 16  ;;  %v4166_v17 = vshll.u32 %v6132_v41, 16 }
 0x130   : > { %6915 = vmatprep.mubr.bf16.mxu0 %v10300_v20  ;;  %v6577_v28 = vpop.f32.mrf.mxu1  ;;  %6864 = vmatmul.mubr.bf16.vlgmr.msra.gmra.mxu1 %v9008_v61  ;;  %v4172_v9 = vshll.u32 %v9333_v6, 16  ;;  %v4176_v31 = vshrl.u32 %v9333_v6, 16  ;;  %v6626_v45 = vpop.f32.mrf.mxu0  ;;  %v9363_v22 = vcombine.low %v4103_v48, %v4113_v47  ;;  %v9367_v40 = vrot.slane %v4148_v21, 5  ;;  %v9381_v61 = vld [vmem:[%s7359_s13 + $0xa4] sm:$0x1] }
 0x131   : > { %v1221_v8 = vadd.f32 %v6577_v28, %v8858_v24  ;;  %6867 = vmatprep.mubr.bf16.mxu1 %v9108_v58  ;;  %v9369_v4 = vcombine.low %v4127_v63, %v4137_v29  ;;  %v4145_v20 = vor.u32 %v4144_v53, %v4141_v14  ;;  %v4154_v24 = vrot.slane %v4152_v0, 4  ;;  %v6135_v28 = vld [vmem:[%s7359_s13 + $0xa8] sm:$0xf]  ;;  %v9386_v14 = vld [vmem:[%s7359_s13 + $0xac] sm:$0xf] }
 0x132   : > { %v1212_v62 = vpop.f32.mrf.mxu1  ;;  %v1668_v48 = vpop.f32.mrf.mxu0  ;;  %v9377_v47 = vrot.slane %v4158_v59, 5  ;;  %v6213_v21 = vrot.slane %v9357_v37, 9  ;;  %v4165_v29 = vrot.slane %v4163_v11, 4  ;;  %v4168_v18 = vrot.slane %v4166_v17, 5 }
 0x133   : > { %v9374_v3 = vadd.f32 %v6625_v5, %v1221_v8  ;;  %v1213_v58 = vadd.f32 %v1212_v62, %v8879_v57  ;;  %v9383_v44 = vrot.slane %v4172_v9, 5  ;;  %v4178_v41 = vrot.slane %v4176_v31, 4  ;;  %v10306_v62 = vld [vmem:[#allocation10_spill] sm:$0xff] }
 0x134   : > { %v6578_v63 = vpop.f32.mrf.mxu1  ;;  %v6629_v5 = vpop.f32.mrf.mxu0  ;;  %v10303_v0 = vcombine.low %v9071_v33, %v9079_v23  ;;  %v4187_v59 = vshrl.u32 %v6135_v28, 16  ;;  %v4190_v37 = vshll.u32 %v6135_v28, 16  ;;  %v10304_v11 = vcombine.low %v9123_v7, %v9127_v50 }
 0x135   : > { %10301 = vst [vmem:[#allocation32_spill] sm:$0xff] %v9374_v3  ;;  %v9388_v53 = vadd.f32 %v1665_v15, %v1213_v58  ;;  %v1224_v57 = vadd.f32 %v6578_v63, %v8915_v38  ;;  %v9397_v17 = vrot.slane %v4145_v20, 4  ;;  %v4155_v15 = vor.u32 %v4154_v24, %v9367_v40  ;;  %v6198_v58 = vld [vmem:[%s7359_s13 + $0x9c] sm:$0xe] }
 0x136   : > { %v1215_v8 = vpop.f32.mrf.mxu1  ;;  %v4740_v9 = vrot.slane %v9293_v12, 5  ;;  %v4182_v38 = vshll.u32 %v9381_v61, 16  ;;  %v1681_v23 = vpop.f32.mrf.mxu0  ;;  %v4743_v28 = vrot.slane %v9316_v54, 5  ;;  %v4196_v63 = vshll.u32 %v9386_v14, 16 }
 0x137   : > { %10302 = vst [vmem:[#allocation33_spill] sm:$0xff] %v9388_v53  ;;  %6916 = vmatmul.mubr.bf16.gmra.mxu0 %v10303_v0  ;;  %v9402_v31 = vadd.f32 %v6626_v45, %v1224_v57  ;;  %v1216_v33 = vadd.f32 %v1215_v8, %v10306_v62  ;;  %v4169_v50 = vor.u32 %v4168_v18, %v4165_v29  ;;  %v4747_v12 = vrot.slane %v9333_v6, 5  ;;  %v10307_v57 = vld [vmem:[#allocation14_spill] sm:$0xff]  ;;  %v10308_v6 = vld [vmem:[#allocation16_spill] sm:$0xff] }
 0x138   : > { %6919 = vmatprep.mubr.bf16.mxu0 %v10304_v11  ;;  %v6581_v7 = vpop.f32.mrf.mxu1  ;;  %6868 = vmatmul.mubr.bf16.gmra.mxu1 %v9116_v2  ;;  %v4179_v20 = vor.u32 %v4178_v41, %v9383_v44  ;;  %v4200_v45 = vshrl.u32 %v9386_v14, 16  ;;  %v6630_v8 = vpop.f32.mrf.mxu0  ;;  %v4189_v54 = vrot.slane %v4187_v59, 4  ;;  %v4192_v11 = vrot.slane %v4190_v37, 5 }
 0x139   : > { %10305 = vst [vmem:[#allocation34_spill] sm:$0xff] %v9402_v31  ;;  %v9412_v24 = vadd.f32 %v1668_v48, %v1216_v33  ;;  %v1237_v0 = vadd.f32 %v6581_v7, %v10307_v57  ;;  %6871 = vmatprep.mubr.bf16.mxu1 %v9158_v25  ;;  %v4156_v31 = vrot.slane %v4155_v15, 4  ;;  %v4742_v2 = vrot.slane %v4740_v9, 4 }
 0x13a   : > { %v1228_v62 = vpop.f32.mrf.mxu1  ;;  %v4184_v18 = vrot.slane %v4182_v38, 5  ;;  %v6214_v29 = vrot.slane %v6198_v58, 9  ;;  %v1684_v3 = vpop.f32.mrf.mxu0  ;;  %v9422_v48 = vrot.slane %v4196_v63, 5  ;;  %v4202_v33 = vrot.slane %v4200_v45, 4 }
 0x13b   : > { %v9416_v41 = vadd.f32 %v6629_v5, %v1237_v0  ;;  %v1229_v53 = vadd.f32 %v1228_v62, %v10308_v6  ;;  %v4170_v57 = vrot.slane %v4169_v50, 4  ;;  %v4180_v25 = vrot.slane %v4179_v20, 4 }
 0x13c   : > { %v6582_v7 = vpop.f32.mrf.mxu1  ;;  %v4749_v59 = vrot.slane %v4747_v12, 4  ;;  %v4750_v37 = vrot.slane %v9381_v61, 5  ;;  %v6633_v38 = vpop.f32.mrf.mxu0  ;;  %v10309_v58 = vcombine.low %v9165_v49, %v9169_v16  ;;  %v9433_v63 = vsel %vm7701_vm5, %v6213_v21, %v4740_v9  ;;  %v6199_v21 = vld [vmem:[%s7359_s13 + $0xa8] sm:$0xe] }
 0x13d   : > { %v9425_v15 = vadd.f32 %v1681_v23, %v1229_v53  ;;  %v1240_v5 = vadd.f32 %v6582_v7, %v9062_v39  ;;  %v4193_v50 = vor.u32 %v4192_v11, %v4189_v54  ;;  %v10310_v20 = vcombine.low %v9201_v60, %v9223_v10 }
 0x13e   : > { %v1231_v45 = vpop.f32.mrf.mxu1  ;;  %v4151_v39 = vsel %vm7390_vm2, %v9397_v17, %v9367_v40  ;;  %v4161_v49 = vsel %vm7390_vm2, %v4156_v31, %v9377_v47  ;;  %v9447_v16 = vsel %vm7701_vm5, %v4742_v2, %v4743_v28  ;;  %v4206_v61 = vshll.u32 %v9420_v35, 16  ;;  %v1697_v60 = vpop.f32.mrf.mxu0  ;;  %v6138_v17 = vld [vmem:[%s7359_s13 + $0xb4] sm:$0xf]  ;;  %v10311_v47 = vld [vmem:[#allocation25_spill] sm:$0xff]  ;;  %v9476_v2 = vld [vmem:[%s7359_s13 + $0xb8] sm:$0xf] }
 0x13f   : > { %6920 = vmatmul.mubr.bf16.gmra.mxu0 %v10309_v58  ;;  %v9451_v53 = vadd.f32 %v6630_v8, %v1240_v5  ;;  %v1232_v10 = vadd.f32 %v1231_v45, %v9096_v46  ;;  %v4203_v9 = vor.u32 %v4202_v33, %v9422_v48  ;;  %v4754_v40 = vrot.slane %v9386_v14, 5  ;;  %v10312_v8 = vld [vmem:[#allocation20_spill] sm:$0xff] }
 0x140   : > { %6923 = vmatprep.mubr.bf16.mxu0 %v10310_v20  ;;  %v6585_v23 = vpop.f32.mrf.mxu1  ;;  %6872 = vmatmul.mubr.bf16.gmra.mxu1 %v10311_v47  ;;  %v4175_v31 = vsel %vm7390_vm2, %v4170_v57, %v9383_v44  ;;  %v4185_v28 = vsel %vm7390_vm2, %v4180_v25, %v4184_v18  ;;  %v9465_v46 = vsel %vm7701_vm5, %v6214_v29, %v4747_v12  ;;  %v6634_v11 = vpop.f32.mrf.mxu0  ;;  %v4194_v62 = vrot.slane %v4193_v50, 4  ;;  %v10313_v57 = vld [vmem:[#allocation22_spill] sm:$0xff]  ;;  %v10317_v47 = vld [vmem:[#allocation27_spill] sm:$0xff] }
 0x141   : > { %v9469_v0 = vsel %vm7701_vm5, %v4749_v59, %v4750_v37  ;;  %v9471_v14 = vadd.f32 %v1684_v3, %v1232_v10  ;;  %v1253_v54 = vadd.f32 %v6585_v23, %v10312_v8  ;;  %6875 = vmatprep.mubr.bf16.mxu1 %v9305_v42  ;;  %v6215_v44 = vrot.slane %v6199_v21, 9 }
 0x142   : > { %v1244_v18 = vpop.f32.mrf.mxu1  ;;  %v4208_v6 = vrot.slane %v4206_v61, 5  ;;  %v4757_v12 = vrot.slane %v9420_v35, 5  ;;  %v4211_v29 = vshrl.u32 %v6138_v17, 16  ;;  %v4214_v33 = vshll.u32 %v6138_v17, 16  ;;  %v1700_v25 = vpop.f32.mrf.mxu0 }
 0x143   : > { %v9479_v7 = vadd.f32 %v6633_v38, %v1253_v54  ;;  %v1245_v3 = vadd.f32 %v1244_v18, %v10313_v57  ;;  %v4204_v59 = vrot.slane %v4203_v9, 4  ;;  %v4756_v37 = vrot.slane %v4754_v40, 4  ;;  %v10314_v38 = vld [vmem:[#allocation24_spill] sm:$0xff] }
 0x144   : > { %v6586_v42 = vpop.f32.mrf.mxu1  ;;  %v9482_v5 = vcombine.low %v4151_v39, %v4161_v49  ;;  %v6245_v58 = vcombine.low %v9433_v63, %v9447_v16  ;;  %v9486_v50 = vcombine.low %v4175_v31, %v4185_v28  ;;  %v4220_v35 = vshll.u32 %v9476_v2, 16  ;;  %v6637_v61 = vpop.f32.mrf.mxu0  ;;  %v6141_v49 = vld [vmem:[%s7359_s13 + $0xc0] sm:$0xf]  ;;  %v9500_v16 = vld [vmem:[%s7359_s13 + $0xc4] sm:$0xf] }
 0x145   : > { %v9489_v45 = vadd.f32 %v1697_v60, %v1245_v3  ;;  %v1256_v20 = vadd.f32 %v6586_v42, %v10314_v38  ;;  %v10315_v21 = vcombine.low %v9263_v51, %v9284_v55  ;;  %v6246_v39 = vcombine.low %v9465_v46, %v9469_v0  ;;  %v10322_v46 = vld [vmem:[#allocation13_spill] sm:$0xff] }
 0x146   : > { %v4224_v63 = vshrl.u32 %v9476_v2, 16  ;;  %v1247_v10 = vpop.f32.mrf.mxu1  ;;  %v10316_v60 = vcombine.low %v9313_v13, %v9328_v30  ;;  %v4199_v51 = vsel %vm7390_vm2, %v4194_v62, %v9422_v48  ;;  %v9510_v55 = vsel %vm7701_vm5, %v6215_v44, %v4754_v40  ;;  %v1713_v28 = vpop.f32.mrf.mxu0  ;;  %v9522_v30 = vld [vmem:[%s7359_s13 + $0xbc] sm:$0x1]  ;;  %v6200_v48 = vld [vmem:[%s7359_s13 + $0xb4] sm:$0xe] }
 0x147   : > { %6924 = vmatmul.mubr.bf16.gmra.mxu0 %v10315_v21  ;;  %v4213_v9 = vrot.slane %v4211_v29, 4  ;;  %v4216_v17 = vrot.slane %v4214_v33, 5  ;;  %v9512_v23 = vadd.f32 %v6634_v11, %v1256_v20  ;;  %v1248_v31 = vadd.f32 %v1247_v10, %v10317_v47  ;;  %v9544_v20 = vld [vmem:[%s7359_s13 + $0xc8] sm:$0x1] }
 0x148   : > { %6927 = vmatprep.mubr.bf16.mxu0 %v10316_v60  ;;  %v4209_v8 = vsel %vm7390_vm2, %v4204_v59, %v4208_v6  ;;  %v9519_v13 = vsel %vm7701_vm5, %v4756_v37, %v4757_v12  ;;  %v6589_v54 = vpop.f32.mrf.mxu1  ;;  %6876 = vmatmul.mubr.bf16.gmra.mxu1 %v9307_v52  ;;  %v9526_v40 = vrot.slane %v4220_v35, 5  ;;  %v4235_v11 = vshrl.u32 %v6141_v49, 16  ;;  %v6638_v29 = vpop.f32.mrf.mxu0 }
 0x149   : > { %v4238_v62 = vshll.u32 %v6141_v49, 16  ;;  %v4244_v44 = vshll.u32 %v9500_v16, 16  ;;  %v9529_v18 = vadd.f32 %v1700_v25, %v1248_v31  ;;  %v1269_v6 = vadd.f32 %v6589_v54, %v9247_v43  ;;  %6879 = vmatprep.mubr.bf16.mxu1 %v9363_v22 }
 0x14a   : > { %v4226_v12 = vrot.slane %v4224_v63, 4  ;;  %v4248_v33 = vshrl.u32 %v9500_v16, 16  ;;  %v1260_v57 = vpop.f32.mrf.mxu1  ;;  %v4217_v3 = vor.u32 %v4216_v17, %v4213_v9  ;;  %v4230_v52 = vshll.u32 %v9522_v30, 16  ;;  %v1716_v43 = vpop.f32.mrf.mxu0  ;;  %v6144_v9 = vld [vmem:[%s7359_s13 + $0xcc] sm:$0xf] }
 0x14b   : > { %v6216_v59 = vrot.slane %v6200_v48, 9  ;;  %v4761_v37 = vrot.slane %v9476_v2, 5  ;;  %v9536_v42 = vadd.f32 %v6637_v61, %v1269_v6  ;;  %v1261_v25 = vadd.f32 %v1260_v57, %v9266_v1  ;;  %v6201_v48 = vld [vmem:[%s7359_s13 + $0xc0] sm:$0xe] }
 0x14c   : > { %v9539_v35 = vcombine.low %v4199_v51, %v4209_v8  ;;  %v6247_v22 = vcombine.low %v9510_v55, %v9519_v13  ;;  %v6590_v38 = vpop.f32.mrf.mxu1  ;;  %v4237_v21 = vrot.slane %v4235_v11, 4  ;;  %v4240_v63 = vrot.slane %v4238_v62, 5  ;;  %v6641_v10 = vpop.f32.mrf.mxu0  ;;  %v9566_v8 = vld [vmem:[%s7359_s13 + $0xd0] sm:$0xf] }
 0x14d   : > { %v9546_v49 = vrot.slane %v4244_v44, 5  ;;  %v4250_v2 = vrot.slane %v4248_v33, 4  ;;  %v9548_v61 = vadd.f32 %v1713_v28, %v1261_v25  ;;  %v1272_v1 = vadd.f32 %v6590_v38, %v9286_v26 }
 0x14e   : > { %v10318_v60 = vcombine.low %v9342_v19, %v9352_v36  ;;  %v4227_v51 = vor.u32 %v4226_v12, %v9526_v40  ;;  %v4764_v55 = vrot.slane %v9522_v30, 5  ;;  %v1263_v17 = vpop.f32.mrf.mxu1  ;;  %v9557_v47 = vrot.slane %v4217_v3, 4  ;;  %v1729_v13 = vpop.f32.mrf.mxu0 }
 0x14f   : > { %v9559_v31 = vrot.slane %v4230_v52, 5  ;;  %v9563_v26 = vsel %vm7701_vm5, %v6216_v59, %v4761_v37  ;;  %v4763_v28 = vrot.slane %v4761_v37, 4  ;;  %v9568_v19 = vadd.f32 %v6638_v29, %v1272_v1  ;;  %v10319_v29 = vld [vmem:[#allocation9_spill] sm:$0xff] }
 0x150   : > { %6928 = vmatmul.mubr.bf16.gmra.mxu0 %v10318_v60  ;;  %v1264_v36 = vadd.f32 %v1263_v17, %v9295_v34  ;;  %v4254_v30 = vshll.u32 %v9544_v20, 16  ;;  %v6593_v54 = vpop.f32.mrf.mxu1  ;;  %6880 = vmatmul.mubr.bf16.gmra.mxu1 %v9369_v4  ;;  %v4241_v11 = vor.u32 %v4240_v63, %v4237_v21  ;;  %v4251_v62 = vor.u32 %v4250_v2, %v9546_v49  ;;  %v6642_v57 = vpop.f32.mrf.mxu0 }
 0x151   : > { %6931 = vmatprep.mubr.bf16.mxu0 %v6245_v58  ;;  %v4768_v58 = vrot.slane %v9500_v16, 5  ;;  %v4259_v44 = vshrl.u32 %v6144_v9, 16  ;;  %v4262_v6 = vshll.u32 %v6144_v9, 16  ;;  %v1285_v33 = vadd.f32 %v6593_v54, %v10319_v29  ;;  %6883 = vmatprep.mubr.bf16.mxu1 %v9482_v5 }
 0x152   : > { %v9576_v12 = vadd.f32 %v1716_v43, %v1264_v36  ;;  %v4268_v34 = vshll.u32 %v9566_v8, 16  ;;  %v4272_v3 = vshrl.u32 %v9566_v8, 16  ;;  %v1276_v16 = vpop.f32.mrf.mxu1  ;;  %v4228_v52 = vrot.slane %v4227_v51, 4  ;;  %v10320_v43 = vld [vmem:[#allocation12_spill] sm:$0xff]  ;;  %v1732_v21 = vpop.f32.mrf.mxu0  ;;  %v10321_v36 = vld [vmem:[#allocation11_spill] sm:$0xff] }
 0x153   : > { %v4765_v4 = vsel %vm7701_vm5, %v4763_v28, %v4764_v55  ;;  %v6217_v59 = vrot.slane %v6201_v48, 9  ;;  %v4771_v37 = vrot.slane %v9544_v20, 5  ;;  %v9585_v25 = vadd.f32 %v6641_v10, %v1285_v33  ;;  %v6146_v20 = vld [vmem:[%s7359_s13 + $0xd4] sm:$0x1] }
 0x154   : > { %v1277_v38 = vadd.f32 %v1276_v16, %v10320_v43  ;;  %v4256_v63 = vrot.slane %v4254_v30, 5  ;;  %v4770_v5 = vrot.slane %v4768_v58, 4  ;;  %v6594_v2 = vpop.f32.mrf.mxu1  ;;  %v4242_v1 = vrot.slane %v4241_v11, 4 }
 0x155   : > { %v4252_v60 = vrot.slane %v4251_v62, 4  ;;  %v4261_v9 = vrot.slane %v4259_v44, 4  ;;  %v4264_v17 = vrot.slane %v4262_v6, 5  ;;  %v1288_v55 = vadd.f32 %v6594_v2, %v10321_v36  ;;  %v6645_v28 = vpop.f32.mrf.mxu0  ;;  %v6202_v6 = vld [vmem:[%s7359_s13 + $0xcc] sm:$0xe]  ;;  %s6960_s13 = smul.u32 432, %s7350_s7 }
 0x156   : > { %v9588_v51 = vadd.f32 %v1729_v13, %v1277_v38  ;;  %v9595_v10 = vrot.slane %v4268_v34, 5  ;;  %v4274_v30 = vrot.slane %v4272_v3, 4  ;;  %v1279_v48 = vpop.f32.mrf.mxu1  ;;  %v4223_v13 = vsel %vm7390_vm2, %v9557_v47, %v9526_v40  ;;  %s10082_s7 = sand.u32 1, %s7241_s16  }
 0x157   : > { %v4233_v54 = vsel %vm7390_vm2, %v4228_v52, %v9559_v31  ;;  %v4775_v11 = vrot.slane %v9566_v8, 5  ;;  %v9605_v62 = vadd.f32 %v6642_v57, %v1288_v55  ;;  %v1280_v0 = vadd.f32 %v1279_v48, %v10322_v46  ;;  %v10323_v57 = vld [vmem:[#allocation15_spill] sm:$0xff]  ;;  %s9683_s14 = scalar_lea.vmem %s10171_s2, %s6960_s13  ;;  %s260_s22 = scalar_lea.vmem [#allocation3], %s10082_s7 }
 0x158   : > { %6932 = vmatmul.mubr.bf16.gmra.mxu0 %v6246_v39  ;;  %v1745_v39 = vpop.f32.mrf.mxu0  ;;  %v4769_v44 = vsel %vm7701_vm5, %v6217_v59, %v4768_v58  ;;  %v6597_v29 = vpop.f32.mrf.mxu1  ;;  %6884 = vmatmul.mubr.bf16.gmra.mxu1 %v9486_v50  ;;  %v6248_v40 = vcombine.low %v9563_v26, %v4765_v4  ;;  %v4247_v47 = vsel %vm7390_vm2, %v4242_v1, %v9546_v49  ;;  %v4278_v8 = vshll.u32 %v6146_v20, 16  ;;  %v10326_v48 = vld [vmem:[#allocation19_spill] sm:$0xff]  ;;  %s5497_s24 = sshll.u32 %s260_s22, 4  ;;  %s266_s26 = scalar_lea.vmem [#allocation5], %s10082_s7  ;;  %s10094_s24 = int_to_ptr.vmem [resolvable:$true] %s5497_s24 }
 0x159   : > { %6935 = vmatprep.mubr.bf16.mxu0 %v6247_v22  ;;  %v4772_v22 = vsel %vm7701_vm5, %v4770_v5, %v4771_v37  ;;  %v4265_v31 = vor.u32 %v4264_v17, %v4261_v9  ;;  %v9618_v33 = vadd.f32 %v1732_v21, %v1280_v0  ;;  %v1301_v34 = vadd.f32 %v6597_v29, %v10323_v57  ;;  %v10324_v37 = vld [vmem:[#allocation17_spill] sm:$0xff]  ;;  %v10325_v9 = vld [vmem:[#allocation18_spill] sm:$0xff]  ;;  %s5511_s29 = sshll.u32 %s266_s26, 4  ;;  %s5477_s10 = scalar_lea.sflag [#allocation4], %s10082_s7  ;;  %s10101_s29 = int_to_ptr.vmem [resolvable:$true] %s5511_s29 }
 0x15a   : > { %v6646_v58 = vpop.f32.mrf.mxu0  ;;  %6887 = vmatprep.mubr.bf16.mxu1 %v9539_v35  ;;  %v4257_v3 = vsel %vm7390_vm2, %v4252_v60, %v4256_v63  ;;  %v4275_v50 = vor.u32 %v4274_v30, %v9595_v10  ;;  %v1292_v16 = vpop.f32.mrf.mxu1  ;;  %v6249_v26 = vcombine.low %v4769_v44, %v4772_v22  ;;  %v6218_v52 = vrot.slane %v6202_v6, 9  ;;  %v10327_v44 = vld [vmem:[#allocation21_spill] sm:$0xff]  ;;  %s7151_s13 = scalar_lea.vmem %s10094_s24, 16  ;;  %p7158_p1 = scmp.lt.s32.totalorder %s10094_s24, %s7156_s12 }
 0x15b   : > { %v4777_v4 = vrot.slane %v4775_v11, 4  ;;  %v4778_v59 = vrot.slane %v6146_v20, 5  ;;  %v9625_v49 = vadd.f32 %v6645_v28, %v1301_v34  ;;  %v1293_v43 = vadd.f32 %v1292_v16, %v10324_v37  ;;  %v10330_v37 = vld [vmem:[#allocation28_spill] sm:$0xff]  ;;  %p7152_p12 = scmp.ne.s32.totalorder %s10094_s24, %s7151_s13 }
 0x15c   : > { %v1748_v38 = vpop.f32.mrf.mxu0  ;;  %v6598_v21 = vpop.f32.mrf.mxu1  ;;  %v6176_v5 = vcombine.low %v4223_v13, %v4233_v54  ;;  %v6177_v2 = vcombine.low %v4247_v47, %v4257_v3  ;;  %v4266_v1 = vrot.slane %v4265_v31, 4  ;;  %v4276_v17 = vrot.slane %v4275_v50, 4  ;;  %v10328_v47 = vld [vmem:[#allocation23_spill] sm:$0xff] }
 0x15d   : > { %v9628_v35 = vadd.f32 %v1745_v39, %v1293_v43  ;;  %v1304_v63 = vadd.f32 %v6598_v21, %v10325_v9  ;;  %v4280_v36 = vrot.slane %v4278_v8, 5  ;;  %v4776_v28 = vsel %vm7701_vm5, %v6218_v52, %v4775_v11  ;;  %p7153_p13 = pnand %p7152_p12, %p7327_p4 }
 0x15e   : > { %v6649_v60 = vpop.f32.mrf.mxu0  ;;  %v1295_v55 = vpop.f32.mrf.mxu1  ;;  %v4779_v20 = vsel %vm7701_vm5, %v4777_v4, %v4778_v59  ;;  %v4271_v0 = vsel %vm7390_vm2, %v4266_v1, %v9595_v10  ;;  %v10329_v10 = vld [vmem:[#allocation26_spill] sm:$0xff] }
 0x15f   : > { %v9635_v30 = vadd.f32 %v6646_v58, %v1304_v63  ;;  %v1296_v13 = vadd.f32 %v1295_v55, %v10326_v48  ;;  %v4281_v56 = vsel %vm7390_vm2, %v4276_v17, %v4280_v36  ;;  %v6250_v11 = vcombine.low %v4776_v28, %v4779_v20  ;;  %v10332_v17 = vld [vmem:[#allocation30_spill] sm:$0xff]  ;;  %v10333_v20 = vld [vmem:[#allocation31_spill] sm:$0xff]  ;;  %p7154_p0 = pneg %p7153_p13 }
 0x160   : > { %6936 = vmatmul.mubr.bf16.gmra.mxu0 %v6248_v40  ;;  %v1761_v54 = vpop.f32.mrf.mxu0  ;;  %v6601_v46 = vpop.f32.mrf.mxu1  ;;  %6888 = vmatmul.mubr.bf16.gmra.mxu1 %v6176_v5  ;;  %v6178_v34 = vcombine.low %v4271_v0, %v4281_v56  ;;  %v10334_v0 = vld [vmem:[#allocation32_spill] sm:$0xff] }
 0x161   : > { %6939 = vmatprep.mubr.bf16.mxu0 %v6249_v26  ;;  %v9641_v39 = vadd.f32 %v1748_v38, %v1296_v13  ;;  %v1317_v22 = vadd.f32 %v6601_v46, %v10327_v44  ;;  %6891 = vmatprep.mubr.bf16.mxu1 %v6177_v2  ;;  %v10331_v2 = vld [vmem:[#allocation29_spill] sm:$0xff] }
 0x162   : > { %v6650_v6 = vpop.f32.mrf.mxu0  ;;  %v1308_v29 = vpop.f32.mrf.mxu1 }
 0x163   : > { %v9646_v40 = vadd.f32 %v6649_v60, %v1317_v22  ;;  %v1309_v31 = vadd.f32 %v1308_v29, %v10328_v47 }
 0x164   : > { %v1764_v8 = vpop.f32.mrf.mxu0  ;;  %v6602_v57 = vpop.f32.mrf.mxu1 }
 0x165   : > { %v9649_v58 = vadd.f32 %v1761_v54, %v1309_v31  ;;  %v1320_v3 = vadd.f32 %v6602_v57, %v10329_v10 }
 0x166   : > { %v6653_v50 = vpop.f32.mrf.mxu0  ;;  %v1311_v16 = vpop.f32.mrf.mxu1 }
 0x167   : > { %v9652_v26 = vadd.f32 %v6650_v6, %v1320_v3  ;;  %v1312_v27 = vadd.f32 %v1311_v16, %v9242_v32 }
 0x168   : > { %6940 = vmatmul.mubr.bf16.gmra.mxu0 %v6250_v11  ;;  %v1777_v52 = vpop.f32.mrf.mxu0  ;;  %v6605_v4 = vpop.f32.mrf.mxu1  ;;  %6892 = vmatmul.mubr.bf16.gmra.mxu1 %v6178_v34  ;;  %v10335_v11 = vld [vmem:[#allocation33_spill] sm:$0xff]  ;;  %v10336_v34 = vld [vmem:[#allocation34_spill] sm:$0xff] }
 0x169   : > { %v9655_v59 = vadd.f32 %v1764_v8, %v1312_v27  ;;  %v1333_v43 = vadd.f32 %v6605_v4, %v10330_v37  ;;  %v7259_v8 = vmov 0.0  }
 0x16a   : > { %v6654_v38 = vpop.f32.mrf.mxu0  ;;  %v1324_v21 = vpop.f32.mrf.mxu1  ;;  %5279 = vst [vmem:[%s9683_s14 + $0x30] sm:$0xff] %v7259_v8  ;;  %5280 = vst [vmem:[%s9683_s14 + $0x38] sm:$0xff] %v7259_v8 }
 0x16b   : > { %v9658_v5 = vadd.f32 %v6653_v50, %v1333_v43  ;;  %v1325_v1 = vadd.f32 %v1324_v21, %v10331_v2  ;;  %5273 = vst [vmem:[%s9683_s14] sm:$0xff] %v7259_v8  ;;  %5274 = vst [vmem:[%s9683_s14 + $0x8] sm:$0xff] %v7259_v8 }
 0x16c   : > { %v1780_v9 = vpop.f32.mrf.mxu0  ;;  %v6606_v63 = vpop.f32.mrf.mxu1  ;;  %5275 = vst [vmem:[%s9683_s14 + $0x10] sm:$0x3] %v7259_v8  ;;  %5276 = vst [vmem:[%s9683_s14 + $0x18] sm:$0xff] %v7259_v8 }
 0x16d   : > { %v9661_v60 = vadd.f32 %v1777_v52, %v1325_v1  ;;  %v1336_v32 = vadd.f32 %v6606_v63, %v10332_v17  ;;  %5277 = vst [vmem:[%s9683_s14 + $0x20] sm:$0xff] %v7259_v8  ;;  %5278 = vst [vmem:[%s9683_s14 + $0x28] sm:$0x3] %v7259_v8 }
 0x16e   : > { %v6721_v36 = vpop.f32.mrf.mxu0  ;;  %v1327_v55 = vpop.f32.mrf.mxu1  ;;  %5281 = vst [vmem:[%s9683_s14 + $0x40] sm:$0x3] %v7259_v8  ;;  %5282 = vst [vmem:[%s9683_s14 + $0x48] sm:$0xff] %v7259_v8 }
 0x16f   : > { %v9664_v28 = vadd.f32 %v6654_v38, %v1336_v32  ;;  %v1328_v48 = vadd.f32 %v1327_v55, %v10333_v20  ;;  %5283 = vst [vmem:[%s9683_s14 + $0x50] sm:$0xff] %v7259_v8  ;;  %5284 = vst [vmem:[%s9683_s14 + $0x58] sm:$0x3] %v7259_v8 }
 0x170   : > { %v9667_v13 = vpop.f32.mrf.mxu0  ;;  %v6673_v54 = vpop.f32.mrf.mxu1  ;;  %5285 = vst [vmem:[%s9683_s14 + $0x60] sm:$0xff] %v7259_v8  ;;  %5286 = vst [vmem:[%s9683_s14 + $0x68] sm:$0xff] %v7259_v8 }
 0x171   : > { %v9669_v46 = vadd.f32 %v1780_v9, %v1328_v48  ;;  %v2181_v44 = vadd.f32 %v6673_v54, %v10334_v0  ;;  %5287 = vst [vmem:[%s9683_s14 + $0x70] sm:$0x3] %v7259_v8  ;;  %5288 = vst [vmem:[%s9683_s14 + $0x78] sm:$0xff] %v7259_v8 }
 0x172   : > { %v9672_v22 = vpop.f32.mrf.mxu0  ;;  %v2052_v6 = vpop.f32.mrf.mxu1  ;;  %5289 = vst [vmem:[%s9683_s14 + $0x80] sm:$0xff] %v7259_v8  ;;  %5290 = vst [vmem:[%s9683_s14 + $0x88] sm:$0x3] %v7259_v8 }
 0x173   : > { %v9675_v56 = vadd.f32 %v6721_v36, %v2181_v44  ;;  %v2179_v29 = vadd.f32 %v2052_v6, %v10335_v11  ;;  %5291 = vst [vmem:[%s9683_s14 + $0x90] sm:$0xff] %v7259_v8  ;;  %5292 = vst [vmem:[%s9683_s14 + $0x98] sm:$0xff] %v7259_v8 }
 0x174   : > { %v9678_v47 = vpop.f32.mrf.mxu0  ;;  %v6674_v31 = vpop.f32.mrf.mxu1  ;;  %5293 = vst [vmem:[%s9683_s14 + $0xa0] sm:$0x3] %v7259_v8  ;;  %5294 = vst [vmem:[%s9683_s14 + $0xa8] sm:$0xff] %v7259_v8 }
 0x175   : > { %5295 = vst [vmem:[%s9683_s14 + $0xb0] sm:$0xff] %v7259_v8  ;;  %5296 = vst [vmem:[%s9683_s14 + $0xb8] sm:$0x3] %v7259_v8  ;;  %v9740_v57 = vadd.f32 %v9667_v13, %v2179_v29  ;;  %v2182_v10 = vadd.f32 %v6674_v31, %v10336_v34 }
 0x176   : > { %5297 = vst [vmem:[%s9683_s14 + $0xc0] sm:$0xff] %v7259_v8  ;;  %5298 = vst [vmem:[%s9683_s14 + $0xc8] sm:$0xff] %v7259_v8  ;;  %v6725_v3 = vpop.f32.mrf.mxu0  ;;  %v2055_v50 = vpop.f32.mrf.mxu1 }
 0x177   : > { %5299 = vst [vmem:[%s9683_s14 + $0xd0] sm:$0x3] %v7259_v8  ;;  %5300 = vst [vmem:[%s9683_s14 + $0xd8] sm:$0xff] %v7259_v8  ;;  %v9744_v16 = vadd.f32 %v9672_v22, %v2182_v10  ;;  %v2180_v27 = vadd.f32 %v2055_v50, %v9412_v24 }
 0x178   : > { %5301 = vst [vmem:[%s9683_s14 + $0xe0] sm:$0xff] %v7259_v8  ;;  %5302 = vst [vmem:[%s9683_s14 + $0xe8] sm:$0x3] %v7259_v8  ;;  %v2822_v52 = vpop.f32.mrf.mxu0  ;;  %v6677_v4 = vpop.f32.mrf.mxu1 }
 0x179   : > { %5303 = vst [vmem:[%s9683_s14 + $0xf0] sm:$0xff] %v7259_v8  ;;  %5304 = vst [vmem:[%s9683_s14 + $0xf8] sm:$0xff] %v7259_v8  ;;  %v9748_v37 = vadd.f32 %v9678_v47, %v2180_v27  ;;  %v2185_v43 = vadd.f32 %v6677_v4, %v9416_v41 }
 0x17a   : > { %5305 = vst [vmem:[%s9683_s14 + $0x100] sm:$0x3] %v7259_v8  ;;  %5306 = vst [vmem:[%s9683_s14 + $0x108] sm:$0xff] %v7259_v8  ;;  %v6726_v38 = vpop.f32.mrf.mxu0  ;;  %v2068_v21 = vpop.f32.mrf.mxu1 }
 0x17b   : > { %5307 = vst [vmem:[%s9683_s14 + $0x110] sm:$0xff] %v7259_v8  ;;  %5308 = vst [vmem:[%s9683_s14 + $0x118] sm:$0x3] %v7259_v8  ;;  %v9751_v2 = vadd.f32 %v6725_v3, %v2185_v43  ;;  %v2183_v1 = vadd.f32 %v2068_v21, %v9425_v15 }
 0x17c   : > { %5309 = vst [vmem:[%s9683_s14 + $0x120] sm:$0xff] %v7259_v8  ;;  %5310 = vst [vmem:[%s9683_s14 + $0x128] sm:$0xff] %v7259_v8  ;;  %v2825_v9 = vpop.f32.mrf.mxu0  ;;  %v6678_v63 = vpop.f32.mrf.mxu1 }
 0x17d   : > { %5311 = vst [vmem:[%s9683_s14 + $0x130] sm:$0x3] %v7259_v8  ;;  %5312 = vst [vmem:[%s9683_s14 + $0x138] sm:$0xff] %v7259_v8  ;;  %v9754_v17 = vadd.f32 %v2822_v52, %v2183_v1  ;;  %v2186_v32 = vadd.f32 %v6678_v63, %v9451_v53 }
 0x17e   : > { %5313 = vst [vmem:[%s9683_s14 + $0x140] sm:$0xff] %v7259_v8  ;;  %5314 = vst [vmem:[%s9683_s14 + $0x148] sm:$0x3] %v7259_v8  ;;  %v6729_v24 = vpop.f32.mrf.mxu0  ;;  %v2071_v36 = vpop.f32.mrf.mxu1 }
 0x17f   : > { %5315 = vst [vmem:[%s9683_s14 + $0x150] sm:$0xff] %v7259_v8  ;;  %5316 = vst [vmem:[%s9683_s14 + $0x158] sm:$0xff] %v7259_v8  ;;  %v9757_v55 = vadd.f32 %v6726_v38, %v2186_v32  ;;  %v2184_v20 = vadd.f32 %v2071_v36, %v9471_v14 }
 0x180   : > { %5317 = vst [vmem:[%s9683_s14 + $0x160] sm:$0x3] %v7259_v8  ;;  %5318 = vst [vmem:[%s9683_s14 + $0x168] sm:$0xff] %v7259_v8  ;;  %v2838_v48 = vpop.f32.mrf.mxu0  ;;  %v6681_v41 = vpop.f32.mrf.mxu1 }
 0x181   : > { %5319 = vst [vmem:[%s9683_s14 + $0x170] sm:$0xff] %v7259_v8  ;;  %5320 = vst [vmem:[%s9683_s14 + $0x178] sm:$0x3] %v7259_v8  ;;  %v9760_v13 = vadd.f32 %v2825_v9, %v2184_v20  ;;  %v2189_v54 = vadd.f32 %v6681_v41, %v9479_v7 }
 0x182   : > { %5321 = vst [vmem:[%s9683_s14 + $0x180] sm:$0xff] %v7259_v8  ;;  %5322 = vst [vmem:[%s9683_s14 + $0x188] sm:$0xff] %v7259_v8  ;;  %v6730_v0 = vpop.f32.mrf.mxu0  ;;  %v2084_v15 = vpop.f32.mrf.mxu1 }
 0x183   : > { %5323 = vst [vmem:[%s9683_s14 + $0x190] sm:$0x3] %v7259_v8  ;;  %5324 = vst [vmem:[%s9683_s14 + $0x198] sm:$0xff] %v7259_v8  ;;  %v9763_v44 = vadd.f32 %v6729_v24, %v2189_v54  ;;  %v2187_v22 = vadd.f32 %v2084_v15, %v9489_v45 }
 0x184   : > { %5325 = vst [vmem:[%s9683_s14 + $0x1a0] sm:$0xff] %v7259_v8  ;;  %5326 = vst [vmem:[%s9683_s14 + $0x1a8] sm:$0x3] %v7259_v8  ;;  %v2841_v6 = vpop.f32.mrf.mxu0  ;;  %v6682_v53 = vpop.f32.mrf.mxu1 }
 0x185   : > { %v9766_v11 = vadd.f32 %v2838_v48, %v2187_v22  ;;  %v2190_v29 = vadd.f32 %v6682_v53, %v9512_v23 }
 0x186   : > { %v6733_v47 = vpop.f32.mrf.mxu0  ;;  %v2087_v14 = vpop.f32.mrf.mxu1 }
 0x187   : > { %v9769_v31 = vadd.f32 %v6730_v0, %v2190_v29  ;;  %v2188_v8 = vadd.f32 %v2087_v14, %v9529_v18 }
 0x188   : > { %v2854_v34 = vpop.f32.mrf.mxu0  ;;  %v6685_v7 = vpop.f32.mrf.mxu1 }
 0x189   : > { %v9772_v10 = vadd.f32 %v2841_v6, %v2188_v8  ;;  %v2193_v3 = vadd.f32 %v6685_v7, %v9536_v42 }
 0x18a   : > { %v6734_v50 = vpop.f32.mrf.mxu0  ;;  %v2100_v45 = vpop.f32.mrf.mxu1 }
 0x18b   : > { %v9775_v27 = vadd.f32 %v6733_v47, %v2193_v3  ;;  %v2191_v52 = vadd.f32 %v2100_v45, %v9548_v61 }
 0x18c   : > { %v2857_v4 = vpop.f32.mrf.mxu0  ;;  %v6686_v23 = vpop.f32.mrf.mxu1 }
 0x18d   : > { %v9778_v43 = vadd.f32 %v2854_v34, %v2191_v52  ;;  %v2194_v38 = vadd.f32 %v6686_v23, %v9568_v19 }
 0x18e   : > { %v6737_v21 = vpop.f32.mrf.mxu0  ;;  %v2103_v18 = vpop.f32.mrf.mxu1 }
 0x18f   : > { %v9781_v1 = vadd.f32 %v6734_v50, %v2194_v38  ;;  %v2192_v9 = vadd.f32 %v2103_v18, %v9576_v12 }
 0x190   : > { %v2870_v63 = vpop.f32.mrf.mxu0  ;;  %v6689_v42 = vpop.f32.mrf.mxu1 }
 0x191   : > { %v9784_v32 = vadd.f32 %v2857_v4, %v2192_v9  ;;  %v2197_v24 = vadd.f32 %v6689_v42, %v9585_v25 }
 0x192   : > { %v6738_v36 = vpop.f32.mrf.mxu0  ;;  %v2116_v61 = vpop.f32.mrf.mxu1 }
 0x193   : > { %v9787_v20 = vadd.f32 %v6737_v21, %v2197_v24  ;;  %v2195_v48 = vadd.f32 %v2116_v61, %v9588_v51 }
 0x194   : > { %v2873_v41 = vpop.f32.mrf.mxu0  ;;  %v6690_v19 = vpop.f32.mrf.mxu1 }
 0x195   : > { %v9790_v54 = vadd.f32 %v2870_v63, %v2195_v48  ;;  %v2198_v0 = vadd.f32 %v6690_v19, %v9605_v62 }
 0x196   : > { %v6741_v15 = vpop.f32.mrf.mxu0  ;;  %v2119_v12 = vpop.f32.mrf.mxu1 }
 0x197   : > { %v9793_v22 = vadd.f32 %v6738_v36, %v2198_v0  ;;  %v2196_v6 = vadd.f32 %v2119_v12, %v9618_v33 }
 0x198   : > { %v2886_v53 = vpop.f32.mrf.mxu0  ;;  %v6693_v25 = vpop.f32.mrf.mxu1 }
 0x199   : > { %10337 = vst [vmem:[#allocation10_spill] sm:$0xff] %v9793_v22  ;;  %v9796_v29 = vadd.f32 %v2873_v41, %v2196_v6  ;;  %v2201_v47 = vadd.f32 %v6693_v25, %v9625_v49 }
 0x19a   : > { %v6742_v14 = vpop.f32.mrf.mxu0  ;;  %v2132_v51 = vpop.f32.mrf.mxu1 }
 0x19b   : > { %10338 = vst [vmem:[#allocation14_spill] sm:$0xff] %v9796_v29  ;;  %v9799_v8 = vadd.f32 %v6741_v15, %v2201_v47  ;;  %v2199_v34 = vadd.f32 %v2132_v51, %v9628_v35 }
 0x19c   : > { %v2889_v7 = vpop.f32.mrf.mxu0  ;;  %v6694_v62 = vpop.f32.mrf.mxu1 }
 0x19d   : > { %10339 = vst [vmem:[#allocation16_spill] sm:$0xff] %v9799_v8  ;;  %v9802_v3 = vadd.f32 %v2886_v53, %v2199_v34  ;;  %v2202_v50 = vadd.f32 %v6694_v62, %v9635_v30 }
 0x19e   : > { %v6745_v45 = vpop.f32.mrf.mxu0  ;;  %v2135_v33 = vpop.f32.mrf.mxu1 }
 0x19f   : > { %10340 = vst [vmem:[#allocation25_spill] sm:$0xff] %v9802_v3  ;;  %v9805_v52 = vadd.f32 %v6742_v14, %v2202_v50  ;;  %v2200_v4 = vadd.f32 %v2135_v33, %v9641_v39 }
 0x1a0   : > { %v2902_v23 = vpop.f32.mrf.mxu0  ;;  %v6697_v49 = vpop.f32.mrf.mxu1 }
 0x1a1   : > { %10341 = vst [vmem:[#allocation20_spill] sm:$0xff] %v9805_v52  ;;  %v9808_v38 = vadd.f32 %v2889_v7, %v2200_v4  ;;  %v2205_v21 = vadd.f32 %v6697_v49, %v9646_v40 }
 0x1a2   : > { %v6746_v18 = vpop.f32.mrf.mxu0  ;;  %v2148_v35 = vpop.f32.mrf.mxu1 }
 0x1a3   : > { %10342 = vst [vmem:[#allocation22_spill] sm:$0xff] %v9808_v38  ;;  %v9811_v9 = vadd.f32 %v6745_v45, %v2205_v21  ;;  %v2203_v63 = vadd.f32 %v2148_v35, %v9649_v58 }
 0x1a4   : > { %v2905_v42 = vpop.f32.mrf.mxu0  ;;  %v6698_v30 = vpop.f32.mrf.mxu1 }
 0x1a5   : > { %10343 = vst [vmem:[#allocation24_spill] sm:$0xff] %v9811_v9  ;;  %v9814_v24 = vadd.f32 %v2902_v23, %v2203_v63  ;;  %v2206_v36 = vadd.f32 %v6698_v30, %v9652_v26 }
 0x1a6   : > { %v6749_v61 = vpop.f32.mrf.mxu0  ;;  %v2151_v39 = vpop.f32.mrf.mxu1 }
 0x1a7   : > { %10344 = vst [vmem:[#allocation27_spill] sm:$0xff] %v9814_v24  ;;  %v9817_v48 = vadd.f32 %v6746_v18, %v2206_v36  ;;  %v2204_v41 = vadd.f32 %v2151_v39, %v9655_v59 }
 0x1a8   : > { %v2918_v19 = vpop.f32.mrf.mxu0  ;;  %v6701_v40 = vpop.f32.mrf.mxu1 }
 0x1a9   : > { %10345 = vst [vmem:[#allocation9_spill] sm:$0xff] %v9817_v48  ;;  %v9820_v0 = vadd.f32 %v2905_v42, %v2204_v41  ;;  %v2209_v15 = vadd.f32 %v6701_v40, %v9658_v5 }
 0x1aa   : > { %v6750_v12 = vpop.f32.mrf.mxu0  ;;  %v2164_v58 = vpop.f32.mrf.mxu1 }
 0x1ab   : > { %10346 = vst [vmem:[#allocation12_spill] sm:$0xff] %v9820_v0  ;;  %v9823_v6 = vadd.f32 %v6749_v61, %v2209_v15  ;;  %v2207_v53 = vadd.f32 %v2164_v58, %v9661_v60 }
 0x1ac   : > { %v2921_v25 = vpop.f32.mrf.mxu0  ;;  %v6702_v26 = vpop.f32.mrf.mxu1 }
 0x1ad   : > { %10347 = vst [vmem:[#allocation11_spill] sm:$0xff] %v9823_v6  ;;  %v9826_v47 = vadd.f32 %v2918_v19, %v2207_v53  ;;  %v2210_v14 = vadd.f32 %v6702_v26, %v9664_v28 }
 0x1ae   : > { %v9829_v51 = vpop.f32.mrf.mxu0  ;;  %v2167_v59 = vpop.f32.mrf.mxu1 }
 0x1af   : > { %10348 = vst [vmem:[#allocation13_spill] sm:$0xff] %v9826_v47  ;;  %v9831_v34 = vadd.f32 %v6750_v12, %v2210_v14  ;;  %v2208_v7 = vadd.f32 %v2167_v59, %v9669_v46 }
 0x1b0   : > { %v9834_v5 = vpop.f32.mrf.mxu0  ;;  %v6769_v62 = vpop.f32.mrf.mxu1 }
 0x1b1   : > { %10349 = vst [vmem:[#allocation15_spill] sm:$0xff] %v9831_v34  ;;  %v9836_v50 = vadd.f32 %v2921_v25, %v2208_v7 }
 0x1b2   : > { %v9838_v45 = vpop.f32.mrf.mxu0  ;;  %v3304_v60 = vpop.f32.mrf.mxu1 }
 0x1b3   : > { %10350 = vst [vmem:[#allocation17_spill] sm:$0xff] %v9836_v50 }
 0x1b4   : > { %v9840_v33 = vpop.f32.mrf.mxu0  ;;  %v6770_v4 = vpop.f32.mrf.mxu1 }
 0x1b6   : > { %v9842_v23 = vpop.f32.mrf.mxu0  ;;  %v9844_v28 = vpop.f32.mrf.mxu1 }
 0x1b8   : > { %v9846_v49 = vpop.f32.mrf.mxu0  ;;  %v9848_v21 = vpop.f32.mrf.mxu1 }
 0x1ba   : > { %v9850_v46 = vpop.f32.mrf.mxu0  ;;  %v9852_v18 = vpop.f32.mrf.mxu1 }
 0x1bc   : > { %v9854_v35 = vpop.f32.mrf.mxu0  ;;  %v9856_v63 = vpop.f32.mrf.mxu1 }
 0x1be   : > { %v9858_v42 = vpop.f32.mrf.mxu0  ;;  %v9860_v30 = vpop.f32.mrf.mxu1 }
 0x1c0   : > { %v9862_v36 = vpop.f32.mrf.mxu0  ;;  %v9864_v61 = vpop.f32.mrf.mxu1 }
 0x1c2   : > { %v9866_v39 = vpop.f32.mrf.mxu0  ;;  %v9868_v41 = vpop.f32.mrf.mxu1 }
 0x1c4   : > { %v9870_v19 = vpop.f32.mrf.mxu0  ;;  %v9872_v40 = vpop.f32.mrf.mxu1 }
 0x1c6   : > { %v9874_v15 = vpop.f32.mrf.mxu0  ;;  %v9876_v12 = vpop.f32.mrf.mxu1 }
 0x1c8   : > { %v9878_v58 = vpop.f32.mrf.mxu0  ;;  %v9880_v53 = vpop.f32.mrf.mxu1 }
 0x1ca   : > { %v9882_v25 = vpop.f32.mrf.mxu0  ;;  %v9884_v26 = vpop.f32.mrf.mxu1 }
 0x1cc   : > { %v9886_v14 = vpop.f32.mrf.mxu0  ;;  %v9888_v59 = vpop.f32.mrf.mxu1 }
 0x1ce   : > { %v9890_v7 = vpop.f32.mrf.mxu0  ;;  %v9892_v50 = vpop.f32.mrf.mxu1 }
 0x1d0   : > { %v9894_v34 = vpop.f32.mrf.mxu0  ;;  %v9896_v47 = vpop.f32.mrf.mxu1 }
 0x1d1   : > { %10351 = vst [vmem:[#allocation18_spill] sm:$0xff] %v9894_v34 }
 0x1d2   : > { %v9898_v6 = vpop.f32.mrf.mxu0  ;;  %v9900_v0 = vpop.f32.mrf.mxu1 }
 0x1d3   : > { %10352 = vst [vmem:[#allocation19_spill] sm:$0xff] %v9898_v6 }
 0x1d4   : > { %v9902_v48 = vpop.f32.mrf.mxu0  ;;  %v9904_v24 = vpop.f32.mrf.mxu1 }
 0x1d5   : > { %10353 = vst [vmem:[#allocation21_spill] sm:$0xff] %v9902_v48  ;;  %10354 = vst [vmem:[#allocation23_spill] sm:$0xff] %v9904_v24 }
 0x1d6   : > { %v9906_v9 = vpop.f32.mrf.mxu0  ;;  %v9908_v38 = vpop.f32.mrf.mxu1 }
 0x1d7   : > { %10355 = vst [vmem:[#allocation26_spill] sm:$0xff] %v9906_v9  ;;  %10356 = vst [vmem:[#allocation28_spill] sm:$0xff] %v9908_v38 }
 0x1d8   : > { %v9910_v52 = vpop.f32.mrf.mxu0  ;;  %v9912_v3 = vpop.f32.mrf.mxu1 }
 0x1d9   : > { %10357 = vst [vmem:[#allocation29_spill] sm:$0xff] %v9910_v52  ;;  %10358 = vst [vmem:[#allocation30_spill] sm:$0xff] %v9912_v3 }
 0x1da   : > { %v9914_v8 = vpop.f32.mrf.mxu0  ;;  %v9916_v29 = vpop.f32.mrf.mxu1 }
 0x1db   : > { %10359 = vst [vmem:[#allocation31_spill] sm:$0xff] %v9914_v8  ;;  %10360 = vst [vmem:[#allocation32_spill] sm:$0xff] %v9916_v29 }
 0x1dc   : > { %v9918_v34 = vpop.f32.mrf.mxu0  ;;  %v9920_v6 = vpop.f32.mrf.mxu1 }
 0x1dd   : > { %10361 = vst [vmem:[#allocation33_spill] sm:$0xff] %v9918_v34  ;;  %10362 = vst [vmem:[#allocation34_spill] sm:$0xff] %v9920_v6 }
 0x1de   : > { %v9922_v22 = vpop.f32.mrf.mxu0  ;;  %v9924_v48 = vpop.f32.mrf.mxu1 }
 0x1df   : > { %10363 = vst [vmem:[#allocation35_spill] sm:$0xff] %v9922_v22  ;;  %10364 = vst [vmem:[#allocation36_spill] sm:$0xff] %v9924_v48 }
 0x1e0   : > { %v9926_v24 = vpop.f32.mrf.mxu0  ;;  %v9928_v9 = vpop.f32.mrf.mxu1 }
 0x1e1   : > { %10365 = vst [vmem:[#allocation37_spill] sm:$0xff] %v9926_v24  ;;  %10366 = vst [vmem:[#allocation38_spill] sm:$0xff] %v9928_v9 }
 0x1e2   : > { %v9930_v38 = vpop.f32.mrf.mxu0  ;;  %v9932_v52 = vpop.f32.mrf.mxu1 }
 0x1e3   : > { %10367 = vst [vmem:[#allocation39_spill] sm:$0xff] %v9930_v38  ;;  %10368 = vst [vmem:[#allocation40_spill] sm:$0xff] %v9932_v52  ;;  %v3433_v38 = vadd.f32 %v6769_v62, %v9675_v56  ;;  %v3432_v56 = vadd.f32 %v9844_v28, %v9748_v37 }
 0x1e4   : > { %v9934_v3 = vpop.f32.mrf.mxu0  ;;  %v9936_v8 = vpop.f32.mrf.mxu1 }
 0x1e5   : > { %10369 = vst [vmem:[#allocation41_spill] sm:$0xff] %v9934_v3  ;;  %10370 = vst [vmem:[#allocation42_spill] sm:$0xff] %v9936_v8  ;;  %v3431_v3 = vadd.f32 %v3304_v60, %v9740_v57  ;;  %v3437_v60 = vadd.f32 %v9848_v21, %v9751_v2 }
 0x1e6   : > { %v9938_v29 = vpop.f32.mrf.mxu0  ;;  %v9940_v34 = vpop.f32.mrf.mxu1 }
 0x1e7   : > { %10371 = vst [vmem:[#allocation43_spill] sm:$0xff] %v9938_v29  ;;  %10372 = vst [vmem:[#allocation44_spill] sm:$0xff] %v9940_v34  ;;  %v3820_v34 = vadd.f32 %v9829_v51, %v3433_v38 }
 0x1e8   : > { %v9942_v6 = vpop.f32.mrf.mxu0  ;;  %v9944_v22 = vpop.f32.mrf.mxu1 }
 0x1e9   : > { %10373 = vst [vmem:[#allocation45_spill] sm:$0xff] %v9942_v6  ;;  %10374 = vst [vmem:[#allocation46_spill] sm:$0xff] %v9944_v22  ;;  %v3434_v6 = vadd.f32 %v6770_v4, %v9744_v16 }
 0x1ea   : > { %v9946_v48 = vpop.f32.mrf.mxu0  ;;  %v9948_v24 = vpop.f32.mrf.mxu1 }
 0x1eb   : > { %10375 = vst [vmem:[#allocation47_spill] sm:$0xff] %v9946_v48  ;;  %10376 = vst [vmem:[#allocation48_spill] sm:$0xff] %v9948_v24  ;;  %v3818_v24 = vadd.f32 %v9834_v5, %v3431_v3  ;;  %v3821_v57 = vadd.f32 %v9838_v45, %v3434_v6  ;;  %v3435_v3 = vadd.f32 %v9852_v18, %v9754_v17 }
 0x1ec   : > { %v9951_v9 = vpop.f32.mrf.mxu0  ;;  %v9953_v52 = vpop.f32.mrf.mxu1  ;;  %v3824_v6 = vadd.f32 %v9842_v23, %v3437_v60  ;;  %v3436_v45 = vadd.f32 %v9860_v30, %v9760_v13  ;;  %v3441_v23 = vadd.f32 %v9864_v61, %v9763_v44 }
 0x1ed   : > { %10377 = vst [vmem:[#allocation49_spill] sm:$0xff] %v9951_v9  ;;  %10378 = vst [vmem:[#allocation50_spill] sm:$0xff] %v9953_v52  ;;  %v3822_v17 = vadd.f32 %v9846_v49, %v3435_v3  ;;  %v3442_v3 = vadd.f32 %v9872_v40, %v9769_v31 }
 0x1ee   : > { %v9956_v29 = vpop.f32.mrf.mxu1  ;;  %v3823_v49 = vadd.f32 %v9854_v35, %v3436_v45  ;;  %v3828_v61 = vadd.f32 %v9858_v42, %v3441_v23  ;;  %v3445_v23 = vadd.f32 %v9880_v53, %v9775_v27 }
 0x1ef   : > { %v6913_v8 = vpop.f32.mrf.mxu0  ;;  %10379 = vst [vmem:[#allocation51_spill] sm:$0xff] %v9956_v29  ;;  %v3819_v29 = vadd.f32 %v9840_v33, %v3432_v56 }
 0x1f0   : > { %v6865_v48 = vpop.f32.mrf.mxu1 }
 0x1f1   : > { %v4943_v22 = vpop.f32.mrf.mxu0  ;;  %v4574_v62 = vadd.f32 %v6865_v48, %v3820_v34 }
 0x1f2   : > { %v4445_v52 = vpop.f32.mrf.mxu1 }
 0x1f3   : > { %v6914_v9 = vpop.f32.mrf.mxu0  ;;  %v5072_v38 = vadd.f32 %v6913_v8, %v4574_v62  ;;  %v4572_v51 = vadd.f32 %v4445_v52, %v3818_v24  ;;  %v3438_v24 = vadd.f32 %v9856_v63, %v9757_v55 }
 0x1f4   : > { %v6866_v4 = vpop.f32.mrf.mxu1 }
 0x1f5   : > { %v4946_v16 = vpop.f32.mrf.mxu0  ;;  %6261 = vst [vmem:[%s9683_s14 + $0x31] sm:$0xff] %v5072_v38  ;;  %v5070_v37 = vadd.f32 %v4943_v22, %v4572_v51  ;;  %v4575_v48 = vadd.f32 %v6866_v4, %v3821_v57  ;;  %v3825_v13 = vadd.f32 %v9850_v46, %v3438_v24  ;;  %v5400_v57 = vmul.f32 %v5072_v38, %v5072_v38 }
 0x1f6   : > { %v4448_v5 = vpop.f32.mrf.mxu1  ;;  %v3439_v4 = vadd.f32 %v9868_v41, %v9766_v11 }
 0x1f7   : > { %v6917_v34 = vpop.f32.mrf.mxu0  ;;  %6259 = vst [vmem:[%s9683_s14 + $0x19] sm:$0xff] %v5070_v37  ;;  %v5073_v2 = vadd.f32 %v6914_v9, %v4575_v48  ;;  %v4573_v8 = vadd.f32 %v4448_v5, %v3819_v29  ;;  %v5398_v9 = vmul.f32 %v5070_v37, %v5070_v37 }
 0x1f8   : > { %v6869_v33 = vpop.f32.mrf.mxu1  ;;  %v3826_v45 = vadd.f32 %v9862_v36, %v3439_v4 }
 0x1f9   : > { %v4959_v52 = vpop.f32.mrf.mxu0  ;;  %6262 = vst [vmem:[%s9683_s14 + $0x39] sm:$0xff] %v5073_v2  ;;  %v5071_v22 = vadd.f32 %v4946_v16, %v4573_v8  ;;  %v4578_v28 = vadd.f32 %v6869_v33, %v3824_v6  ;;  %v5401_v48 = vmul.f32 %v5073_v2, %v5073_v2  ;;  %v3440_v6 = vadd.f32 %v9876_v12, %v9772_v10 }
 0x1fa   : > { %v4461_v29 = vpop.f32.mrf.mxu1  ;;  %v3829_v33 = vadd.f32 %v9866_v39, %v3442_v3  ;;  %v3444_v3 = vadd.f32 %v9892_v50, %v9784_v32 }
 0x1fb   : > { %v6918_v21 = vpop.f32.mrf.mxu0  ;;  %6260 = vst [vmem:[%s9683_s14 + $0x21] sm:$0xff] %v5071_v22  ;;  %v5360_v18 = vadd.f32 %v5071_v22, %v5070_v37  ;;  %v5399_v56 = vmul.f32 %v5071_v22, %v5071_v22  ;;  %v5076_v55 = vadd.f32 %v6917_v34, %v4578_v28  ;;  %v4576_v63 = vadd.f32 %v4461_v29, %v3822_v17 }
 0x1fc   : > { %v6870_v30 = vpop.f32.mrf.mxu1 }
 0x1fd   : > { %v4962_v62 = vpop.f32.mrf.mxu0  ;;  %v5361_v60 = vadd.f32 %v5360_v18, %v5072_v38  ;;  %v5430_v51 = vadd.f32 %v5399_v56, %v5398_v9  ;;  %6265 = vst [vmem:[%s9683_s14 + $0x61] sm:$0xff] %v5076_v55  ;;  %v5074_v16 = vadd.f32 %v4959_v52, %v4576_v63  ;;  %v4579_v37 = vadd.f32 %v6870_v30, %v3825_v13 }
 0x1fe   : > { %v4464_v46 = vpop.f32.mrf.mxu1  ;;  %v3443_v9 = vadd.f32 %v9884_v26, %v9778_v43  ;;  %v5404_v39 = vmul.f32 %v5076_v55, %v5076_v55  ;;  %v3446_v13 = vadd.f32 %v9888_v59, %v9781_v1 }
 0x1ff   : > { %v6921_v44 = vpop.f32.mrf.mxu0  ;;  %v5431_v34 = vadd.f32 %v5430_v51, %v5400_v57  ;;  %6263 = vst [vmem:[%s9683_s14 + $0x49] sm:$0xff] %v5074_v16  ;;  %v5362_v35 = vadd.f32 %v5361_v60, %v5073_v2  ;;  %v4577_v38 = vadd.f32 %v4464_v46, %v3823_v49  ;;  %v5402_v42 = vmul.f32 %v5074_v16, %v5074_v16 }
 0x200   : > { %v5077_v8 = vadd.f32 %v6918_v21, %v4579_v37  ;;  %v6873_v52 = vpop.f32.mrf.mxu1  ;;  %v3827_v21 = vadd.f32 %v9870_v19, %v3440_v6  ;;  %v3832_v60 = vadd.f32 %v9874_v15, %v3445_v23  ;;  %v3833_v4 = vadd.f32 %v9882_v25, %v3446_v13  ;;  %v10387_v13 = vld [vmem:[#allocation30_spill] sm:$0xff] }
 0x201   : > { %v4975_v5 = vpop.f32.mrf.mxu0  ;;  %v5363_v11 = vadd.f32 %v5362_v35, %v5074_v16  ;;  %v5432_v41 = vadd.f32 %v5431_v34, %v5401_v48  ;;  %v5075_v24 = vadd.f32 %v4962_v62, %v4577_v38  ;;  %v4582_v31 = vadd.f32 %v6873_v52, %v3828_v61 }
 0x202   : > { %6266 = vst [vmem:[%s9683_s14 + $0x69] sm:$0xff] %v5077_v8  ;;  %v4477_v2 = vpop.f32.mrf.mxu1  ;;  %v5405_v19 = vmul.f32 %v5077_v8, %v5077_v8  ;;  %v3449_v37 = vadd.f32 %v9896_v47, %v9787_v20  ;;  %v3831_v52 = vadd.f32 %v9886_v14, %v3444_v3  ;;  %v10392_v3 = vld [vmem:[#allocation34_spill] sm:$0xff] }
 0x203   : > { %v6922_v40 = vpop.f32.mrf.mxu0  ;;  %v5433_v17 = vadd.f32 %v5432_v41, %v5402_v42  ;;  %6264 = vst [vmem:[%s9683_s14 + $0x51] sm:$0xff] %v5075_v24  ;;  %v5364_v22 = vadd.f32 %v5363_v11, %v5075_v24  ;;  %v5403_v28 = vmul.f32 %v5075_v24, %v5075_v24  ;;  %v5080_v10 = vadd.f32 %v6921_v44, %v4582_v31  ;;  %v10380_v41 = vld [vmem:[#allocation10_spill] sm:$0xff]  ;;  %v10381_v24 = vld [vmem:[#allocation23_spill] sm:$0xff] }
 0x204   : > { %v4580_v36 = vadd.f32 %v4477_v2, %v3826_v45  ;;  %v6874_v29 = vpop.f32.mrf.mxu1  ;;  %v3836_v11 = vadd.f32 %v9890_v7, %v3449_v37  ;;  %v3450_v31 = vadd.f32 %v10381_v24, %v10380_v41 }
 0x205   : > { %v4978_v12 = vpop.f32.mrf.mxu0  ;;  %v5365_v18 = vadd.f32 %v5364_v22, %v5076_v55  ;;  %v5434_v56 = vadd.f32 %v5433_v17, %v5403_v28  ;;  %6269 = vst [vmem:[%s9683_s14 + $0x91] sm:$0xff] %v5080_v10  ;;  %v4583_v63 = vadd.f32 %v6874_v29, %v3829_v33  ;;  %v3830_v55 = vadd.f32 %v9878_v58, %v3443_v9  ;;  %v10382_v17 = vld [vmem:[#allocation18_spill] sm:$0xff] }
 0x206   : > { %v5078_v49 = vadd.f32 %v4975_v5, %v4580_v36  ;;  %v4480_v30 = vpop.f32.mrf.mxu1  ;;  %v3447_v5 = vadd.f32 %v9900_v0, %v9790_v54  ;;  %v5408_v25 = vmul.f32 %v5080_v10, %v5080_v10  ;;  %v10383_v28 = vld [vmem:[#allocation14_spill] sm:$0xff] }
 0x207   : > { %v6925_v62 = vpop.f32.mrf.mxu0  ;;  %v5435_v27 = vadd.f32 %v5434_v56, %v5404_v39  ;;  %v5366_v53 = vadd.f32 %v5365_v18, %v5077_v8  ;;  %v5081_v57 = vadd.f32 %v6922_v40, %v4583_v63  ;;  %v4581_v43 = vadd.f32 %v4480_v30, %v3827_v21  ;;  %v10385_v39 = vld [vmem:[#allocation19_spill] sm:$0xff] }
 0x208   : > { %6267 = vst [vmem:[%s9683_s14 + $0x79] sm:$0xff] %v5078_v49  ;;  %v6877_v51 = vpop.f32.mrf.mxu1  ;;  %v5406_v44 = vmul.f32 %v5078_v49, %v5078_v49  ;;  %v3834_v22 = vadd.f32 %v10382_v17, %v3447_v5  ;;  %v3837_v18 = vadd.f32 %v10385_v39, %v3450_v31  ;;  %v10401_v39 = vld [vmem:[#allocation27_spill] sm:$0xff] }
 0x209   : > { %v4991_v26 = vpop.f32.mrf.mxu0  ;;  %v5367_v16 = vadd.f32 %v5366_v53, %v5078_v49  ;;  %v5436_v61 = vadd.f32 %v5435_v27, %v5405_v19  ;;  %6270 = vst [vmem:[%s9683_s14 + $0x99] sm:$0xff] %v5081_v57  ;;  %v5079_v1 = vadd.f32 %v4978_v12, %v4581_v43  ;;  %v4586_v15 = vadd.f32 %v6877_v51, %v3832_v60  ;;  %v10388_v60 = vld [vmem:[#allocation21_spill] sm:$0xff] }
 0x20a   : > { %v4493_v46 = vpop.f32.mrf.mxu1  ;;  %v5409_v54 = vmul.f32 %v5081_v57, %v5081_v57  ;;  %v10389_v51 = vld [vmem:[#allocation25_spill] sm:$0xff] }
 0x20b   : > { %v6926_v59 = vpop.f32.mrf.mxu0  ;;  %v5437_v48 = vadd.f32 %v5436_v61, %v5406_v44  ;;  %6268 = vst [vmem:[%s9683_s14 + $0x81] sm:$0xff] %v5079_v1  ;;  %v5368_v58 = vadd.f32 %v5367_v16, %v5079_v1  ;;  %v5407_v34 = vmul.f32 %v5079_v1, %v5079_v1  ;;  %v4584_v35 = vadd.f32 %v4493_v46, %v3830_v55  ;;  %v10390_v16 = vld [vmem:[#allocation32_spill] sm:$0xff] }
 0x20c   : > { %v5084_v6 = vadd.f32 %v6925_v62, %v4586_v15  ;;  %v6878_v42 = vpop.f32.mrf.mxu1  ;;  %v10386_v62 = vld [vmem:[#allocation16_spill] sm:$0xff]  ;;  %v3451_v44 = vadd.f32 %v10390_v16, %v10389_v51 }
 0x20d   : > { %v4994_v38 = vpop.f32.mrf.mxu0  ;;  %v5369_v32 = vadd.f32 %v5368_v58, %v5080_v10  ;;  %v5438_v50 = vadd.f32 %v5437_v48, %v5407_v34  ;;  %v5082_v8 = vadd.f32 %v4991_v26, %v4584_v35  ;;  %v4587_v20 = vadd.f32 %v6878_v42, %v3833_v4  ;;  %v10384_v10 = vld [vmem:[#allocation28_spill] sm:$0xff]  ;;  %v10393_v34 = vld [vmem:[#allocation26_spill] sm:$0xff] }
 0x20e   : > { %6273 = vst [vmem:[%s9683_s14 + $0xc1] sm:$0xff] %v5084_v6  ;;  %v4496_v40 = vpop.f32.mrf.mxu1  ;;  %v3448_v12 = vadd.f32 %v10384_v10, %v10383_v28  ;;  %v3453_v19 = vadd.f32 %v10387_v13, %v10386_v62  ;;  %v10391_v4 = vld [vmem:[#allocation20_spill] sm:$0xff]  ;;  %v5412_v15 = vmul.f32 %v5084_v6, %v5084_v6  ;;  %v10399_v28 = vld [vmem:[#allocation38_spill] sm:$0xff] }
 0x20f   : > { %v5439_v0 = vadd.f32 %v5438_v50, %v5408_v25  ;;  %6271 = vst [vmem:[%s9683_s14 + $0xa9] sm:$0xff] %v5082_v8  ;;  %v5370_v45 = vadd.f32 %v5369_v32, %v5081_v57  ;;  %v5085_v33 = vadd.f32 %v6926_v59, %v4587_v20  ;;  %v4585_v14 = vadd.f32 %v4496_v40, %v3831_v52  ;;  %v10394_v20 = vld [vmem:[#allocation29_spill] sm:$0xff]  ;;  %v10395_v52 = vld [vmem:[#allocation22_spill] sm:$0xff]  ;;  %v10397_v40 = vld [vmem:[#allocation31_spill] sm:$0xff] }
 0x210   : > { %v6929_v47 = vpop.f32.mrf.mxu0  ;;  %v6881_v7 = vpop.f32.mrf.mxu1  ;;  %v5410_v23 = vmul.f32 %v5082_v8, %v5082_v8  ;;  %v3835_v55 = vadd.f32 %v10388_v60, %v3448_v12  ;;  %v3454_v37 = vadd.f32 %v10392_v3, %v10391_v4  ;;  %v3840_v35 = vadd.f32 %v10393_v34, %v3453_v19  ;;  %v10403_v19 = vld [vmem:[#allocation9_spill] sm:$0xff]  ;;  %v10405_v60 = vld [vmem:[#allocation35_spill] sm:$0xff] }
 0x211   : > { %v5371_v21 = vadd.f32 %v5370_v45, %v5082_v8  ;;  %v5440_v9 = vadd.f32 %v5439_v0, %v5409_v54  ;;  %6274 = vst [vmem:[%s9683_s14 + $0xc9] sm:$0xff] %v5085_v33  ;;  %v4590_v36 = vadd.f32 %v6881_v7, %v3836_v11  ;;  %v5083_v56 = vadd.f32 %v4994_v38, %v4585_v14  ;;  %v10396_v11 = vld [vmem:[#allocation36_spill] sm:$0xff]  ;;  %v10406_v3 = vld [vmem:[#allocation37_spill] sm:$0xff] }
 0x212   : > { %v5007_v2 = vpop.f32.mrf.mxu0  ;;  %v4509_v63 = vpop.f32.mrf.mxu1  ;;  %v5413_v42 = vmul.f32 %v5085_v33, %v5085_v33  ;;  %v3452_v41 = vadd.f32 %v10396_v11, %v10395_v52  ;;  %v3841_v54 = vadd.f32 %v10397_v40, %v3454_v37  ;;  %v10412_v40 = vld [vmem:[#allocation41_spill] sm:$0xff] }
 0x213   : > { %v5441_v49 = vadd.f32 %v5440_v9, %v5410_v23  ;;  %v5088_v30 = vadd.f32 %v6929_v47, %v4590_v36  ;;  %v4588_v27 = vadd.f32 %v4509_v63, %v3834_v22  ;;  %6272 = vst [vmem:[%s9683_s14 + $0xb1] sm:$0xff] %v5083_v56  ;;  %v5372_v57 = vadd.f32 %v5371_v21, %v5083_v56  ;;  %v10398_v22 = vld [vmem:[#allocation24_spill] sm:$0xff]  ;;  %v10400_v36 = vld [vmem:[#allocation33_spill] sm:$0xff] }
 0x214   : > { %v6930_v29 = vpop.f32.mrf.mxu0  ;;  %v5411_v43 = vmul.f32 %v5083_v56, %v5083_v56  ;;  %v6882_v26 = vpop.f32.mrf.mxu1  ;;  %v3838_v47 = vadd.f32 %v10394_v20, %v3451_v44  ;;  %v10411_v20 = vld [vmem:[#allocation46_spill] sm:$0xff] }
 0x215   : > { %6277 = vst [vmem:[%s9683_s14 + $0xf1] sm:$0xff] %v5088_v30  ;;  %v5086_v61 = vadd.f32 %v5007_v2, %v4588_v27  ;;  %v4591_v1 = vadd.f32 %v6882_v26, %v3837_v18  ;;  %v5373_v46 = vadd.f32 %v5372_v57, %v5084_v6  ;;  %v10402_v18 = vld [vmem:[#allocation40_spill] sm:$0xff] }
 0x216   : > { %v5010_v53 = vpop.f32.mrf.mxu0  ;;  %v5442_v48 = vadd.f32 %v5441_v49, %v5411_v43  ;;  %v4512_v58 = vpop.f32.mrf.mxu1  ;;  %v3455_v56 = vadd.f32 %v10402_v18, %v10401_v39  ;;  %v10404_v49 = vld [vmem:[#allocation42_spill] sm:$0xff] }
 0x217   : > { %6275 = vst [vmem:[%s9683_s14 + $0xd9] sm:$0xff] %v5086_v61  ;;  %v5089_v38 = vadd.f32 %v6930_v29, %v4591_v1  ;;  %v4589_v5 = vadd.f32 %v4512_v58, %v3835_v55  ;;  %v5374_v50 = vadd.f32 %v5373_v46, %v5085_v33  ;;  %v5414_v45 = vmul.f32 %v5086_v61, %v5086_v61  ;;  %v10408_v46 = vld [vmem:[#allocation44_spill] sm:$0xff] }
 0x218   : > { %v6933_v59 = vpop.f32.mrf.mxu0  ;;  %v5443_v32 = vadd.f32 %v5442_v48, %v5412_v15  ;;  %v6885_v8 = vpop.f32.mrf.mxu1  ;;  %v3457_v33 = vadd.f32 %v10399_v28, %v10398_v22  ;;  %v3839_v29 = vadd.f32 %v10400_v36, %v3452_v41  ;;  %v3458_v27 = vadd.f32 %v10404_v49, %v10403_v19  ;;  %v10407_v15 = vld [vmem:[#allocation12_spill] sm:$0xff]  ;;  %v10417_v36 = vld [vmem:[#allocation50_spill] sm:$0xff]  ;;  %v10418_v49 = vld [vmem:[#allocation45_spill] sm:$0xff] }
 0x219   : > { %6278 = vst [vmem:[%s9683_s14 + $0xf9] sm:$0xff] %v5089_v38  ;;  %v5087_v6 = vadd.f32 %v5010_v53, %v4589_v5  ;;  %v4594_v24 = vadd.f32 %v6885_v8, %v3840_v35  ;;  %v5375_v0 = vadd.f32 %v5374_v50, %v5086_v61  ;;  %v5416_v53 = vmul.f32 %v5088_v30, %v5088_v30  ;;  %v10409_v35 = vld [vmem:[#allocation39_spill] sm:$0xff] }
 0x21a   : > { %v5023_v25 = vpop.f32.mrf.mxu0  ;;  %v5444_v2 = vadd.f32 %v5443_v32, %v5413_v42  ;;  %v4525_v17 = vpop.f32.mrf.mxu1  ;;  %v3844_v55 = vadd.f32 %v10405_v60, %v3457_v33  ;;  %v5417_v61 = vmul.f32 %v5089_v38, %v5089_v38  ;;  %v3842_v37 = vadd.f32 %v10406_v3, %v3455_v56  ;;  %v10410_v8 = vld [vmem:[#allocation11_spill] sm:$0xff] }
 0x21b   : > { %6276 = vst [vmem:[%s9683_s14 + $0xe1] sm:$0xff] %v5087_v6  ;;  %v5415_v10 = vmul.f32 %v5087_v6, %v5087_v6  ;;  %v5092_v12 = vadd.f32 %v6933_v59, %v4594_v24  ;;  %v4592_v14 = vadd.f32 %v4525_v17, %v3838_v47  ;;  %v5376_v23 = vadd.f32 %v5375_v0, %v5087_v6  ;;  %v10413_v0 = vld [vmem:[#allocation13_spill] sm:$0xff] }
 0x21c   : > { %v6934_v31 = vpop.f32.mrf.mxu0  ;;  %v5445_v21 = vadd.f32 %v5444_v2, %v5414_v45  ;;  %v6886_v9 = vpop.f32.mrf.mxu1  ;;  %v3456_v48 = vadd.f32 %v10408_v46, %v10407_v15  ;;  %v3845_v5 = vadd.f32 %v10409_v35, %v3458_v27  ;;  %v10414_v45 = vld [vmem:[#allocation48_spill] sm:$0xff] }
 0x21d   : > { %6281 = vst [vmem:[%s9683_s14 + $0x121] sm:$0xff] %v5092_v12  ;;  %v5090_v63 = vadd.f32 %v5023_v25, %v4592_v14  ;;  %v4595_v62 = vadd.f32 %v6886_v9, %v3841_v54  ;;  %v5377_v57 = vadd.f32 %v5376_v23, %v5088_v30  ;;  %v3459_v2 = vadd.f32 %v10414_v45, %v10413_v0  ;;  %v10416_v9 = vld [vmem:[#allocation15_spill] sm:$0xff] }
 0x21e   : > { %v5026_v7 = vpop.f32.mrf.mxu0  ;;  %v5446_v43 = vadd.f32 %v5445_v21, %v5415_v10  ;;  %v4528_v26 = vpop.f32.mrf.mxu1  ;;  %v3843_v54 = vadd.f32 %v10412_v40, %v3456_v48  ;;  %v5420_v33 = vmul.f32 %v5092_v12, %v5092_v12  ;;  %v10415_v21 = vld [vmem:[#allocation43_spill] sm:$0xff]  ;;  %v10422_v48 = vld [vmem:[#allocation49_spill] sm:$0xff] }
 0x21f   : > { %6279 = vst [vmem:[%s9683_s14 + $0x109] sm:$0xff] %v5090_v63  ;;  %v5093_v51 = vadd.f32 %v6934_v31, %v4595_v62  ;;  %v4593_v16 = vadd.f32 %v4528_v26, %v3839_v29  ;;  %v5378_v59 = vadd.f32 %v5377_v57, %v5089_v38  ;;  %v5418_v42 = vmul.f32 %v5090_v63, %v5090_v63 }
 0x220   : > { %v6937_v13 = vpop.f32.mrf.mxu0  ;;  %v5447_v1 = vadd.f32 %v5446_v43, %v5416_v53  ;;  %v6889_v4 = vpop.f32.mrf.mxu1  ;;  %v3461_v38 = vadd.f32 %v10411_v20, %v10410_v8  ;;  %v3462_v29 = vadd.f32 %v10417_v36, %v10416_v9  ;;  %v3846_v27 = vadd.f32 %v10418_v49, %v3459_v2  ;;  %v10419_v53 = vld [vmem:[#allocation17_spill] sm:$0xff] }
 0x221   : > { %6282 = vst [vmem:[%s9683_s14 + $0x129] sm:$0xff] %v5093_v51  ;;  %v5091_v30 = vadd.f32 %v5026_v7, %v4593_v16  ;;  %v4598_v58 = vadd.f32 %v6889_v4, %v3844_v55  ;;  %v5379_v25 = vadd.f32 %v5378_v59, %v5090_v63  ;;  %v5421_v56 = vmul.f32 %v5093_v51, %v5093_v51 }
 0x222   : > { %v5039_v44 = vpop.f32.mrf.mxu0  ;;  %v5448_v32 = vadd.f32 %v5447_v1, %v5417_v61  ;;  %v4541_v50 = vpop.f32.mrf.mxu1  ;;  %v3848_v23 = vadd.f32 %v10415_v21, %v3461_v38  ;;  %v10421_v61 = vld [vmem:[#allocation47_spill] sm:$0xff] }
 0x223   : > { %6280 = vst [vmem:[%s9683_s14 + $0x111] sm:$0xff] %v5091_v30  ;;  %v5419_v47 = vmul.f32 %v5091_v30, %v5091_v30  ;;  %v5096_v52 = vadd.f32 %v6937_v13, %v4598_v58  ;;  %v4596_v11 = vadd.f32 %v4541_v50, %v3842_v37  ;;  %v5380_v24 = vadd.f32 %v5379_v25, %v5091_v30 }
 0x224   : > { %v6938_v34 = vpop.f32.mrf.mxu0  ;;  %v5449_v6 = vadd.f32 %v5448_v32, %v5418_v42  ;;  %v6890_v31 = vpop.f32.mrf.mxu1  ;;  %v3849_v1 = vadd.f32 %v10421_v61, %v3462_v29 }
 0x225   : > { %6285 = vst [vmem:[%s9683_s14 + $0x151] sm:$0xff] %v5096_v52  ;;  %v5094_v17 = vadd.f32 %v5039_v44, %v4596_v11  ;;  %v4599_v22 = vadd.f32 %v6890_v31, %v3845_v5  ;;  %v5381_v10 = vadd.f32 %v5380_v24, %v5092_v12  ;;  %v10420_v12 = vld [vmem:[#allocation51_spill] sm:$0xff]  ;;  %v5424_v35 = vmul.f32 %v5096_v52, %v5096_v52 }
 0x226   : > { %v5042_v41 = vpop.f32.mrf.mxu0  ;;  %v5450_v14 = vadd.f32 %v5449_v6, %v5419_v47  ;;  %v4544_v7 = vpop.f32.mrf.mxu1  ;;  %v3460_v57 = vadd.f32 %v10420_v12, %v10419_v53 }
 0x227   : > { %6283 = vst [vmem:[%s9683_s14 + $0x139] sm:$0xff] %v5094_v17  ;;  %v5097_v39 = vadd.f32 %v6938_v34, %v4599_v22  ;;  %v4597_v18 = vadd.f32 %v4544_v7, %v3843_v54  ;;  %v5382_v62 = vadd.f32 %v5381_v10, %v5093_v51  ;;  %v5422_v55 = vmul.f32 %v5094_v17, %v5094_v17 }
 0x228   : > { %v6941_v28 = vpop.f32.mrf.mxu0  ;;  %v5451_v63 = vadd.f32 %v5450_v14, %v5420_v33  ;;  %v6893_v13 = vpop.f32.mrf.mxu1  ;;  %v3847_v30 = vadd.f32 %v10422_v48, %v3460_v57 }
 0x229   : > { %6286 = vst [vmem:[%s9683_s14 + $0x159] sm:$0xff] %v5097_v39  ;;  %v5095_v43 = vadd.f32 %v5042_v41, %v4597_v18  ;;  %v4602_v26 = vadd.f32 %v6893_v13, %v3848_v23  ;;  %v5383_v60 = vadd.f32 %v5382_v62, %v5094_v17  ;;  %v5425_v8 = vmul.f32 %v5097_v39, %v5097_v39 }
 0x22a   : > { %v5055_v19 = vpop.f32.mrf.mxu0  ;;  %v5452_v16 = vadd.f32 %v5451_v63, %v5421_v56  ;;  %v4557_v44 = vpop.f32.mrf.mxu1 }
 0x22b   : > { %6284 = vst [vmem:[%s9683_s14 + $0x141] sm:$0xff] %v5095_v43  ;;  %v5423_v51 = vmul.f32 %v5095_v43, %v5095_v43  ;;  %v5100_v59 = vadd.f32 %v6941_v28, %v4602_v26  ;;  %v4600_v4 = vadd.f32 %v4557_v44, %v3846_v27  ;;  %v5384_v37 = vadd.f32 %v5383_v60, %v5095_v43 }
 0x22c   : > { %v5453_v3 = vadd.f32 %v5452_v16, %v5422_v55  ;;  %v6894_v15 = vpop.f32.mrf.mxu1  ;;  %v6942_v46 = vpop.f32.mrf.mxu0 }
 0x22d   : > { %6289 = vst [vmem:[%s9683_s14 + $0x181] sm:$0xff] %v5100_v59  ;;  %v5098_v58 = vadd.f32 %v5055_v19, %v4600_v4  ;;  %v4603_v34 = vadd.f32 %v6894_v15, %v3849_v1  ;;  %v5385_v5 = vadd.f32 %v5384_v37, %v5096_v52  ;;  %v5428_v52 = vmul.f32 %v5100_v59, %v5100_v59 }
 0x22e   : > { %v5454_v25 = vadd.f32 %v5453_v3, %v5423_v51  ;;  %v4560_v42 = vpop.f32.mrf.mxu1  ;;  %v5058_v47 = vpop.f32.mrf.mxu0 }
 0x22f   : > { %6287 = vst [vmem:[%s9683_s14 + $0x169] sm:$0xff] %v5098_v58  ;;  %v5101_v32 = vadd.f32 %v6942_v46, %v4603_v34  ;;  %v4601_v50 = vadd.f32 %v4560_v42, %v3847_v30  ;;  %v5386_v38 = vadd.f32 %v5385_v5, %v5097_v39  ;;  %v5426_v6 = vmul.f32 %v5098_v58, %v5098_v58 }
 0x230   : > { %v5455_v20 = vadd.f32 %v5454_v25, %v5424_v35 }
 0x231   : > { %6290 = vst [vmem:[%s9683_s14 + $0x189] sm:$0xff] %v5101_v32  ;;  %v5099_v11 = vadd.f32 %v5058_v47, %v4601_v50  ;;  %v5387_v41 = vadd.f32 %v5386_v38, %v5098_v58  ;;  %v5429_v2 = vmul.f32 %v5101_v32, %v5101_v32 }
 0x232   : > { %v5456_v24 = vadd.f32 %v5455_v20, %v5425_v8 }
 0x233   : > { %6288 = vst [vmem:[%s9683_s14 + $0x171] sm:$0xff] %v5099_v11  ;;  %v5427_v31 = vmul.f32 %v5099_v11, %v5099_v11  ;;  %v5388_v54 = vadd.f32 %v5387_v41, %v5099_v11  ;;  %s7157_s14 = scalar_lea.vmem %s7156_s12, 32 }
 0x234   : > { %v5457_v40 = vadd.f32 %v5456_v24, %v5426_v6  ;;  %p7159_p2 = scmp.lt.s32.totalorder %s7157_s14, %s7151_s13 }
 0x235   : > { %v5389_v0 = vadd.f32 %v5388_v54, %v5100_v59 }
 0x236   : > { %v5458_v45 = vadd.f32 %v5457_v40, %v5427_v31  ;;  %p7160_p3 = por %p7159_p2, %p7158_p1 }
 0x237   : > { %v5390_v17 = vadd.f32 %v5389_v0, %v5101_v32 }
 0x238   : > { %v5459_v22 = vadd.f32 %v5458_v45, %v5428_v52  ;;  %p7161_p5 = pnand %p7160_p3, %p7154_p0 }
 0x239   : > { %v5391_v28 = vrot.slane %v5390_v17, 4 }
 0x23a   : > { %v5460_v33 = vadd.f32 %v5459_v22, %v5429_v2 }
 0x23b   : > { %v5392_v10 = vadd.f32 %v5391_v28, %v5390_v17 }
 0x23c   : > { %v5461_v14 = vrot.slane %v5460_v33, 4 }
 0x23d   : > { %v5393_v7 = vrot.slane %v5392_v10, 2 }
 0x23e   : > { %v5462_v21 = vadd.f32 %v5461_v14, %v5460_v33 }
 0x23f   : > { %v5394_v23 = vadd.f32 %v5393_v7, %v5392_v10 }
 0x240   : > { %v5463_v9 = vrot.slane %v5462_v21, 2 }
 0x241   : > { %v5395_v36 = vrot.slane %v5394_v23, 1 }
 0x242   : > { %v5464_v29 = vadd.f32 %v5463_v9, %v5462_v21 }
 0x243   : > { %v5396_v39 = vadd.f32 %v5395_v36, %v5394_v23 }
 0x244   : > { %v5465_v18 = vrot.slane %v5464_v29, 1 }
 0x245   : > { %5397 = vst [vmem:[%s260_s22] sm:$0x1] %v5396_v39 }
 0x246   : > { %v5466_v56 = vadd.f32 %v5465_v18, %v5464_v29 }
 0x247   : > { %7164 = shalt.err (!%p7161_p5)
}
 0x248   : > { %s7165_s21 = scalar_lea.hbm %s10092_s6, 16  ;;  %s7169_s5 = scalar_lea.hbm %s10172_s3, 32 }
 0x249   : > { %p7166_p6 = scmp.ne.s32.totalorder %s10092_s6, %s7165_s21  ;;  %p7170_p10 = scmp.lt.s32.totalorder %s10092_s6, %s10172_s3 }
 0x24a   : > { %p7171_p11 = scmp.lt.s32.totalorder %s7169_s5, %s7165_s21 }
 0x24b   : > { %p7167_p7 = pnand %p7166_p6, %p7327_p4 }
 0x24c   : > { %p7172_p12 = por %p7171_p11, %p7170_p10 }
 0x24d   : > { %p7168_p9 = pneg %p7167_p7 }
 0x24f   : > { %p7173_p13 = pnand %p7172_p12, %p7168_p9 }
 0x251   : > { %7176 = shalt.err (!%p7173_p13)
}
 0x252   : > { %6961 = dma.vmem_to_hbm [thread:$0]  (%p7327_p4), %s10094_s24, 16, %s10092_s6, %s5477_s10   ;;  %5467 = vst [vmem:[%s266_s26] sm:$0x1] %v5466_v56 }
 0x253   : > { %s5481_s13 = scalar_lea.sflag [#allocation6], %s10082_s7  ;;  %s7177_s11 = scalar_lea.vmem %s10101_s29, 16 }
 0x254   : > { %p7178_p0 = scmp.ne.s32.totalorder %s10101_s29, %s7177_s11  ;;  %s7261_s12 = smov [#allocation5]  }
 0x255   : > { %s7181_s14 = sshll.u32 %s7261_s12, 4  ;;  %s7182_s14 = int_to_ptr.vmem [resolvable:$false] %s7181_s14 }
 0x256   : > { %p7179_p1 = pnand %p7178_p0, %p7327_p4  ;;  %s7183_s21 = scalar_lea.vmem %s7182_s14, 32 }
 0x257   : > { %p7184_p3 = scmp.lt.s32.totalorder %s10101_s29, %s7182_s14  ;;  %p7185_p5 = scmp.lt.s32.totalorder %s7183_s21, %s7177_s11 }
 0x258   : > { %p7180_p2 = pneg %p7179_p1 }
 0x259   : > { %p7186_p6 = por %p7185_p5, %p7184_p3 }
 0x25b   : > { %p7187_p7 = pnand %p7186_p6, %p7180_p2 }
 0x25d   : > { %7190 = shalt.err (!%p7187_p7)
}
 0x25e   : > { %s7191_s24 = scalar_lea.hbm %s10099_s9, 16  ;;  %s7195_s6 = scalar_lea.hbm %s10173_s4, 32 }
 0x25f   : > { %p7192_p9 = scmp.ne.s32.totalorder %s10099_s9, %s7191_s24  ;;  %p7196_p12 = scmp.lt.s32.totalorder %s10099_s9, %s10173_s4 }
 0x260   : > { %p7197_p13 = scmp.lt.s32.totalorder %s7195_s6, %s7191_s24 }
 0x261   : > { %p7193_p10 = pnand %p7192_p9, %p7327_p4 }
 0x262   : > { %p7198_p0 = por %p7197_p13, %p7196_p12 }
 0x263   : > { %p7194_p11 = pneg %p7193_p10 }
 0x265   : > { %p7199_p1 = pnand %p7198_p0, %p7194_p11 }
 0x267   : > { %7202 = shalt.err (!%p7199_p1)
}
 0x268   : > { %6962 = dma.vmem_to_hbm [thread:$0]  (%p7327_p4), %s10101_s29, 16, %s10099_s9, %s5481_s13  }
 0x269 PF: > { %p6972_p2 = scmp.ge.s32.totalorder %s7257_s20, 2  ;;  %s5534_s30 = sand.u32 1, %s7237_s15  }
 0x26a   : > { %s5535_s5 = scalar_lea.sflag [#allocation4], %s5534_s30 }
 0x26b   : > { %p6966_p3 = pnand %p6972_p2, %p7334_p8 }
 0x26d   : > { %p6967_p5 = pneg %p6966_p3 }
 0x26f   : > { %7228 = dma.done.wait (%p6967_p5), %s5535_s5, 16  }
 0x270   : > { %7230 = vsyncadd (%p6967_p5), %s5535_s5, 4294967280  ;;  %s5543_s18 = scalar_lea.sflag [#allocation6], %s5534_s30 }
 0x271   : > { %7232 = dma.done.wait (%p6967_p5), %s5543_s18, 16  }
 0x272   : > { %7234 = vsyncadd (%p6967_p5), %s5543_s18, 4294967280  ;;  %s21_s20 = sadd.s32 1, %s7257_s20   ;;  %s10423_s15 = smov %s7241_s16 }
 0x273   : > { %p18_p6 = scmp.ge.s32.totalorder %s21_s20, 4   ;;  %s10424_s16 = smov %s7245_s17 }
 0x274   : > { %s10425_s17 = smov %s7340_s28  ;;  %s10426_s18 = smov %s7253_s19 }
 0x275   : > { %s10427_s19 = smov %s10429_s23  ;;  %20 = sbr.rel (!%p18_p6) target bundleno = 6 (0x6), region = 118 }
 0x27a   :  { %5547 = vsyncpa [#allocation4], 1 }
 0x27b   :  { %5549 = vsyncpa [#allocation4 + $0x1], 1 }
 0x27c   :  { %5550 = vsyncpa [#allocation6], 1 }
 0x27d   :  { %5552 = vsyncpa [#allocation6 + $0x1], 1 }

</bundles_post_ra>
